<compile_context>
chip_gen: v5e
topology: v5e:2x2
jax: 0.10.0
libtpu: 0.0.40
codegen_flags: <defaults>
</compile_context>

<pallas_src>
import jax
import jax.numpy as jnp
from jax import lax
from jax.experimental import pallas as pl
from jax.experimental.pallas import tpu as pltpu


_IM2COL_MAX_CIN = 128                    # below: K=Cin underfills MXU -> im2col
_VMEM_LIMIT_BYTES = 48 * 1024 * 1024     # > default scoped limit, < v7x physical


# -----------------------------------------------------------------------------
# In-kernel helpers
# -----------------------------------------------------------------------------
def _zero_halo(xp_ref):
    """Zero only the 4 border strips of the padded scratch (the interior is
    fully overwritten by every _fill_taps call)."""
    Hp, Wp, C = xp_ref.shape
    zrow = jnp.zeros((1, Wp, C), xp_ref.dtype)
    xp_ref[0:1, :, :] = zrow
    xp_ref[Hp - 1:Hp, :, :] = zrow
    zcol = jnp.zeros((Hp, 1, C), xp_ref.dtype)
    xp_ref[:, 0:1, :] = zcol
    xp_ref[:, Wp - 1:Wp, :] = zcol


def _fill_taps(src_hwc, xp_ref, col_ref):
    """Write src (H, W, C) into the padded scratch interior and, for small Cin,
    build the flat bf16 im2col buffer (H*W, 9*C)."""
    H, W, C = src_hwc.shape
    xp_ref[1:H + 1, 1:W + 1, :] = src_hwc.astype(xp_ref.dtype)
    if C < _IM2COL_MAX_CIN:
        for dy in range(3):
            for dx in range(3):
                k = dy * 3 + dx
                col_ref[:, k * C:(k + 1) * C] = (
                    xp_ref[dy:dy + H, dx:dx + W, :]
                    .reshape(H * W, C).astype(col_ref.dtype))


def _conv_bn(xp_ref, col_ref, H, W, C, wmat_ref, scale, bias):
    """3x3 conv (taps prepared by _fill_taps) + folded BN affine; f32 (H*W, Nout)."""
    if C < _IM2COL_MAX_CIN:
        # Single 2-D MXU matmul: (H*W, 9C) x (9C, Nout), bf16 operands, f32 acc.
        y = jnp.dot(col_ref[...], wmat_ref[...],
                    preferred_element_type=jnp.float32)
    else:
        # K=Cin already fills the MXU depth: accumulate 9 shifted-window dots,
        # skipping the im2col copy traffic entirely.
        nout = wmat_ref.shape[1]
        y = jnp.zeros((H * W, nout), jnp.float32)
        for dy in range(3):
            for dx in range(3):
                k = dy * 3 + dx
                tap = (xp_ref[dy:dy + H, dx:dx + W, :]
                       .reshape(H * W, C).astype(jnp.bfloat16))
                y = y + jnp.dot(tap, wmat_ref[k * C:(k + 1) * C, :],
                                preferred_element_type=jnp.float32)
    return y * scale + bias


# -----------------------------------------------------------------------------
# Fused kernels (one grid step == one batch element)
# -----------------------------------------------------------------------------
def _block_dec_s1_kernel(x_ref, w2_ref, s2_ref, b2_ref, w1_ref, s1_ref, b1_ref,
                         o_ref, xp_ref, col_ref):
    _, H, W, C = x_ref.shape
    _zero_halo(xp_ref)
    xv = x_ref[0]                                               # (H, W, C) f32

    # out = relu(bn2(conv2(x)))
    _fill_taps(xv, xp_ref, col_ref)
    out = jnp.maximum(
        _conv_bn(xp_ref, col_ref, H, W, C, w2_ref, s2_ref[0], b2_ref[0]), 0.0)

    # out = relu(bn1(conv1(out)) + x)
    _fill_taps(out.reshape(H, W, C), xp_ref, col_ref)
    out = _conv_bn(xp_ref, col_ref, H, W, C, w1_ref, s1_ref[0], b1_ref[0])
    o_ref[0] = jnp.maximum(out.reshape(H, W, C) + xv, 0.0).astype(o_ref.dtype)


def _block_dec_s2_kernel(x_ref, w2_ref, s2_ref, b2_ref,
                         w1_ref, s1_ref, b1_ref,
                         wsc_ref, ssc_ref, bsc_ref,
                         o_ref, xp_ref, col_ref):
    _, H, W, C = x_ref.shape
    P4 = o_ref.shape[3]                                          # 4 * planes
    _zero_halo(xp_ref)
    xv = x_ref[0]                                                # (H, W, C) f32

    # Taps of x are shared by conv2 and the (upsample-folded) shortcut conv.
    _fill_taps(xv, xp_ref, col_ref)
    out = jnp.maximum(
        _conv_bn(xp_ref, col_ref, H, W, C, w2_ref, s2_ref[0], b2_ref[0]), 0.0)
    shortcut = _conv_bn(xp_ref, col_ref, H, W, C, wsc_ref, ssc_ref[0], bsc_ref[0])
    # Park shortcut in the VMEM-resident output block instead of keeping the
    # (H*W, 4*planes) value live across the second im2col + matmul (no spill).
    o_ref[0] = shortcut.reshape(H, W, P4).astype(o_ref.dtype)

    # main branch: bn1(conv1(upsample2x(out))) with the upsample folded into
    # phase-packed weights -> (H*W, 4*planes), phases packed along channels.
    _fill_taps(out.reshape(H, W, C), xp_ref, col_ref)
    main = _conv_bn(xp_ref, col_ref, H, W, C, w1_ref, s1_ref[0], b1_ref[0])
    o_ref[0] = jnp.maximum(main.reshape(H, W, P4) + o_ref[0], 0.0).astype(o_ref.dtype)


# -----------------------------------------------------------------------------
# Weight / BN preparation (wrapper side, pure JAX, runs once)
# -----------------------------------------------------------------------------
def _fold_bn(gamma, beta, mean, var, conv_bias=None, eps=1e-5):
    scale = gamma / jnp.sqrt(var + eps)
    bias = beta - mean * scale
    if conv_bias is not None:
        bias = bias + scale * conv_bias
    return scale.astype(jnp.float32), bias.astype(jnp.float32)


def _pack_conv_weights(w_hwio):
    """(3,3,Cin,Cout) -> (9*Cin, Cout) bf16, matching the im2col tap layout."""
    kh, kw, cin, cout = w_hwio.shape
    return w_hwio.astype(jnp.float32).reshape(kh * kw * cin, cout).astype(jnp.bfloat16)


# G[phase, neighborhood_offset_on_unupsampled_padded_input, original_tap]
# (fold of a 2x nearest upsample into a 3-tap conv along one axis)
_PHASE_G = jnp.array(
    [[[1., 0., 0.],
      [0., 1., 1.],
      [0., 0., 0.]],
     [[0., 0., 0.],
      [1., 1., 0.],
      [0., 0., 1.]]], dtype=jnp.float32)


def _pack_upsampled_conv_weights(w_hwio):
    """Fold conv3x3(nearest_upsample_2x(t)) into weights applied directly to t.

    Returns (9*Cin, 4*Cout) bf16: row block k = r*3+s is the im2col tap on the
    un-upsampled, 1-padded input; column block p = py*2+px is the output phase
    (py, px) of the 2x-upsampled result."""
    _, _, cin, cout = w_hwio.shape
    wp = jnp.einsum('ard,bse,decf->rscabf', _PHASE_G, _PHASE_G,
                    w_hwio.astype(jnp.float32))            # (3,3,Cin,2,2,Cout)
    return wp.reshape(9 * cin, 4 * cout).astype(jnp.bfloat16)


def _col_scratch_shape(H, W, C):
    if C < _IM2COL_MAX_CIN:
        return (H * W, 9 * C)
    return (8, 128)   # dummy; the direct-accumulation path never touches it


# -----------------------------------------------------------------------------
# pallas_call wrappers
# -----------------------------------------------------------------------------
def _basic_block_dec_s1(x_nhwc, w2, s2, b2, w1, s1, b1):
    N, H, W, C = x_nhwc.shape
    flops = 2 * 2 * N * H * W * (9 * C) * C
    bytes_accessed = (4 * x_nhwc.size + 2 * (w2.size + w1.size)
                      + 4 * N * H * W * C)
    return pl.pallas_call(
        _block_dec_s1_kernel,
        out_shape=jax.ShapeDtypeStruct((N, H, W, C), jnp.float32),
        grid_spec=pltpu.PrefetchScalarGridSpec(
            num_scalar_prefetch=0,
            grid=(N,),
            in_specs=[
                pl.BlockSpec((1, H, W, C), lambda n: (n, 0, 0, 0)),
                pl.BlockSpec((9 * C, C), lambda n: (0, 0)),
                pl.BlockSpec((1, C), lambda n: (0, 0)),
                pl.BlockSpec((1, C), lambda n: (0, 0)),
                pl.BlockSpec((9 * C, C), lambda n: (0, 0)),
                pl.BlockSpec((1, C), lambda n: (0, 0)),
                pl.BlockSpec((1, C), lambda n: (0, 0)),
            ],
            out_specs=pl.BlockSpec((1, H, W, C), lambda n: (n, 0, 0, 0)),
            scratch_shapes=[
                pltpu.VMEM((H + 2, W + 2, C), jnp.float32),          # padded input
                pltpu.VMEM(_col_scratch_shape(H, W, C), jnp.bfloat16),  # im2col
            ]),
        compiler_params=pltpu.CompilerParams(
            dimension_semantics=("parallel",),
            vmem_limit_bytes=_VMEM_LIMIT_BYTES),
        cost_estimate=pl.CostEstimate(flops=int(flops), transcendentals=0,
                                      bytes_accessed=int(bytes_accessed)),
    )(x_nhwc, w2, s2.reshape(1, C), b2.reshape(1, C),
      w1, s1.reshape(1, C), b1.reshape(1, C))


def _basic_block_dec_s2(x_nhwc, w2, s2, b2, w1p, s1p, b1p, wscp, sscp, bscp):
    N, H, W, C = x_nhwc.shape
    P4 = int(w1p.shape[1])                                # 4 * planes
    flops = 2 * N * H * W * (9 * C) * (C + 2 * P4)
    bytes_accessed = (4 * x_nhwc.size + 2 * (w2.size + w1p.size + wscp.size)
                      + 4 * N * H * W * P4)
    return pl.pallas_call(
        _block_dec_s2_kernel,
        out_shape=jax.ShapeDtypeStruct((N, H, W, P4), jnp.float32),
        grid_spec=pltpu.PrefetchScalarGridSpec(
            num_scalar_prefetch=0,
            grid=(N,),
            in_specs=[
                pl.BlockSpec((1, H, W, C), lambda n: (n, 0, 0, 0)),
                pl.BlockSpec((9 * C, C), lambda n: (0, 0)),
                pl.BlockSpec((1, C), lambda n: (0, 0)),
                pl.BlockSpec((1, C), lambda n: (0, 0)),
                pl.BlockSpec((9 * C, P4), lambda n: (0, 0)),
                pl.BlockSpec((1, P4), lambda n: (0, 0)),
                pl.BlockSpec((1, P4), lambda n: (0, 0)),
                pl.BlockSpec((9 * C, P4), lambda n: (0, 0)),
                pl.BlockSpec((1, P4), lambda n: (0, 0)),
                pl.BlockSpec((1, P4), lambda n: (0, 0)),
            ],
            out_specs=pl.BlockSpec((1, H, W, P4), lambda n: (n, 0, 0, 0)),
            scratch_shapes=[
                pltpu.VMEM((H + 2, W + 2, C), jnp.float32),
                pltpu.VMEM(_col_scratch_shape(H, W, C), jnp.bfloat16),
            ]),
        compiler_params=pltpu.CompilerParams(
            dimension_semantics=("parallel",),
            vmem_limit_bytes=_VMEM_LIMIT_BYTES),
        cost_estimate=pl.CostEstimate(flops=int(flops), transcendentals=0,
                                      bytes_accessed=int(bytes_accessed)),
    )(x_nhwc, w2, s2.reshape(1, C), b2.reshape(1, C),
      w1p, s1p.reshape(1, P4), b1p.reshape(1, P4),
      wscp, sscp.reshape(1, P4), bscp.reshape(1, P4))


# -----------------------------------------------------------------------------
# Public forward (NCHW in / NCHW out, like the PyTorch module)
# -----------------------------------------------------------------------------
def basic_block_dec(x_nchw, params, stride):
    N, C, H, W = x_nchw.shape
    x = jnp.transpose(x_nchw, (0, 2, 3, 1)).astype(jnp.float32)   # NCHW -> NHWC

    bn2 = params["bn2"]
    s2, b2 = _fold_bn(bn2["gamma"], bn2["beta"], bn2["mean"], bn2["var"])
    bn1 = params["bn1"]

    if stride == 1:
        s1, b1 = _fold_bn(bn1["gamma"], bn1["beta"], bn1["mean"], bn1["var"])
        y = _basic_block_dec_s1(x, _pack_conv_weights(params["w2"]), s2, b2,
                                _pack_conv_weights(params["w1"]), s1, b1)
        return jnp.transpose(y, (0, 3, 1, 2))                     # NHWC -> NCHW

    assert stride == 2, "only stride in {1, 2} supported"
    planes = C // stride
    s1, b1 = _fold_bn(bn1["gamma"], bn1["beta"], bn1["mean"], bn1["var"],
                      conv_bias=params["b1"])
    bn_sc = params["bn_sc"]
    ssc, bsc = _fold_bn(bn_sc["gamma"], bn_sc["beta"], bn_sc["mean"],
                        bn_sc["var"], conv_bias=params["b_sc"])

    y_packed = _basic_block_dec_s2(
        x, _pack_conv_weights(params["w2"]), s2, b2,
        _pack_upsampled_conv_weights(params["w1"]),
        jnp.tile(s1, 4), jnp.tile(b1, 4),
        _pack_upsampled_conv_weights(params["w_sc"]),
        jnp.tile(ssc, 4), jnp.tile(bsc, 4))

    # De-interleave phase-packed output and go to NCHW in one pass:
    # packed[n, i, j, (py*2+px)*planes + co] == out[n, co, 2i+py, 2j+px]
    y6 = y_packed.reshape(N, H, W, 2, 2, planes)
    y = jnp.transpose(y6, (0, 5, 1, 3, 2, 4)).reshape(N, planes, 2 * H, 2 * W)
    return y


# -----------------------------------------------------------------------------
# Parameter setup
# -----------------------------------------------------------------------------
def _bn_params(key, c):
    k1, k2, k3, k4 = jax.random.split(key, 4)
    return dict(
        gamma=1.0 + 0.1 * jax.random.normal(k1, (c,), jnp.float32),
        beta=0.1 * jax.random.normal(k2, (c,), jnp.float32),
        mean=0.1 * jax.random.normal(k3, (c,), jnp.float32),
        var=jnp.abs(1.0 + 0.1 * jax.random.normal(k4, (c,), jnp.float32)),
    )


def init_basic_block_dec(key, in_planes, stride):
    planes = in_planes // stride
    keys = jax.random.split(key, 8)
    p = {
        "w2": 0.1 * jax.random.normal(keys[0], (3, 3, in_planes, in_planes), jnp.float32),
        "bn2": _bn_params(keys[1], in_planes),
        "bn1": _bn_params(keys[2], planes),
        "w1": 0.1 * jax.random.normal(keys[3], (3, 3, in_planes, planes), jnp.float32),
    }
    if stride == 1:
        p["b1"] = None
    else:  # ResizeConv2d convs have bias=True
        p["b1"] = 0.1 * jax.random.normal(keys[4], (planes,), jnp.float32)
        p["w_sc"] = 0.1 * jax.random.normal(keys[5], (3, 3, in_planes, planes), jnp.float32)
        p["b_sc"] = 0.1 * jax.random.normal(keys[6], (planes,), jnp.float32)
        p["bn_sc"] = _bn_params(keys[7], planes)
    return p


# -----------------------------------------------------------------------------
# Pure-JAX reference (correctness check)
# -----------------------------------------------------------------------------
def _upsample_nearest(x_nhwc, factor):
    return jnp.repeat(jnp.repeat(x_nhwc, factor, axis=1), factor, axis=2)


def _ref_conv3x3(x_nhwc, w_hwio, conv_bias=None):
    y = lax.conv_general_dilated(
        x_nhwc, w_hwio, window_strides=(1, 1), padding=((1, 1), (1, 1)),
        dimension_numbers=("NHWC", "HWIO", "NHWC"))
    if conv_bias is not None:
        y = y + conv_bias
    return y


def _ref_bn(x, bn, eps=1e-5):
    return bn["gamma"] * (x - bn["mean"]) / jnp.sqrt(bn["var"] + eps) + bn["beta"]


def basic_block_dec_ref(x_nchw, params, stride):
    x = jnp.transpose(x_nchw, (0, 2, 3, 1)).astype(jnp.float32)
    out = jax.nn.relu(_ref_bn(_ref_conv3x3(x, params["w2"]), params["bn2"]))
    if stride == 1:
        out = _ref_bn(_ref_conv3x3(out, params["w1"]), params["bn1"]) + x
    else:
        up_out = _upsample_nearest(out, stride)
        up_x = _upsample_nearest(x, stride)
        out = _ref_bn(_ref_conv3x3(up_out, params["w1"], params["b1"]), params["bn1"])
        out = out + _ref_bn(_ref_conv3x3(up_x, params["w_sc"], params["b_sc"]),
                            params["bn_sc"])
    out = jax.nn.relu(out)
    return jnp.transpose(out, (0, 3, 1, 2))


# -----------------------------------------------------------------------------
if __name__ == "__main__":
    key = jax.random.PRNGKey(0)
    kx, kp1, kp2 = jax.random.split(key, 3)

    N, C, H, W = 2, 4, 16, 16
    x = jax.random.normal(kx, (N, C, H, W), jnp.float32)

    # bf16 MXU operands (f32 accumulate) -> slightly looser tolerance than f32.
    TOL = 3e-2

    # stride=1 path (identity shortcut)
    params1 = init_basic_block_dec(kp1, in_planes=C, stride=1)
    y1 = jax.block_until_ready(basic_block_dec(x, params1, stride=1))
    r1 = basic_block_dec_ref(x, params1, stride=1)
    assert y1.shape == (N, C, H, W)
    assert jnp.allclose(y1, r1, atol=TOL, rtol=TOL), "stride=1 mismatch"

    # stride=2 path (ResizeConv2d upsample folded into phase-packed weights)
    params2 = init_basic_block_dec(kp2, in_planes=C, stride=2)
    y2 = jax.block_until_ready(basic_block_dec(x, params2, stride=2))
    r2 = basic_block_dec_ref(x, params2, stride=2)
    assert y2.shape == (N, C // 2, 2 * H, 2 * W)
    assert jnp.allclose(y2, r2, atol=TOL, rtol=TOL), "stride=2 mismatch"

    print("KERNEL_OK")
</pallas_src>

<mosaic_0001>
module attributes {stable_mosaic.version = 11 : i64} {
  func.func @_block_dec_s1_kernel(%arg0: i32, %arg1: memref<1x16x16x4xf32, #tpu.memory_space<vmem>>, %arg2: memref<36x4xbf16, #tpu.memory_space<vmem>>, %arg3: memref<1x4xf32, #tpu.memory_space<vmem>>, %arg4: memref<1x4xf32, #tpu.memory_space<vmem>>, %arg5: memref<36x4xbf16, #tpu.memory_space<vmem>>, %arg6: memref<1x4xf32, #tpu.memory_space<vmem>>, %arg7: memref<1x4xf32, #tpu.memory_space<vmem>>, %arg8: memref<1x16x16x4xf32, #tpu.memory_space<vmem>>, %arg9: memref<18x18x4xf32, #tpu.memory_space<vmem>>, %arg10: memref<256x36xbf16, #tpu.memory_space<vmem>>) attributes {dimension_semantics = [#tpu.dimension_semantics<parallel>], iteration_bounds = array<i64: 2>, scalar_prefetch = 0 : i64, scratch_operands = 2 : i64, tpu.core_type = #tpu.core_type<tc>, window_params = [{transform_indices = @transform_0, window_bounds = array<i64: 1, 16, 16, 4>}, {pipeline_mode = #tpu.pipeline_mode<synchronous>, transform_indices = @transform_1, window_bounds = array<i64: 36, 4>}, {pipeline_mode = #tpu.pipeline_mode<synchronous>, transform_indices = @transform_2, window_bounds = array<i64: 1, 4>}, {pipeline_mode = #tpu.pipeline_mode<synchronous>, transform_indices = @transform_3, window_bounds = array<i64: 1, 4>}, {pipeline_mode = #tpu.pipeline_mode<synchronous>, transform_indices = @transform_4, window_bounds = array<i64: 36, 4>}, {pipeline_mode = #tpu.pipeline_mode<synchronous>, transform_indices = @transform_5, window_bounds = array<i64: 1, 4>}, {pipeline_mode = #tpu.pipeline_mode<synchronous>, transform_indices = @transform_6, window_bounds = array<i64: 1, 4>}, {transform_indices = @transform_7, window_bounds = array<i64: 1, 16, 16, 4>}]} {
    %cst = arith.constant 0.000000e+00 : f32
    %0 = vector.broadcast %cst : f32 to vector<1x18x4xf32>
    %c0 = arith.constant 0 : index
    %c0_0 = arith.constant 0 : index
    %c0_1 = arith.constant 0 : index
    %1 = vector.load %arg9[%c0, %c0_0, %c0_1] : memref<18x18x4xf32, #tpu.memory_space<vmem>>, vector<1x18x4xf32>
    tpu.vector_store %arg9[%c0, %c0_0, %c0_1], %0 {strides = array<i32>} : memref<18x18x4xf32, #tpu.memory_space<vmem>>, vector<1x18x4xf32>,
    %c17 = arith.constant 17 : index
    %c0_2 = arith.constant 0 : index
    %c0_3 = arith.constant 0 : index
    %2 = vector.load %arg9[%c17, %c0_2, %c0_3] : memref<18x18x4xf32, #tpu.memory_space<vmem>>, vector<1x18x4xf32>
    tpu.vector_store %arg9[%c17, %c0_2, %c0_3], %0 {strides = array<i32>} : memref<18x18x4xf32, #tpu.memory_space<vmem>>, vector<1x18x4xf32>,
    %cst_4 = arith.constant 0.000000e+00 : f32
    %3 = vector.broadcast %cst_4 : f32 to vector<18x1x4xf32>
    %c0_5 = arith.constant 0 : index
    %c0_6 = arith.constant 0 : index
    %c0_7 = arith.constant 0 : index
    %4 = vector.load %arg9[%c0_5, %c0_6, %c0_7] : memref<18x18x4xf32, #tpu.memory_space<vmem>>, vector<18x1x4xf32>
    tpu.vector_store %arg9[%c0_5, %c0_6, %c0_7], %3 {strides = array<i32>} : memref<18x18x4xf32, #tpu.memory_space<vmem>>, vector<18x1x4xf32>,
    %c0_8 = arith.constant 0 : index
    %c17_9 = arith.constant 17 : index
    %c0_10 = arith.constant 0 : index
    %5 = vector.load %arg9[%c0_8, %c17_9, %c0_10] : memref<18x18x4xf32, #tpu.memory_space<vmem>>, vector<18x1x4xf32>
    tpu.vector_store %arg9[%c0_8, %c17_9, %c0_10], %3 {strides = array<i32>} : memref<18x18x4xf32, #tpu.memory_space<vmem>>, vector<18x1x4xf32>,
    %c0_11 = arith.constant 0 : index
    %c0_12 = arith.constant 0 : index
    %c0_13 = arith.constant 0 : index
    %c0_14 = arith.constant 0 : index
    %6 = vector.load %arg1[%c0_11, %c0_12, %c0_13, %c0_14] : memref<1x16x16x4xf32, #tpu.memory_space<vmem>>, vector<1x16x16x4xf32>
    %7 = vector.shape_cast %6 : vector<1x16x16x4xf32> to vector<16x16x4xf32>
    %c1 = arith.constant 1 : index
    %c1_15 = arith.constant 1 : index
    %c0_16 = arith.constant 0 : index
    %8 = vector.load %arg9[%c1, %c1_15, %c0_16] : memref<18x18x4xf32, #tpu.memory_space<vmem>>, vector<16x16x4xf32>
    tpu.vector_store %arg9[%c1, %c1_15, %c0_16], %7 {strides = array<i32>} : memref<18x18x4xf32, #tpu.memory_space<vmem>>, vector<16x16x4xf32>,
    %c0_17 = arith.constant 0 : index
    %c0_18 = arith.constant 0 : index
    %c0_19 = arith.constant 0 : index
    %9 = vector.load %arg9[%c0_17, %c0_18, %c0_19] : memref<18x18x4xf32, #tpu.memory_space<vmem>>, vector<16x16x4xf32>
    %10 = vector.shape_cast %9 : vector<16x16x4xf32> to vector<256x4xf32>
    %11 = arith.truncf %10 : vector<256x4xf32> to vector<256x4xbf16>
    %c0_20 = arith.constant 0 : index
    %c0_21 = arith.constant 0 : index
    %12 = vector.load %arg10[%c0_20, %c0_21] : memref<256x36xbf16, #tpu.memory_space<vmem>>, vector<256x4xbf16>
    tpu.vector_store %arg10[%c0_20, %c0_21], %11 {strides = array<i32>} : memref<256x36xbf16, #tpu.memory_space<vmem>>, vector<256x4xbf16>,
    %c0_22 = arith.constant 0 : index
    %c1_23 = arith.constant 1 : index
    %c0_24 = arith.constant 0 : index
    %13 = vector.load %arg9[%c0_22, %c1_23, %c0_24] : memref<18x18x4xf32, #tpu.memory_space<vmem>>, vector<16x16x4xf32>
    %14 = vector.shape_cast %13 : vector<16x16x4xf32> to vector<256x4xf32>
    %15 = arith.truncf %14 : vector<256x4xf32> to vector<256x4xbf16>
    %c0_25 = arith.constant 0 : index
    %c4 = arith.constant 4 : index
    %16 = vector.load %arg10[%c0_25, %c4] : memref<256x36xbf16, #tpu.memory_space<vmem>>, vector<256x4xbf16>
    tpu.vector_store %arg10[%c0_25, %c4], %15 {strides = array<i32>} : memref<256x36xbf16, #tpu.memory_space<vmem>>, vector<256x4xbf16>,
    %c0_26 = arith.constant 0 : index
    %c2 = arith.constant 2 : index
    %c0_27 = arith.constant 0 : index
    %17 = vector.load %arg9[%c0_26, %c2, %c0_27] : memref<18x18x4xf32, #tpu.memory_space<vmem>>, vector<16x16x4xf32>
    %18 = vector.shape_cast %17 : vector<16x16x4xf32> to vector<256x4xf32>
    %19 = arith.truncf %18 : vector<256x4xf32> to vector<256x4xbf16>
    %c0_28 = arith.constant 0 : index
    %c8 = arith.constant 8 : index
    %20 = vector.load %arg10[%c0_28, %c8] : memref<256x36xbf16, #tpu.memory_space<vmem>>, vector<256x4xbf16>
    tpu.vector_store %arg10[%c0_28, %c8], %19 {strides = array<i32>} : memref<256x36xbf16, #tpu.memory_space<vmem>>, vector<256x4xbf16>,
    %c1_29 = arith.constant 1 : index
    %c0_30 = arith.constant 0 : index
    %c0_31 = arith.constant 0 : index
    %21 = vector.load %arg9[%c1_29, %c0_30, %c0_31] : memref<18x18x4xf32, #tpu.memory_space<vmem>>, vector<16x16x4xf32>
    %22 = vector.shape_cast %21 : vector<16x16x4xf32> to vector<256x4xf32>
    %23 = arith.truncf %22 : vector<256x4xf32> to vector<256x4xbf16>
    %c0_32 = arith.constant 0 : index
    %c12 = arith.constant 12 : index
    %24 = vector.load %arg10[%c0_32, %c12] : memref<256x36xbf16, #tpu.memory_space<vmem>>, vector<256x4xbf16>
    tpu.vector_store %arg10[%c0_32, %c12], %23 {strides = array<i32>} : memref<256x36xbf16, #tpu.memory_space<vmem>>, vector<256x4xbf16>,
    %c1_33 = arith.constant 1 : index
    %c1_34 = arith.constant 1 : index
    %c0_35 = arith.constant 0 : index
    %25 = vector.load %arg9[%c1_33, %c1_34, %c0_35] : memref<18x18x4xf32, #tpu.memory_space<vmem>>, vector<16x16x4xf32>
    %26 = vector.shape_cast %25 : vector<16x16x4xf32> to vector<256x4xf32>
    %27 = arith.truncf %26 : vector<256x4xf32> to vector<256x4xbf16>
    %c0_36 = arith.constant 0 : index
    %c16 = arith.constant 16 : index
    %28 = vector.load %arg10[%c0_36, %c16] : memref<256x36xbf16, #tpu.memory_space<vmem>>, vector<256x4xbf16>
    tpu.vector_store %arg10[%c0_36, %c16], %27 {strides = array<i32>} : memref<256x36xbf16, #tpu.memory_space<vmem>>, vector<256x4xbf16>,
    %c1_37 = arith.constant 1 : index
    %c2_38 = arith.constant 2 : index
    %c0_39 = arith.constant 0 : index
    %29 = vector.load %arg9[%c1_37, %c2_38, %c0_39] : memref<18x18x4xf32, #tpu.memory_space<vmem>>, vector<16x16x4xf32>
    %30 = vector.shape_cast %29 : vector<16x16x4xf32> to vector<256x4xf32>
    %31 = arith.truncf %30 : vector<256x4xf32> to vector<256x4xbf16>
    %c0_40 = arith.constant 0 : index
    %c20 = arith.constant 20 : index
    %32 = vector.load %arg10[%c0_40, %c20] : memref<256x36xbf16, #tpu.memory_space<vmem>>, vector<256x4xbf16>
    tpu.vector_store %arg10[%c0_40, %c20], %31 {strides = array<i32>} : memref<256x36xbf16, #tpu.memory_space<vmem>>, vector<256x4xbf16>,
    %c2_41 = arith.constant 2 : index
    %c0_42 = arith.constant 0 : index
    %c0_43 = arith.constant 0 : index
    %33 = vector.load %arg9[%c2_41, %c0_42, %c0_43] : memref<18x18x4xf32, #tpu.memory_space<vmem>>, vector<16x16x4xf32>
    %34 = vector.shape_cast %33 : vector<16x16x4xf32> to vector<256x4xf32>
    %35 = arith.truncf %34 : vector<256x4xf32> to vector<256x4xbf16>
    %c0_44 = arith.constant 0 : index
    %c24 = arith.constant 24 : index
    %36 = vector.load %arg10[%c0_44, %c24] : memref<256x36xbf16, #tpu.memory_space<vmem>>, vector<256x4xbf16>
    tpu.vector_store %arg10[%c0_44, %c24], %35 {strides = array<i32>} : memref<256x36xbf16, #tpu.memory_space<vmem>>, vector<256x4xbf16>,
    %c2_45 = arith.constant 2 : index
    %c1_46 = arith.constant 1 : index
    %c0_47 = arith.constant 0 : index
    %37 = vector.load %arg9[%c2_45, %c1_46, %c0_47] : memref<18x18x4xf32, #tpu.memory_space<vmem>>, vector<16x16x4xf32>
    %38 = vector.shape_cast %37 : vector<16x16x4xf32> to vector<256x4xf32>
    %39 = arith.truncf %38 : vector<256x4xf32> to vector<256x4xbf16>
    %c0_48 = arith.constant 0 : index
    %c28 = arith.constant 28 : index
    %40 = vector.load %arg10[%c0_48, %c28] : memref<256x36xbf16, #tpu.memory_space<vmem>>, vector<256x4xbf16>
    tpu.vector_store %arg10[%c0_48, %c28], %39 {strides = array<i32>} : memref<256x36xbf16, #tpu.memory_space<vmem>>, vector<256x4xbf16>,
    %c2_49 = arith.constant 2 : index
    %c2_50 = arith.constant 2 : index
    %c0_51 = arith.constant 0 : index
    %41 = vector.load %arg9[%c2_49, %c2_50, %c0_51] : memref<18x18x4xf32, #tpu.memory_space<vmem>>, vector<16x16x4xf32>
    %42 = vector.shape_cast %41 : vector<16x16x4xf32> to vector<256x4xf32>
    %43 = arith.truncf %42 : vector<256x4xf32> to vector<256x4xbf16>
    %c0_52 = arith.constant 0 : index
    %c32 = arith.constant 32 : index
    %44 = vector.load %arg10[%c0_52, %c32] : memref<256x36xbf16, #tpu.memory_space<vmem>>, vector<256x4xbf16>
    tpu.vector_store %arg10[%c0_52, %c32], %43 {strides = array<i32>} : memref<256x36xbf16, #tpu.memory_space<vmem>>, vector<256x4xbf16>,
    %c0_53 = arith.constant 0 : index
    %c0_54 = arith.constant 0 : index
    %45 = vector.load %arg3[%c0_53, %c0_54] : memref<1x4xf32, #tpu.memory_space<vmem>>, vector<1x4xf32>
    %46 = vector.shape_cast %45 : vector<1x4xf32> to vector<4xf32>
    %c0_55 = arith.constant 0 : index
    %c0_56 = arith.constant 0 : index
    %47 = vector.load %arg4[%c0_55, %c0_56] : memref<1x4xf32, #tpu.memory_space<vmem>>, vector<1x4xf32>
    %48 = vector.shape_cast %47 : vector<1x4xf32> to vector<4xf32>
    %c0_57 = arith.constant 0 : index
    %c0_58 = arith.constant 0 : index
    %49 = vector.load %arg10[%c0_57, %c0_58] : memref<256x36xbf16, #tpu.memory_space<vmem>>, vector<256x36xbf16>
    %c0_59 = arith.constant 0 : index
    %c0_60 = arith.constant 0 : index
    %50 = vector.load %arg2[%c0_59, %c0_60] : memref<36x4xbf16, #tpu.memory_space<vmem>>, vector<36x4xbf16>
    %cst_61 = arith.constant dense<0.000000e+00> : vector<256x4xf32>
    %51 = tpu.matmul %49, %50, %cst_61 {dimension_numbers = #tpu.dot_dimension_numbers<[1], [0], [0], [1], [0, 0, 1, 1], [], []>} : vector<256x36xbf16>, vector<36x4xbf16>, vector<256x4xf32> -> vector<256x4xf32>
    %52 = vector.shape_cast %46 : vector<4xf32> to vector<1x4xf32>
    %53 = vector.broadcast %52 : vector<1x4xf32> to vector<256x4xf32>
    %54 = arith.mulf %51, %53 : vector<256x4xf32>
    %55 = vector.shape_cast %48 : vector<4xf32> to vector<1x4xf32>
    %56 = vector.broadcast %55 : vector<1x4xf32> to vector<256x4xf32>
    %57 = arith.addf %54, %56 : vector<256x4xf32>
    %cst_62 = arith.constant 0.000000e+00 : f32
    %58 = vector.broadcast %cst_62 : f32 to vector<256x4xf32>
    %59 = arith.maximumf %57, %58 : vector<256x4xf32>
    %60 = vector.shape_cast %59 : vector<256x4xf32> to vector<16x16x4xf32>
    %c1_63 = arith.constant 1 : index
    %c1_64 = arith.constant 1 : index
    %c0_65 = arith.constant 0 : index
    %61 = vector.load %arg9[%c1_63, %c1_64, %c0_65] : memref<18x18x4xf32, #tpu.memory_space<vmem>>, vector<16x16x4xf32>
    tpu.vector_store %arg9[%c1_63, %c1_64, %c0_65], %60 {strides = array<i32>} : memref<18x18x4xf32, #tpu.memory_space<vmem>>, vector<16x16x4xf32>,
    %c0_66 = arith.constant 0 : index
    %c0_67 = arith.constant 0 : index
    %c0_68 = arith.constant 0 : index
    %62 = vector.load %arg9[%c0_66, %c0_67, %c0_68] : memref<18x18x4xf32, #tpu.memory_space<vmem>>, vector<16x16x4xf32>
    %63 = vector.shape_cast %62 : vector<16x16x4xf32> to vector<256x4xf32>
    %64 = arith.truncf %63 : vector<256x4xf32> to vector<256x4xbf16>
    %c0_69 = arith.constant 0 : index
    %c0_70 = arith.constant 0 : index
    %65 = vector.load %arg10[%c0_69, %c0_70] : memref<256x36xbf16, #tpu.memory_space<vmem>>, vector<256x4xbf16>
    tpu.vector_store %arg10[%c0_69, %c0_70], %64 {strides = array<i32>} : memref<256x36xbf16, #tpu.memory_space<vmem>>, vector<256x4xbf16>,
    %c0_71 = arith.constant 0 : index
    %c1_72 = arith.constant 1 : index
    %c0_73 = arith.constant 0 : index
    %66 = vector.load %arg9[%c0_71, %c1_72, %c0_73] : memref<18x18x4xf32, #tpu.memory_space<vmem>>, vector<16x16x4xf32>
    %67 = vector.shape_cast %66 : vector<16x16x4xf32> to vector<256x4xf32>
    %68 = arith.truncf %67 : vector<256x4xf32> to vector<256x4xbf16>
    %c0_74 = arith.constant 0 : index
    %c4_75 = arith.constant 4 : index
    %69 = vector.load %arg10[%c0_74, %c4_75] : memref<256x36xbf16, #tpu.memory_space<vmem>>, vector<256x4xbf16>
    tpu.vector_store %arg10[%c0_74, %c4_75], %68 {strides = array<i32>} : memref<256x36xbf16, #tpu.memory_space<vmem>>, vector<256x4xbf16>,
    %c0_76 = arith.constant 0 : index
    %c2_77 = arith.constant 2 : index
    %c0_78 = arith.constant 0 : index
    %70 = vector.load %arg9[%c0_76, %c2_77, %c0_78] : memref<18x18x4xf32, #tpu.memory_space<vmem>>, vector<16x16x4xf32>
    %71 = vector.shape_cast %70 : vector<16x16x4xf32> to vector<256x4xf32>
    %72 = arith.truncf %71 : vector<256x4xf32> to vector<256x4xbf16>
    %c0_79 = arith.constant 0 : index
    %c8_80 = arith.constant 8 : index
    %73 = vector.load %arg10[%c0_79, %c8_80] : memref<256x36xbf16, #tpu.memory_space<vmem>>, vector<256x4xbf16>
    tpu.vector_store %arg10[%c0_79, %c8_80], %72 {strides = array<i32>} : memref<256x36xbf16, #tpu.memory_space<vmem>>, vector<256x4xbf16>,
    %c1_81 = arith.constant 1 : index
    %c0_82 = arith.constant 0 : index
    %c0_83 = arith.constant 0 : index
    %74 = vector.load %arg9[%c1_81, %c0_82, %c0_83] : memref<18x18x4xf32, #tpu.memory_space<vmem>>, vector<16x16x4xf32>
    %75 = vector.shape_cast %74 : vector<16x16x4xf32> to vector<256x4xf32>
    %76 = arith.truncf %75 : vector<256x4xf32> to vector<256x4xbf16>
    %c0_84 = arith.constant 0 : index
    %c12_85 = arith.constant 12 : index
    %77 = vector.load %arg10[%c0_84, %c12_85] : memref<256x36xbf16, #tpu.memory_space<vmem>>, vector<256x4xbf16>
    tpu.vector_store %arg10[%c0_84, %c12_85], %76 {strides = array<i32>} : memref<256x36xbf16, #tpu.memory_space<vmem>>, vector<256x4xbf16>,
    %c1_86 = arith.constant 1 : index
    %c1_87 = arith.constant 1 : index
    %c0_88 = arith.constant 0 : index
    %78 = vector.load %arg9[%c1_86, %c1_87, %c0_88] : memref<18x18x4xf32, #tpu.memory_space<vmem>>, vector<16x16x4xf32>
    %79 = vector.shape_cast %78 : vector<16x16x4xf32> to vector<256x4xf32>
    %80 = arith.truncf %79 : vector<256x4xf32> to vector<256x4xbf16>
    %c0_89 = arith.constant 0 : index
    %c16_90 = arith.constant 16 : index
    %81 = vector.load %arg10[%c0_89, %c16_90] : memref<256x36xbf16, #tpu.memory_space<vmem>>, vector<256x4xbf16>
    tpu.vector_store %arg10[%c0_89, %c16_90], %80 {strides = array<i32>} : memref<256x36xbf16, #tpu.memory_space<vmem>>, vector<256x4xbf16>,
    %c1_91 = arith.constant 1 : index
    %c2_92 = arith.constant 2 : index
    %c0_93 = arith.constant 0 : index
    %82 = vector.load %arg9[%c1_91, %c2_92, %c0_93] : memref<18x18x4xf32, #tpu.memory_space<vmem>>, vector<16x16x4xf32>
    %83 = vector.shape_cast %82 : vector<16x16x4xf32> to vector<256x4xf32>
    %84 = arith.truncf %83 : vector<256x4xf32> to vector<256x4xbf16>
    %c0_94 = arith.constant 0 : index
    %c20_95 = arith.constant 20 : index
    %85 = vector.load %arg10[%c0_94, %c20_95] : memref<256x36xbf16, #tpu.memory_space<vmem>>, vector<256x4xbf16>
    tpu.vector_store %arg10[%c0_94, %c20_95], %84 {strides = array<i32>} : memref<256x36xbf16, #tpu.memory_space<vmem>>, vector<256x4xbf16>,
    %c2_96 = arith.constant 2 : index
    %c0_97 = arith.constant 0 : index
    %c0_98 = arith.constant 0 : index
    %86 = vector.load %arg9[%c2_96, %c0_97, %c0_98] : memref<18x18x4xf32, #tpu.memory_space<vmem>>, vector<16x16x4xf32>
    %87 = vector.shape_cast %86 : vector<16x16x4xf32> to vector<256x4xf32>
    %88 = arith.truncf %87 : vector<256x4xf32> to vector<256x4xbf16>
    %c0_99 = arith.constant 0 : index
    %c24_100 = arith.constant 24 : index
    %89 = vector.load %arg10[%c0_99, %c24_100] : memref<256x36xbf16, #tpu.memory_space<vmem>>, vector<256x4xbf16>
    tpu.vector_store %arg10[%c0_99, %c24_100], %88 {strides = array<i32>} : memref<256x36xbf16, #tpu.memory_space<vmem>>, vector<256x4xbf16>,
    %c2_101 = arith.constant 2 : index
    %c1_102 = arith.constant 1 : index
    %c0_103 = arith.constant 0 : index
    %90 = vector.load %arg9[%c2_101, %c1_102, %c0_103] : memref<18x18x4xf32, #tpu.memory_space<vmem>>, vector<16x16x4xf32>
    %91 = vector.shape_cast %90 : vector<16x16x4xf32> to vector<256x4xf32>
    %92 = arith.truncf %91 : vector<256x4xf32> to vector<256x4xbf16>
    %c0_104 = arith.constant 0 : index
    %c28_105 = arith.constant 28 : index
    %93 = vector.load %arg10[%c0_104, %c28_105] : memref<256x36xbf16, #tpu.memory_space<vmem>>, vector<256x4xbf16>
    tpu.vector_store %arg10[%c0_104, %c28_105], %92 {strides = array<i32>} : memref<256x36xbf16, #tpu.memory_space<vmem>>, vector<256x4xbf16>,
    %c2_106 = arith.constant 2 : index
    %c2_107 = arith.constant 2 : index
    %c0_108 = arith.constant 0 : index
    %94 = vector.load %arg9[%c2_106, %c2_107, %c0_108] : memref<18x18x4xf32, #tpu.memory_space<vmem>>, vector<16x16x4xf32>
    %95 = vector.shape_cast %94 : vector<16x16x4xf32> to vector<256x4xf32>
    %96 = arith.truncf %95 : vector<256x4xf32> to vector<256x4xbf16>
    %c0_109 = arith.constant 0 : index
    %c32_110 = arith.constant 32 : index
    %97 = vector.load %arg10[%c0_109, %c32_110] : memref<256x36xbf16, #tpu.memory_space<vmem>>, vector<256x4xbf16>
    tpu.vector_store %arg10[%c0_109, %c32_110], %96 {strides = array<i32>} : memref<256x36xbf16, #tpu.memory_space<vmem>>, vector<256x4xbf16>,
    %c0_111 = arith.constant 0 : index
    %c0_112 = arith.constant 0 : index
    %98 = vector.load %arg6[%c0_111, %c0_112] : memref<1x4xf32, #tpu.memory_space<vmem>>, vector<1x4xf32>
    %99 = vector.shape_cast %98 : vector<1x4xf32> to vector<4xf32>
    %c0_113 = arith.constant 0 : index
    %c0_114 = arith.constant 0 : index
    %100 = vector.load %arg7[%c0_113, %c0_114] : memref<1x4xf32, #tpu.memory_space<vmem>>, vector<1x4xf32>
    %101 = vector.shape_cast %100 : vector<1x4xf32> to vector<4xf32>
    %c0_115 = arith.constant 0 : index
    %c0_116 = arith.constant 0 : index
    %102 = vector.load %arg10[%c0_115, %c0_116] : memref<256x36xbf16, #tpu.memory_space<vmem>>, vector<256x36xbf16>
    %c0_117 = arith.constant 0 : index
    %c0_118 = arith.constant 0 : index
    %103 = vector.load %arg5[%c0_117, %c0_118] : memref<36x4xbf16, #tpu.memory_space<vmem>>, vector<36x4xbf16>
    %cst_119 = arith.constant dense<0.000000e+00> : vector<256x4xf32>
    %104 = tpu.matmul %102, %103, %cst_119 {dimension_numbers = #tpu.dot_dimension_numbers<[1], [0], [0], [1], [0, 0, 1, 1], [], []>} : vector<256x36xbf16>, vector<36x4xbf16>, vector<256x4xf32> -> vector<256x4xf32>
    %105 = vector.shape_cast %99 : vector<4xf32> to vector<1x4xf32>
    %106 = vector.broadcast %105 : vector<1x4xf32> to vector<256x4xf32>
    %107 = arith.mulf %104, %106 : vector<256x4xf32>
    %108 = vector.shape_cast %101 : vector<4xf32> to vector<1x4xf32>
    %109 = vector.broadcast %108 : vector<1x4xf32> to vector<256x4xf32>
    %110 = arith.addf %107, %109 : vector<256x4xf32>
    %111 = vector.shape_cast %110 : vector<256x4xf32> to vector<16x16x4xf32>
    %112 = arith.addf %111, %7 : vector<16x16x4xf32>
    %cst_120 = arith.constant 0.000000e+00 : f32
    %113 = vector.broadcast %cst_120 : f32 to vector<16x16x4xf32>
    %114 = arith.maximumf %112, %113 : vector<16x16x4xf32>
    %c0_121 = arith.constant 0 : index
    %c0_122 = arith.constant 0 : index
    %c0_123 = arith.constant 0 : index
    %c0_124 = arith.constant 0 : index
    %115 = vector.load %arg8[%c0_121, %c0_122, %c0_123, %c0_124] : memref<1x16x16x4xf32, #tpu.memory_space<vmem>>, vector<1x16x16x4xf32>
    %116 = vector.shape_cast %115 : vector<1x16x16x4xf32> to vector<16x16x4xf32>
    %117 = vector.shape_cast %114 : vector<16x16x4xf32> to vector<1x16x16x4xf32>
    tpu.vector_store %arg8[%c0_121, %c0_122, %c0_123, %c0_124], %117 {strides = array<i32>} : memref<1x16x16x4xf32, #tpu.memory_space<vmem>>, vector<1x16x16x4xf32>,
    return
  }
  func.func @transform_0(%arg0: i32) -> (i32, i32, i32, i32) {
    %c0_i32 = arith.constant 0 : i32
    %c0_i32_0 = arith.constant 0 : i32
    %c0_i32_1 = arith.constant 0 : i32
    %c0_i32_2 = arith.constant 0 : i32
    return %arg0, %c0_i32, %c0_i32_0, %c0_i32_1 : i32, i32, i32, i32
  }
  func.func @transform_1(%arg0: i32) -> (i32, i32) {
    %c0_i32 = arith.constant 0 : i32
    %c0_i32_0 = arith.constant 0 : i32
    %c0_i32_1 = arith.constant 0 : i32
    return %c0_i32, %c0_i32_0 : i32, i32
  }
  func.func @transform_2(%arg0: i32) -> (i32, i32) {
    %c0_i32 = arith.constant 0 : i32
    %c0_i32_0 = arith.constant 0 : i32
    %c0_i32_1 = arith.constant 0 : i32
    return %c0_i32, %c0_i32_0 : i32, i32
  }
  func.func @transform_3(%arg0: i32) -> (i32, i32) {
    %c0_i32 = arith.constant 0 : i32
    %c0_i32_0 = arith.constant 0 : i32
    %c0_i32_1 = arith.constant 0 : i32
    return %c0_i32, %c0_i32_0 : i32, i32
  }
  func.func @transform_4(%arg0: i32) -> (i32, i32) {
    %c0_i32 = arith.constant 0 : i32
    %c0_i32_0 = arith.constant 0 : i32
    %c0_i32_1 = arith.constant 0 : i32
    return %c0_i32, %c0_i32_0 : i32, i32
  }
  func.func @transform_5(%arg0: i32) -> (i32, i32) {
    %c0_i32 = arith.constant 0 : i32
    %c0_i32_0 = arith.constant 0 : i32
    %c0_i32_1 = arith.constant 0 : i32
    return %c0_i32, %c0_i32_0 : i32, i32
  }
  func.func @transform_6(%arg0: i32) -> (i32, i32) {
    %c0_i32 = arith.constant 0 : i32
    %c0_i32_0 = arith.constant 0 : i32
    %c0_i32_1 = arith.constant 0 : i32
    return %c0_i32, %c0_i32_0 : i32, i32
  }
  func.func @transform_7(%arg0: i32) -> (i32, i32, i32, i32) {
    %c0_i32 = arith.constant 0 : i32
    %c0_i32_0 = arith.constant 0 : i32
    %c0_i32_1 = arith.constant 0 : i32
    %c0_i32_2 = arith.constant 0 : i32
    return %arg0, %c0_i32, %c0_i32_0, %c0_i32_1 : i32, i32, i32, i32
  }
}

</mosaic_0001>

<bundles_post_ra>
// kernel: tpu_custom_call.1
= control target key start
LH: loop header
LB: loop body
LE: loop exit
PB: predicated region body
PF: predicated region fallthrough
CT: control target
= control target key end

     0   :  { %s5393_s24 = smov 0   ;;  %s7640_s0 = inlined_call_operand.vmem [shape: f32[2,16,16,4], index: 0, kind: input, shape index: {}]   ;;  %s7641_s1 = inlined_call_operand.vmem [shape: bf16[36,4], index: 1, kind: input, shape index: {}]   ;;  %s7642_s2 = inlined_call_operand.vmem [shape: f32[1,4], index: 2, kind: input, shape index: {}]   ;;  %s7643_s3 = inlined_call_operand.vmem [shape: f32[1,4], index: 3, kind: input, shape index: {}]   ;;  %s7644_s4 = inlined_call_operand.vmem [shape: bf16[36,4], index: 4, kind: input, shape index: {}]   ;;  %s7645_s5 = inlined_call_operand.vmem [shape: f32[1,4], index: 5, kind: input, shape index: {}]   ;;  %s7646_s6 = inlined_call_operand.vmem [shape: f32[1,4], index: 6, kind: input, shape index: {}]   ;;  %s7647_s7 = inlined_call_operand.vmem [shape: f32[2,16,16,4], index: 7, kind: output, shape index: {}]  }
   0x1 LB: > { %s5082_s25 = sadd.s32 4294967295, %s5342_s24   ;;  %p5086_p0 = scmp.ge.s32.totalorder %s5342_s24, 1  ;;  %s5342_s24 = sphi %s5393_s24, %s17_s24  }
   0x2   : > { %p237_p1 = scmp.lt.s32.totalorder %s5342_s24, 3 }
   0x4   : > { %p238_p2 = pnand %p5086_p0, %p237_p1 }
   0x6   : > { %241 = sbr.rel (%p238_p2) target bundleno = 1910 (0x776), region = 48 }
   0xb   : > { %vm280_vm0 = vcmask 31744   ;;  %p269_p3 = scmp.lt.s32.totalorder %s5082_s25, 1  ;;  %v5344_v0 = vmov 0.0   ;;  %vm283_vm1 = vcmask 25600   ;;  %s5345_s30 = smov 4   ;;  %vm289_vm2 = vcmask 24576  }
   0xc   : > { %281 = vst.msk [vmem:[#allocation2] sm:$0xff] %vm280_vm0, %v5344_v0  ;;  %vm455_vm3 = vcmask 27648   ;;  %s5346_s8 = smov 8   ;;  %vm680_vm4 = vcmask 60448   ;;  %s5347_s9 = smov 12   ;;  %vm905_vm5 = vcmask 93248  }
   0xd   : > { %282 = vst.msk [vmem:[#allocation2 + $0x8] sm:$0xff] %vm280_vm0, %v5344_v0  ;;  %s7712_s25 = smov (!%p269_p3, %s5082_s25), 1  ;;  %s5348_s10 = smov 16   ;;  %vm1130_vm6 = vcmask 126048   ;;  %vm1355_vm7 = vcmask 158848   ;;  %vm1580_vm8 = vcmask 191648  }
   0xe   : > { %286 = vst.msk [vmem:[#allocation2 + $0x198] sm:$0xff] %vm280_vm0, %v5344_v0  ;;  %s5269_s26 = sshll.u32 %s7712_s25, 8  ;;  %s5349_s11 = smov 20   ;;  %vm1806_vm9 = vcmask 224448   ;;  %vm2031_vm10 = vcmask 257248   ;;  %vm2472_vm11 = vcmask 1041408  }
   0xf   : > { %287 = vst.msk [vmem:[#allocation2 + $0x1a0] sm:$0xff] %vm280_vm0, %v5344_v0  ;;  %s5417_s29 = scalar_lea.vmem %s7640_s0, %s5269_s26  ;;  %s5350_s12 = smov 24   ;;  %vm2256_vm12 = vcmask 290048   ;;  %vm2423_vm13 = vcmask 293888  }
  0x10   : > { %284 = vst.msk [vmem:[#allocation2 + $0x10] sm:$0x3] %vm283_vm1, %v5344_v0  ;;  %v5421_v1 = vld [vmem:[%s5417_s29] sm:$0xff]  ;;  %v5425_v2 = vld [vmem:[%s5417_s29 + $0x8] sm:$0xff]  ;;  %v5438_v5 = vld [vmem:[%s5417_s29 + $0x38] sm:$0xff]  ;;  %s5351_s13 = smov 28  }
  0x11   : > { %288 = vst.msk [vmem:[#allocation2 + $0x1a8] sm:$0x3] %vm283_vm1, %v5344_v0  ;;  %v5428_v3 = vld [vmem:[%s5417_s29 + $0x20] sm:$0xff]  ;;  %v5433_v4 = vld [vmem:[%s5417_s29 + $0x28] sm:$0xff]  ;;  %v5448_v9 = vld [vmem:[%s5417_s29 + $0x50] sm:$0xff]  ;;  %s5352_s14 = smov 32  }
  0x12   : > { %359 = vst.msk [vmem:[#allocation2 + $0x19] sm:$0xff] %vm280_vm0, %v5421_v1  ;;  %v5443_v7 = vld [vmem:[%s5417_s29 + $0x40] sm:$0xff]  ;;  %v5453_v10 = vld [vmem:[%s5417_s29 + $0x10] sm:$0xff]  ;;  %v5459_v11 = vld [vmem:[%s5417_s29 + $0x58] sm:$0xff] }
  0x13   : > { %7669 = vst [vmem:[#allocation4_spill] sm:$0xff] %v5433_v4  ;;  %v5464_v13 = vld [vmem:[%s5417_s29 + $0x68] sm:$0xff]  ;;  %v5469_v15 = vld [vmem:[%s5417_s29 + $0x18] sm:$0xff]  ;;  %v5474_v17 = vld [vmem:[%s5417_s29 + $0x70] sm:$0xff] }
  0x14   : > { %360 = vst.msk [vmem:[#allocation2 + $0x21] sm:$0xff] %vm280_vm0, %v5425_v2  ;;  %v488_v6 = vld [vmem:[#allocation2 + $0x1] sm:$0xff]  ;;  %v5485_v20 = vld [vmem:[%s5417_s29 + $0x30] sm:$0xff]  ;;  %v5502_v29 = vld [vmem:[%s5417_s29 + $0x98] sm:$0xff] }
  0x15   : > { %7670 = vst [vmem:[#allocation5_spill] sm:$0xff] %v5438_v5  ;;  %v520_v8 = vpack.c.bf16 %v488_v6, %v488_v6  ;;  %v5482_v19 = vld [vmem:[%s5417_s29 + $0x80] sm:$0xff]  ;;  %v5495_v26 = vld [vmem:[%s5417_s29 + $0x88] sm:$0xff]  ;;  %v5520_v38 = vld [vmem:[%s5417_s29 + $0xb0] sm:$0xff] }
  0x16   : > { %363 = vst.msk [vmem:[#allocation2 + $0x49] sm:$0xff] %vm280_vm0, %v5428_v3  ;;  %v5505_v30 = vld [vmem:[%s5417_s29 + $0x48] sm:$0xff]  ;;  %v5513_v35 = vld [vmem:[%s5417_s29 + $0xa0] sm:$0xff]  ;;  %v5531_v44 = vld [vmem:[%s5417_s29 + $0xb8] sm:$0xff] }
  0x17   : > { %7671 = vst [vmem:[#allocation6_spill] sm:$0xff] %v5443_v7  ;;  %584 = vrot.lane.b32.xlu0 %v520_v8, %s5345_s30  ;;  %v489_v12 = vld [vmem:[#allocation2 + $0x9] sm:$0xff]  ;;  %v5523_v39 = vld [vmem:[%s5417_s29 + $0x60] sm:$0xff]  ;;  %v5541_v48 = vld [vmem:[%s5417_s29 + $0x78] sm:$0xff] }
  0x18   : > { %364 = vst.msk [vmem:[#allocation2 + $0x51] sm:$0xff] %vm280_vm0, %v5433_v4  ;;  %v521_v18 = vpack.c.bf16 %v489_v12, %v489_v12  ;;  %v5538_v47 = vld [vmem:[%s5417_s29 + $0xc8] sm:$0xff]  ;;  %v5549_v53 = vld [vmem:[%s5417_s29 + $0xd0] sm:$0xff]  ;;  %v5556_v56 = vld [vmem:[%s5417_s29 + $0xe0] sm:$0xff] }
  0x19   : > { %7672 = vst [vmem:[#allocation7_spill] sm:$0xff] %v5448_v9  ;;  %v490_v14 = vld [vmem:[#allocation2 + $0x19] sm:$0xff]  ;;  %v5559_v57 = vld [vmem:[%s5417_s29 + $0x90] sm:$0xff]  ;;  %v5567_v62 = vld [vmem:[%s5417_s29 + $0xe8] sm:$0xff] }
  0x1a   : > { %366 = vst.msk [vmem:[#allocation2 + $0x69] sm:$0xff] %vm280_vm0, %v5438_v5  ;;  %v522_v16 = vpack.c.bf16 %v490_v14, %v490_v14 }
  0x1b   : > { %367 = vst.msk [vmem:[#allocation2 + $0x79] sm:$0xff] %vm280_vm0, %v5443_v7  ;;  %v491_v21 = vld [vmem:[#allocation2 + $0x21] sm:$0xff] }
  0x1c   : > { %7673 = vst [vmem:[#allocation8_spill] sm:$0xff] %v5459_v11  ;;  %588 = vrot.lane.b32.xlu1 %v522_v16, %s5345_s30  ;;  %v523_v22 = vpack.c.bf16 %v491_v21, %v491_v21 }
  0x1d   : > { %369 = vst.msk [vmem:[#allocation2 + $0x91] sm:$0xff] %vm280_vm0, %v5448_v9  ;;  %v494_v23 = vld [vmem:[#allocation2 + $0x49] sm:$0xff] }
  0x1e   : > { %7674 = vst [vmem:[#allocation9_spill] sm:$0xff] %v5464_v13  ;;  %v526_v27 = vpack.c.bf16 %v494_v23, %v494_v23 }
  0x1f   : > { %361 = vst.msk [vmem:[#allocation2 + $0x31] sm:$0xff] %vm280_vm0, %v5453_v10  ;;  %586 = vrot.lane.b32.xlu0 %v521_v18, %s5345_s30  ;;  %v495_v31 = vld [vmem:[#allocation2 + $0x51] sm:$0xff] }
  0x20   : > { %370 = vst.msk [vmem:[#allocation2 + $0x99] sm:$0xff] %vm280_vm0, %v5459_v11  ;;  %v527_v33 = vpack.c.bf16 %v495_v31, %v495_v31 }
  0x21   : > { %7675 = vst [vmem:[#allocation10_spill] sm:$0xff] %v5474_v17  ;;  %v497_v34 = vld [vmem:[#allocation2 + $0x69] sm:$0xff] }
  0x22   : > { %372 = vst.msk [vmem:[#allocation2 + $0xb1] sm:$0xff] %vm280_vm0, %v5464_v13  ;;  %v529_v36 = vpack.c.bf16 %v497_v34, %v497_v34  ;;  %v498_v40 = vld [vmem:[#allocation2 + $0x79] sm:$0xff] }
  0x23   : > { %362 = vst.msk [vmem:[#allocation2 + $0x39] sm:$0xff] %vm280_vm0, %v5469_v15  ;;  %v530_v42 = vpack.c.bf16 %v498_v40, %v498_v40 }
  0x24   : > { %7676 = vst [vmem:[#allocation11_spill] sm:$0xff] %v5485_v20  ;;  %590 = vrot.lane.b32.xlu1 %v523_v22, %s5345_s30  ;;  %v500_v43 = vld [vmem:[#allocation2 + $0x91] sm:$0xff] }
  0x25   : > { %373 = vst.msk [vmem:[#allocation2 + $0xc1] sm:$0xff] %vm280_vm0, %v5474_v17  ;;  %v532_v45 = vpack.c.bf16 %v500_v43, %v500_v43  ;;  %v5658_v43 = vld [vmem:[%s5417_s29 + $0xc0] sm:$0xff] }
  0x26   : > { %375 = vst.msk [vmem:[#allocation2 + $0xd9] sm:$0xff] %vm280_vm0, %v5482_v19  ;;  %v492_v24 = vld [vmem:[#allocation2 + $0x31] sm:$0xff] }
  0x27   : > { %365 = vst.msk [vmem:[#allocation2 + $0x61] sm:$0xff] %vm280_vm0, %v5485_v20  ;;  %v524_v25 = vpack.c.bf16 %v492_v24, %v492_v24  ;;  %596 = vrot.lane.b32.xlu0 %v526_v27, %s5345_s30  ;;  %v501_v49 = vld [vmem:[#allocation2 + $0x99] sm:$0xff] }
  0x28   : > { %376 = vst.msk [vmem:[#allocation2 + $0xe1] sm:$0xff] %vm280_vm0, %v5495_v26  ;;  %v533_v51 = vpack.c.bf16 %v501_v49, %v501_v49  ;;  %v5663_v49 = vld [vmem:[%s5417_s29 + $0xd8] sm:$0xff] }
  0x29   : > { %592 = vrot.lane.b32.xlu2 %v524_v25, %s5345_s30  ;;  %7677 = vst [vmem:[#allocation12_spill] sm:$0xff] %v5505_v30  ;;  %v503_v52 = vld [vmem:[#allocation2 + $0xb1] sm:$0xff] }
  0x2a   : > { %v493_v28 = vld [vmem:[#allocation2 + $0x39] sm:$0xff]  ;;  %378 = vst.msk [vmem:[#allocation2 + $0xf9] sm:$0xff] %vm280_vm0, %v5502_v29  ;;  %v535_v54 = vpack.c.bf16 %v503_v52, %v503_v52 }
  0x2b   : > { %368 = vst.msk [vmem:[#allocation2 + $0x81] sm:$0xff] %vm280_vm0, %v5505_v30  ;;  %v525_v32 = vpack.c.bf16 %v493_v28, %v493_v28 }
  0x2c   : > { %379 = vst.msk [vmem:[#allocation2 + $0x109] sm:$0xff] %vm280_vm0, %v5513_v35  ;;  %598 = vrot.lane.b32.xlu1 %v527_v33, %s5345_s30  ;;  %v504_v58 = vld [vmem:[#allocation2 + $0xc1] sm:$0xff] }
  0x2d   : > { %7678 = vst [vmem:[#allocation13_spill] sm:$0xff] %v5520_v38  ;;  %v536_v60 = vpack.c.bf16 %v504_v58, %v504_v58  ;;  %v506_v61 = vld [vmem:[#allocation2 + $0xd9] sm:$0xff] }
  0x2e   : > { %v496_v37 = vld [vmem:[#allocation2 + $0x61] sm:$0xff]  ;;  %7679 = vst [vmem:[#allocation14_spill] sm:$0xff] %v5523_v39  ;;  %v538_v63 = vpack.c.bf16 %v506_v61, %v506_v61  ;;  %v717_v58 = vld [vmem:[#allocation2 + $0x32] sm:$0xff] }
  0x2f   : > { %381 = vst.msk [vmem:[#allocation2 + $0x121] sm:$0xff] %vm280_vm0, %v5520_v38  ;;  %602 = vrot.lane.b32.xlu0 %v529_v36, %s5345_s30  ;;  %v528_v41 = vpack.c.bf16 %v496_v37, %v496_v37  ;;  %v507_v8 = vld [vmem:[#allocation2 + $0xe1] sm:$0xff] }
  0x30   : > { %371 = vst.msk [vmem:[#allocation2 + $0xa9] sm:$0xff] %vm280_vm0, %v5523_v39  ;;  %v539_v14 = vpack.c.bf16 %v507_v8, %v507_v8 }
  0x31   : > { %594 = vrot.lane.b32.xlu2 %v525_v32, %s5345_s30  ;;  %7680 = vst [vmem:[#allocation15_spill] sm:$0xff] %v5531_v44  ;;  %v509_v16 = vld [vmem:[#allocation2 + $0xf9] sm:$0xff] }
  0x32   : > { %382 = vst.msk [vmem:[#allocation2 + $0x129] sm:$0xff] %vm280_vm0, %v5531_v44  ;;  %v499_v46 = vld [vmem:[#allocation2 + $0x81] sm:$0xff]  ;;  %v541_v18 = vpack.c.bf16 %v509_v16, %v509_v16 }
  0x33   : > { %7681 = vst [vmem:[#allocation16_spill] sm:$0xff] %v5538_v47  ;;  %v531_v50 = vpack.c.bf16 %v499_v46, %v499_v46  ;;  %v510_v22 = vld [vmem:[#allocation2 + $0x109] sm:$0xff] }
  0x34   : > { %604 = vrot.lane.b32.xlu1 %v530_v42, %s5345_s30  ;;  %7682 = vst [vmem:[#allocation17_spill] sm:$0xff] %v5541_v48  ;;  %v542_v24 = vpack.c.bf16 %v510_v22, %v510_v22  ;;  %v5652_v42 = vld [vmem:[%s5417_s29 + $0xa8] sm:$0xff] }
  0x35   : > { %384 = vst.msk [vmem:[#allocation2 + $0x141] sm:$0xff] %vm280_vm0, %v5538_v47 }
  0x36   : > { %374 = vst.msk [vmem:[#allocation2 + $0xc9] sm:$0xff] %vm280_vm0, %v5541_v48  ;;  %v512_v25 = vld [vmem:[#allocation2 + $0x121] sm:$0xff] }
  0x37   : > { %608 = vrot.lane.b32.xlu0 %v532_v45, %s5345_s30  ;;  %7683 = vst [vmem:[#allocation18_spill] sm:$0xff] %v5549_v53  ;;  %v502_v55 = vld [vmem:[#allocation2 + $0xa9] sm:$0xff]  ;;  %v544_v27 = vpack.c.bf16 %v512_v25, %v512_v25  ;;  %v396_v25 = vld [vmem:[#allocation2 + $0x38] sm:$0xff] }
  0x38   : > { %385 = vst.msk [vmem:[#allocation2 + $0x151] sm:$0xff] %vm280_vm0, %v5549_v53  ;;  %v534_v59 = vpack.c.bf16 %v502_v55, %v502_v55 }
  0x39   : > { %600 = vrot.lane.b32.xlu2 %v528_v41, %s5345_s30  ;;  %7684 = vst [vmem:[#allocation19_spill] sm:$0xff] %v5556_v56  ;;  %v513_v28 = vld [vmem:[#allocation2 + $0x129] sm:$0xff] }
  0x3a   : > { %387 = vst.msk [vmem:[#allocation2 + $0x169] sm:$0xff] %vm280_vm0, %v5556_v56  ;;  %v545_v31 = vpack.c.bf16 %v513_v28, %v513_v28  ;;  %v394_v28 = vld [vmem:[#allocation2 + $0x20] sm:$0xff] }
  0x3b   : > { %377 = vst.msk [vmem:[#allocation2 + $0xf1] sm:$0xff] %vm280_vm0, %v5559_v57 }
  0x3c   : > { %610 = vrot.lane.b32.xlu1 %v533_v51, %s5345_s30  ;;  %7685 = vst [vmem:[#allocation20_spill] sm:$0xff] %v5567_v62  ;;  %v515_v32 = vld [vmem:[#allocation2 + $0x141] sm:$0xff] }
  0x3d   : > { %388 = vst.msk [vmem:[#allocation2 + $0x171] sm:$0xff] %vm280_vm0, %v5567_v62  ;;  %v505_v6 = vld [vmem:[#allocation2 + $0xc9] sm:$0xff]  ;;  %v547_v33 = vpack.c.bf16 %v515_v32, %v515_v32 }
  0x3e   : > { %308 = vst.msk [vmem:[#allocation2 + $0x11] sm:$0x1] %vm289_vm2, %v5344_v0  ;;  %v537_v12 = vpack.c.bf16 %v505_v6, %v505_v6 }
  0x3f   : > { %614 = vrot.lane.b32.xlu0 %v535_v54, %s5345_s30  ;;  %290 = vst.msk [vmem:[#allocation2] sm:$0x1] %vm289_vm2, %v5344_v0  ;;  %v516_v34 = vld [vmem:[#allocation2 + $0x151] sm:$0xff]  ;;  %v715_v54 = vld [vmem:[#allocation2 + $0x1a] sm:$0xff] }
  0x40   : > { %291 = vst.msk [vmem:[#allocation2 + $0x18] sm:$0x1] %vm289_vm2, %v5344_v0  ;;  %v548_v36 = vpack.c.bf16 %v516_v34, %v516_v34  ;;  %v747_v55 = vpack.c.bf16 %v715_v54, %v715_v54  ;;  %v5698_v34 = vpack.c.bf16 %v396_v25, %v396_v25 }
  0x41   : > { %606 = vrot.lane.b32.xlu2 %v531_v50, %s5345_s30  ;;  %292 = vst.msk [vmem:[#allocation2 + $0x30] sm:$0x1] %vm289_vm2, %v5344_v0  ;;  %v518_v37 = vld [vmem:[#allocation2 + $0x169] sm:$0xff] }
  0x42   : > { %293 = vst.msk [vmem:[#allocation2 + $0x48] sm:$0x1] %vm289_vm2, %v5344_v0  ;;  %v508_v21 = vld [vmem:[#allocation2 + $0xf1] sm:$0xff]  ;;  %v550_v40 = vpack.c.bf16 %v518_v37, %v518_v37 }
  0x43   : > { %294 = vst.msk [vmem:[#allocation2 + $0x60] sm:$0x1] %vm289_vm2, %v5344_v0  ;;  %v540_v23 = vpack.c.bf16 %v508_v21, %v508_v21 }
  0x44   : > { %616 = vrot.lane.b32.xlu1 %v536_v60, %s5345_s30  ;;  %295 = vst.msk [vmem:[#allocation2 + $0x78] sm:$0x1] %vm289_vm2, %v5344_v0  ;;  %v519_v41 = vld [vmem:[#allocation2 + $0x171] sm:$0xff]  ;;  %v392_v60 = vld [vmem:[#allocation2 + $0x8] sm:$0xff] }
  0x45   : > { %296 = vst.msk [vmem:[#allocation2 + $0x90] sm:$0x1] %vm289_vm2, %v5344_v0  ;;  %v551_v45 = vpack.c.bf16 %v519_v41, %v519_v41  ;;  %v714_v46 = vld [vmem:[#allocation2 + $0xa] sm:$0xff]  ;;  %v424_v8 = vpack.c.bf16 %v392_v60, %v392_v60 }
  0x46   : > { %297 = vst.msk [vmem:[#allocation2 + $0xa8] sm:$0x1] %vm289_vm2, %v5344_v0  ;;  %v391_v50 = vld [vmem:[#allocation2] sm:$0xff]  ;;  %v746_v51 = vpack.c.bf16 %v714_v46, %v714_v46  ;;  %v400_v46 = vld [vmem:[#allocation2 + $0x68] sm:$0xff] }
  0x47   : > { %620 = vrot.lane.b32.xlu0 %v538_v63, %s5345_s30  ;;  %298 = vst.msk [vmem:[#allocation2 + $0xc0] sm:$0x1] %vm289_vm2, %v5344_v0  ;;  %v423_v52 = vpack.c.bf16 %v391_v50, %v391_v50  ;;  %v749_v63 = vpack.c.bf16 %v717_v58, %v717_v58  ;;  %v393_v6 = vld [vmem:[#allocation2 + $0x18] sm:$0xff]  ;;  %v5709_v54 = vpack.c.bf16 %v400_v46, %v400_v46  ;;  %v729_v46 = vld [vmem:[#allocation2 + $0xc2] sm:$0xff] }
  0x48   : > { %299 = vst.msk [vmem:[#allocation2 + $0xd8] sm:$0x1] %vm289_vm2, %v5344_v0  ;;  %v395_v61 = vld [vmem:[#allocation2 + $0x30] sm:$0xff]  ;;  %v5681_v16 = vpack.c.bf16 %v393_v6, %v393_v6 }
  0x49   : > { %612 = vrot.lane.b32.xlu2 %v534_v59, %s5345_s30  ;;  %300 = vst.msk [vmem:[#allocation2 + $0xf0] sm:$0x1] %vm289_vm2, %v5344_v0 }
  0x4a   : > { %301 = vst.msk [vmem:[#allocation2 + $0x108] sm:$0x1] %vm289_vm2, %v5344_v0  ;;  %v399_v50 = vld [vmem:[#allocation2 + $0x60] sm:$0xff] }
  0x4b   : > { %302 = vst.msk [vmem:[#allocation2 + $0x120] sm:$0x1] %vm289_vm2, %v5344_v0  ;;  %v5714_v58 = vpack.c.bf16 %v399_v50, %v399_v50 }
  0x4c   : > { %622 = vrot.lane.b32.xlu1 %v539_v14, %s5345_s30  ;;  %303 = vst.msk [vmem:[#allocation2 + $0x138] sm:$0x1] %vm289_vm2, %v5344_v0 }
  0x4d   : > { %304 = vst.msk [vmem:[#allocation2 + $0x150] sm:$0x1] %vm289_vm2, %v5344_v0 }
  0x4e   : > { %305 = vst.msk [vmem:[#allocation2 + $0x168] sm:$0x1] %vm289_vm2, %v5344_v0 }
  0x4f   : > { %626 = vrot.lane.b32.xlu0 %v541_v18, %s5345_s30  ;;  %306 = vst.msk [vmem:[#allocation2 + $0x180] sm:$0x1] %vm289_vm2, %v5344_v0 }
  0x50   : > { %307 = vst.msk [vmem:[#allocation2 + $0x198] sm:$0x1] %vm289_vm2, %v5344_v0 }
  0x51   : > { %618 = vrot.lane.b32.xlu2 %v537_v12, %s5345_s30  ;;  %309 = vst.msk [vmem:[#allocation2 + $0x29] sm:$0x1] %vm289_vm2, %v5344_v0  ;;  %v5678_v12 = vpack.c.bf16 %v395_v61, %v395_v61 }
  0x52   : > { %310 = vst.msk [vmem:[#allocation2 + $0x41] sm:$0x1] %vm289_vm2, %v5344_v0 }
  0x53   : > { %311 = vst.msk [vmem:[#allocation2 + $0x59] sm:$0x1] %vm289_vm2, %v5344_v0 }
  0x54   : > { %628 = vrot.lane.b32.xlu1 %v542_v24, %s5345_s30  ;;  %312 = vst.msk [vmem:[#allocation2 + $0x71] sm:$0x1] %vm289_vm2, %v5344_v0  ;;  %v397_v24 = vld [vmem:[#allocation2 + $0x48] sm:$0xff]  ;;  %v419_v53 = vld [vmem:[#allocation2 + $0x150] sm:$0xff] }
  0x55   : > { %313 = vst.msk [vmem:[#allocation2 + $0x89] sm:$0x1] %vm289_vm2, %v5344_v0 }
  0x56   : > { %314 = vst.msk [vmem:[#allocation2 + $0xa1] sm:$0x1] %vm289_vm2, %v5344_v0 }
  0x57   : > { %632 = vrot.lane.b32.xlu0 %v544_v27, %s5345_s30  ;;  %315 = vst.msk [vmem:[#allocation2 + $0xb9] sm:$0x1] %vm289_vm2, %v5344_v0 }
  0x58   : > { %316 = vst.msk [vmem:[#allocation2 + $0xd1] sm:$0x1] %vm289_vm2, %v5344_v0 }
  0x59   : > { %624 = vrot.lane.b32.xlu2 %v540_v23, %s5345_s30  ;;  %317 = vst.msk [vmem:[#allocation2 + $0xe9] sm:$0x1] %vm289_vm2, %v5344_v0  ;;  %v718_v18 = vld [vmem:[#allocation2 + $0x3a] sm:$0xff] }
  0x5a   : > { %318 = vst.msk [vmem:[#allocation2 + $0x101] sm:$0x1] %vm289_vm2, %v5344_v0  ;;  %v750_v22 = vpack.c.bf16 %v718_v18, %v718_v18  ;;  %v720_v23 = vld [vmem:[#allocation2 + $0x52] sm:$0xff] }
  0x5b   : > { %319 = vst.msk [vmem:[#allocation2 + $0x119] sm:$0x1] %vm289_vm2, %v5344_v0  ;;  %v752_v27 = vpack.c.bf16 %v720_v23, %v720_v23  ;;  %v403_v18 = vld [vmem:[#allocation2 + $0x90] sm:$0xff] }
  0x5c   : > { %634 = vrot.lane.b32.xlu1 %v545_v31, %s5345_s30  ;;  %320 = vst.msk [vmem:[#allocation2 + $0x131] sm:$0x1] %vm289_vm2, %v5344_v0  ;;  %v5693_v31 = vpack.c.bf16 %v397_v24, %v397_v24  ;;  %v724_v60 = vld [vmem:[#allocation2 + $0x82] sm:$0xff]  ;;  %v401_v24 = vld [vmem:[#allocation2 + $0x78] sm:$0xff]  ;;  %v5726_v25 = vpack.c.bf16 %v403_v18, %v403_v18 }
  0x5d   : > { %321 = vst.msk [vmem:[#allocation2 + $0x149] sm:$0x1] %vm289_vm2, %v5344_v0  ;;  %v756_v6 = vpack.c.bf16 %v724_v60, %v724_v60  ;;  %v404_v60 = vld [vmem:[#allocation2 + $0x98] sm:$0xff] }
  0x5e   : > { %322 = vst.msk [vmem:[#allocation2 + $0x161] sm:$0x1] %vm289_vm2, %v5344_v0 }
  0x5f   : > { %638 = vrot.lane.b32.xlu0 %v547_v33, %s5345_s30  ;;  %323 = vst.msk [vmem:[#allocation2 + $0x179] sm:$0x1] %vm289_vm2, %v5344_v0  ;;  %v5696_v33 = vpack.c.bf16 %v394_v28, %v394_v28  ;;  %v5729_v28 = vpack.c.bf16 %v401_v24, %v401_v24 }
  0x60   : > { %324 = vst.msk [vmem:[#allocation2 + $0x191] sm:$0x1] %vm289_vm2, %v5344_v0 }
  0x61   : > { %7686 = vst [vmem:[#allocation21_spill] sm:$0xff] %v5658_v43 }
  0x62   : > { %325 = vst.msk [vmem:[#allocation2 + $0x1a9] sm:$0x1] %vm289_vm2, %v5344_v0 }
  0x63   : > { %7687 = vst [vmem:[#allocation22_spill] sm:$0xff] %v5663_v49 }
  0x64   : > { %640 = vrot.lane.b32.xlu1 %v548_v36, %s5345_s30  ;;  %380 = vst.msk [vmem:[#allocation2 + $0x111] sm:$0xff] %vm280_vm0, %v5652_v42  ;;  %v721_v36 = vld [vmem:[#allocation2 + $0x62] sm:$0xff] }
  0x65   : > { %383 = vst.msk [vmem:[#allocation2 + $0x139] sm:$0xff] %vm280_vm0, %v5658_v43  ;;  %v753_v41 = vpack.c.bf16 %v721_v36, %v721_v36 }
  0x66   : > { %386 = vst.msk [vmem:[#allocation2 + $0x159] sm:$0xff] %vm280_vm0, %v5663_v49 }
  0x67   : > { %644 = vrot.lane.b32.xlu0 %v550_v40, %s5345_s30  ;;  %456 = vst.msk [vmem:[#allocation3] sm:$0xf] %vm455_vm3, %v423_v52  ;;  %v398_v52 = vld [vmem:[#allocation2 + $0x50] sm:$0xff] }
  0x68   : > { %457 = vst.msk [vmem:[#allocation3 + $0x4] sm:$0xf] %vm455_vm3, %v424_v8  ;;  %v726_v8 = vld [vmem:[#allocation2 + $0x9a] sm:$0xff] }
  0x69   : > { %458 = vst.msk [vmem:[#allocation3 + $0x8] sm:$0xf] %vm455_vm3, %v5681_v16  ;;  %v758_v23 = vpack.c.bf16 %v726_v8, %v726_v8  ;;  %v730_v8 = vld [vmem:[#allocation2 + $0xca] sm:$0xff] }
  0x6a   : > { %460 = vst.msk [vmem:[#allocation3 + $0x10] sm:$0xf] %vm455_vm3, %v5678_v12  ;;  %v762_v24 = vpack.c.bf16 %v730_v8, %v730_v8 }
  0x6b   : > { %v511_v0 = vld [vmem:[#allocation2 + $0x111] sm:$0xff]  ;;  %462 = vst.msk [vmem:[#allocation3 + $0x18] sm:$0xf] %vm455_vm3, %v5693_v31 }
  0x6c   : > { %646 = vrot.lane.b32.xlu1 %v551_v45, %s5345_s30  ;;  %v5674_v59 = vpack.c.bf16 %v511_v0, %v511_v0  ;;  %v514_v14 = vld [vmem:[#allocation2 + $0x139] sm:$0xff]  ;;  %459 = vst.msk [vmem:[#allocation3 + $0xc] sm:$0xf] %vm455_vm3, %v5696_v33  ;;  %v713_v0 = vld [vmem:[#allocation2 + $0x2] sm:$0xff]  ;;  %v414_v48 = vld [vmem:[#allocation2 + $0x110] sm:$0xff] }
  0x6d   : > { %v5687_v21 = vpack.c.bf16 %v514_v14, %v514_v14  ;;  %v517_v32 = vld [vmem:[#allocation2 + $0x159] sm:$0xff]  ;;  %461 = vst.msk [vmem:[#allocation3 + $0x14] sm:$0xf] %vm455_vm3, %v5698_v34 }
  0x6e   : > { %630 = vrot.lane.b32.xlu2 %v5674_v59, %s5345_s30  ;;  %v549_v40 = vpack.c.bf16 %v517_v32, %v517_v32  ;;  %v723_v45 = vld [vmem:[#allocation2 + $0x7a] sm:$0xff]  ;;  %465 = vst.msk [vmem:[#allocation3 + $0x24] sm:$0xf] %vm455_vm3, %v5709_v54  ;;  %v727_v32 = vld [vmem:[#allocation2 + $0xaa] sm:$0xff] }
  0x6f   : > { %811 = vrot.lane.b32.xlu0 %v746_v51, %s5346_s8  ;;  %v755_v51 = vpack.c.bf16 %v723_v45, %v723_v45  ;;  %464 = vst.msk [vmem:[#allocation3 + $0x20] sm:$0xf] %vm455_vm3, %v5714_v58  ;;  %v759_v45 = vpack.c.bf16 %v727_v32, %v727_v32  ;;  %v739_v17 = vld [vmem:[#allocation2 + $0x13a] sm:$0xff] }
  0x70   : > { %468 = vst.msk [vmem:[#allocation3 + $0x30] sm:$0xf] %vm455_vm3, %v5726_v25  ;;  %v417_v62 = vld [vmem:[#allocation2 + $0x138] sm:$0xff] }
  0x71   : > { %466 = vst.msk [vmem:[#allocation3 + $0x28] sm:$0xf] %vm455_vm3, %v5729_v28  ;;  %v5833_v56 = vpack.c.bf16 %v417_v62, %v417_v62  ;;  %v742_v11 = vld [vmem:[#allocation2 + $0x15a] sm:$0xff] }
  0x72   : > { %v420_v9 = vld [vmem:[#allocation2 + $0x158] sm:$0xff] }
  0x73   : > { %482 = vst.msk [vmem:[#allocation3 + $0x68] sm:$0xf] %vm455_vm3, %v5833_v56 }
  0x74   : > { %813 = vrot.lane.b32.xlu1 %v747_v55, %s5346_s8  ;;  %v5712_v55 = vpack.c.bf16 %v398_v52, %v398_v52  ;;  %v405_v52 = vld [vmem:[#allocation2 + $0xa8] sm:$0xff] }
  0x75   : > { %v5751_v18 = vpack.c.bf16 %v405_v52, %v405_v52  ;;  %v733_v52 = vld [vmem:[#allocation2 + $0xf2] sm:$0xff] }
  0x76   : > { %636 = vrot.lane.b32.xlu2 %v5687_v21, %s5345_s30  ;;  %463 = vst.msk [vmem:[#allocation3 + $0x1c] sm:$0xf] %vm455_vm3, %v5712_v55 }
  0x77   : > { %817 = vrot.lane.b32.xlu0 %v749_v63, %s5346_s8  ;;  %v745_v63 = vpack.c.bf16 %v713_v0, %v713_v0  ;;  %v761_v0 = vpack.c.bf16 %v729_v46, %v729_v46  ;;  %470 = vst.msk [vmem:[#allocation3 + $0x38] sm:$0xf] %vm455_vm3, %v5751_v18 }
  0x7c   : > { %819 = vrot.lane.b32.xlu1 %v750_v22, %s5346_s8  ;;  %v402_v22 = vld [vmem:[#allocation2 + $0x80] sm:$0xff] }
  0x7e   : > { %642 = vrot.lane.b32.xlu2 %v549_v40, %s5345_s30 }
  0x7f   : > { %823 = vrot.lane.b32.xlu0 %v752_v27, %s5346_s8  ;;  %v716_v27 = vld [vmem:[#allocation2 + $0x22] sm:$0xff] }
  0x83   : > { %v593_v37 = vpop.permute.xlu2 %592 }
  0x84   : > { %685 = vst.msk [vmem:[#allocation3 + $0x10] sm:$0xf] %vm680_vm4, %v593_v37  ;;  %825 = vrot.lane.b32.xlu1 %v753_v41, %s5346_s8  ;;  %v5733_v37 = vpack.c.bf16 %v402_v22, %v402_v22  ;;  %v748_v41 = vpack.c.bf16 %v716_v27, %v716_v27  ;;  %v732_v27 = vld [vmem:[#allocation2 + $0xe2] sm:$0xff] }
  0x86   : > { %809 = vrot.lane.b32.xlu2 %v745_v63, %s5346_s8  ;;  %467 = vst.msk [vmem:[#allocation3 + $0x2c] sm:$0xf] %vm455_vm3, %v5733_v37  ;;  %v719_v63 = vld [vmem:[#allocation2 + $0x4a] sm:$0xff] }
  0x87   : > { %829 = vrot.lane.b32.xlu0 %v755_v51, %s5346_s8  ;;  %v406_v51 = vld [vmem:[#allocation2 + $0xb0] sm:$0xff] }
  0x89   : > { %v585_v14 = vpop.permute.xlu0 %584 }
  0x8a   : > { %681 = vst.msk [vmem:[#allocation3] sm:$0xf] %vm680_vm4, %v585_v14 }
  0x8b   : > { %v595_v61 = vpop.permute.xlu2 %594 }
  0x8c   : > { %686 = vst.msk [vmem:[#allocation3 + $0x14] sm:$0xf] %vm680_vm4, %v595_v61  ;;  %831 = vrot.lane.b32.xlu1 %v756_v6, %s5346_s8  ;;  %v5744_v61 = vpack.c.bf16 %v406_v51, %v406_v51  ;;  %v5747_v6 = vpack.c.bf16 %v404_v60, %v404_v60 }
  0x8e   : > { %v589_v40 = vpop.permute.xlu1 %588  ;;  %815 = vrot.lane.b32.xlu2 %v748_v41, %s5346_s8  ;;  %471 = vst.msk [vmem:[#allocation3 + $0x3c] sm:$0xf] %vm455_vm3, %v5744_v61  ;;  %v764_v41 = vpack.c.bf16 %v732_v27, %v732_v27  ;;  %v412_v27 = vld [vmem:[#allocation2 + $0xf8] sm:$0xff] }
  0x8f   : > { %835 = vrot.lane.b32.xlu0 %v758_v23, %s5346_s8  ;;  %683 = vst.msk [vmem:[#allocation3 + $0x8] sm:$0xf] %vm680_vm4, %v589_v40  ;;  %v5755_v23 = vpack.c.bf16 %v719_v63, %v719_v63  ;;  %v408_v40 = vld [vmem:[#allocation2 + $0xc8] sm:$0xff] }
  0x90   : > { %469 = vst.msk [vmem:[#allocation3 + $0x34] sm:$0xf] %vm455_vm3, %v5747_v6  ;;  %v5772_v60 = vpack.c.bf16 %v408_v40, %v408_v40  ;;  %v410_v40 = vld [vmem:[#allocation2 + $0xe0] sm:$0xff] }
  0x91   : > { %v587_v50 = vpop.permute.xlu0 %586 }
  0x92   : > { %682 = vst.msk [vmem:[#allocation3 + $0x4] sm:$0xf] %vm680_vm4, %v587_v50  ;;  %v722_v50 = vld [vmem:[#allocation2 + $0x6a] sm:$0xff] }
  0x93   : > { %v601_v36 = vpop.permute.xlu2 %600  ;;  %v5776_v8 = vpack.c.bf16 %v722_v50, %v722_v50  ;;  %473 = vst.msk [vmem:[#allocation3 + $0x44] sm:$0xf] %vm455_vm3, %v5772_v60  ;;  %v5789_v50 = vpack.c.bf16 %v410_v40, %v410_v40 }
  0x94   : > { %689 = vst.msk [vmem:[#allocation3 + $0x20] sm:$0xf] %vm680_vm4, %v601_v36  ;;  %837 = vrot.lane.b32.xlu1 %v759_v45, %s5346_s8  ;;  %v409_v36 = vld [vmem:[#allocation2 + $0xd8] sm:$0xff]  ;;  %v407_v45 = vld [vmem:[#allocation2 + $0xc0] sm:$0xff] }
  0x95   : > { %v5765_v46 = vpack.c.bf16 %v409_v36, %v409_v36  ;;  %v5768_v51 = vpack.c.bf16 %v407_v45, %v407_v45  ;;  %v725_v45 = vld [vmem:[#allocation2 + $0x92] sm:$0xff]  ;;  %475 = vst.msk [vmem:[#allocation3 + $0x4c] sm:$0xf] %vm455_vm3, %v5789_v50 }
  0x96   : > { %v591_v22 = vpop.permute.xlu1 %590  ;;  %821 = vrot.lane.b32.xlu2 %v5755_v23, %s5346_s8 }
  0x97   : > { %841 = vrot.lane.b32.xlu0 %v761_v0, %s5346_s8  ;;  %684 = vst.msk [vmem:[#allocation3 + $0xc] sm:$0xf] %vm680_vm4, %v591_v22  ;;  %v735_v22 = vld [vmem:[#allocation2 + $0x10a] sm:$0xff] }
  0x98   : > { %474 = vst.msk [vmem:[#allocation3 + $0x48] sm:$0xf] %vm455_vm3, %v5765_v46  ;;  %v767_v36 = vpack.c.bf16 %v735_v22, %v735_v22  ;;  %v5797_v22 = vpack.c.bf16 %v725_v45, %v725_v45  ;;  %v413_v45 = vld [vmem:[#allocation2 + $0x108] sm:$0xff] }
  0x99   : > { %v597_v32 = vpop.permute.xlu0 %596  ;;  %472 = vst.msk [vmem:[#allocation3 + $0x40] sm:$0xf] %vm455_vm3, %v5768_v51 }
  0x9a   : > { %687 = vst.msk [vmem:[#allocation3 + $0x18] sm:$0xf] %vm680_vm4, %v597_v32  ;;  %v411_v32 = vld [vmem:[#allocation2 + $0xf0] sm:$0xff] }
  0x9b   : > { %v607_v14 = vpop.permute.xlu2 %606 }
  0x9c   : > { %692 = vst.msk [vmem:[#allocation3 + $0x2c] sm:$0xf] %vm680_vm4, %v607_v14  ;;  %843 = vrot.lane.b32.xlu1 %v762_v24, %s5346_s8  ;;  %v765_v14 = vpack.c.bf16 %v733_v52, %v733_v52  ;;  %v736_v52 = vld [vmem:[#allocation2 + $0x112] sm:$0xff] }
  0x9e   : > { %v599_v63 = vpop.permute.xlu1 %598  ;;  %827 = vrot.lane.b32.xlu2 %v5776_v8, %s5346_s8 }
  0x9f   : > { %847 = vrot.lane.b32.xlu0 %v764_v41, %s5346_s8  ;;  %688 = vst.msk [vmem:[#allocation3 + $0x1c] sm:$0xf] %vm680_vm4, %v599_v63  ;;  %v5786_v41 = vpack.c.bf16 %v412_v27, %v412_v27  ;;  %v5793_v63 = vpack.c.bf16 %v411_v32, %v411_v32  ;;  %v738_v27 = vld [vmem:[#allocation2 + $0x12a] sm:$0xff]  ;;  %v415_v32 = vld [vmem:[#allocation2 + $0x120] sm:$0xff] }
  0xa1   : > { %v603_v24 = vpop.permute.xlu0 %602  ;;  %477 = vst.msk [vmem:[#allocation3 + $0x54] sm:$0xf] %vm455_vm3, %v5786_v41 }
  0xa2   : > { %690 = vst.msk [vmem:[#allocation3 + $0x24] sm:$0xf] %vm680_vm4, %v603_v24 }
  0xa3   : > { %v613_v0 = vpop.permute.xlu2 %612  ;;  %476 = vst.msk [vmem:[#allocation3 + $0x50] sm:$0xf] %vm455_vm3, %v5793_v63 }
  0xa4   : > { %695 = vst.msk [vmem:[#allocation3 + $0x38] sm:$0xf] %vm680_vm4, %v613_v0  ;;  %849 = vrot.lane.b32.xlu1 %v765_v14, %s5346_s8  ;;  %v768_v14 = vpack.c.bf16 %v736_v52, %v736_v52  ;;  %v728_v52 = vld [vmem:[#allocation2 + $0xb2] sm:$0xff] }
  0xa6   : > { %v605_v24 = vpop.permute.xlu1 %604  ;;  %833 = vrot.lane.b32.xlu2 %v5797_v22, %s5346_s8 }
  0xa7   : > { %853 = vrot.lane.b32.xlu0 %v767_v36, %s5346_s8  ;;  %691 = vst.msk [vmem:[#allocation3 + $0x28] sm:$0xf] %vm680_vm4, %v605_v24  ;;  %v770_v36 = vpack.c.bf16 %v738_v27, %v738_v27  ;;  %v5810_v24 = vpack.c.bf16 %v413_v45, %v413_v45  ;;  %v5818_v27 = vpack.c.bf16 %v728_v52, %v728_v52 }
  0xa9   : > { %v609_v40 = vpop.permute.xlu0 %608  ;;  %478 = vst.msk [vmem:[#allocation3 + $0x58] sm:$0xf] %vm455_vm3, %v5810_v24 }
  0xaa   : > { %693 = vst.msk [vmem:[#allocation3 + $0x30] sm:$0xf] %vm680_vm4, %v609_v40  ;;  %v5814_v40 = vpack.c.bf16 %v414_v48, %v414_v48  ;;  %v418_v48 = vld [vmem:[#allocation2 + $0x140] sm:$0xff] }
  0xab   : > { %v619_v0 = vpop.permute.xlu2 %618  ;;  %v5828_v52 = vpack.c.bf16 %v418_v48, %v418_v48  ;;  %v744_v48 = vld [vmem:[#allocation2 + $0x172] sm:$0xff] }
  0xac   : > { %698 = vst.msk [vmem:[#allocation3 + $0x44] sm:$0xf] %vm680_vm4, %v619_v0  ;;  %v5807_v0 = vpack.c.bf16 %v415_v32, %v415_v32  ;;  %855 = vrot.lane.b32.xlu1 %v768_v14, %s5346_s8  ;;  %v771_v14 = vpack.c.bf16 %v739_v17, %v739_v17  ;;  %v741_v32 = vld [vmem:[#allocation2 + $0x152] sm:$0xff]  ;;  %v731_v17 = vld [vmem:[#allocation2 + $0xda] sm:$0xff]  ;;  %v776_v49 = vpack.c.bf16 %v744_v48, %v744_v48 }
  0xad   : > { %479 = vst.msk [vmem:[#allocation3 + $0x5c] sm:$0xf] %vm455_vm3, %v5814_v40 }
  0xae   : > { %480 = vst.msk [vmem:[#allocation3 + $0x60] sm:$0xf] %vm455_vm3, %v5807_v0  ;;  %v611_v39 = vpop.permute.xlu1 %610  ;;  %839 = vrot.lane.b32.xlu2 %v5818_v27, %s5346_s8 }
  0xaf   : > { %859 = vrot.lane.b32.xlu0 %v770_v36, %s5346_s8  ;;  %694 = vst.msk [vmem:[#allocation3 + $0x34] sm:$0xf] %vm680_vm4, %v611_v39  ;;  %v416_v36 = vld [vmem:[#allocation2 + $0x128] sm:$0xff] }
  0xb0   : > { %v5831_v39 = vpack.c.bf16 %v416_v36, %v416_v36  ;;  %483 = vst.msk [vmem:[#allocation3 + $0x6c] sm:$0xf] %vm455_vm3, %v5828_v52  ;;  %v421_v36 = vld [vmem:[#allocation2 + $0x168] sm:$0xff] }
  0xb1   : > { %v615_v45 = vpop.permute.xlu0 %614 }
  0xb2   : > { %696 = vst.msk [vmem:[#allocation3 + $0x3c] sm:$0xf] %vm680_vm4, %v615_v45 }
  0xb3   : > { %v625_v13 = vpop.permute.xlu2 %624  ;;  %481 = vst.msk [vmem:[#allocation3 + $0x64] sm:$0xf] %vm455_vm3, %v5831_v39 }
  0xb4   : > { %701 = vst.msk [vmem:[#allocation3 + $0x50] sm:$0xf] %vm680_vm4, %v625_v13  ;;  %v773_v13 = vpack.c.bf16 %v741_v32, %v741_v32  ;;  %861 = vrot.lane.b32.xlu1 %v771_v14, %s5346_s8  ;;  %v5840_v32 = vpack.c.bf16 %v731_v17, %v731_v17  ;;  %v774_v14 = vpack.c.bf16 %v742_v11, %v742_v11  ;;  %v734_v17 = vld [vmem:[#allocation2 + $0xfa] sm:$0xff] }
  0xb5   : > { %v5851_v11 = vpack.c.bf16 %v419_v53, %v419_v53  ;;  %v5860_v48 = vpack.c.bf16 %v734_v17, %v734_v17 }
  0xb6   : > { %v617_v45 = vpop.permute.xlu1 %616  ;;  %845 = vrot.lane.b32.xlu2 %v5840_v32, %s5346_s8 }
  0xb7   : > { %865 = vrot.lane.b32.xlu0 %v773_v13, %s5346_s8  ;;  %697 = vst.msk [vmem:[#allocation3 + $0x40] sm:$0xf] %vm680_vm4, %v617_v45  ;;  %v5848_v13 = vpack.c.bf16 %v421_v36, %v421_v36  ;;  %v5853_v45 = vpack.c.bf16 %v420_v9, %v420_v9  ;;  %v422_v9 = vld [vmem:[#allocation2 + $0x170] sm:$0xff] }
  0xb8   : > { %484 = vst.msk [vmem:[#allocation3 + $0x70] sm:$0xf] %vm455_vm3, %v5851_v11 }
  0xb9   : > { %v621_v62 = vpop.permute.xlu0 %620  ;;  %486 = vst.msk [vmem:[#allocation3 + $0x78] sm:$0xf] %vm455_vm3, %v5848_v13 }
  0xba   : > { %699 = vst.msk [vmem:[#allocation3 + $0x48] sm:$0xf] %vm680_vm4, %v621_v62 }
  0xbb   : > { %485 = vst.msk [vmem:[#allocation3 + $0x74] sm:$0xf] %vm455_vm3, %v5853_v45 }
  0xbc   : > { %867 = vrot.lane.b32.xlu1 %v774_v14, %s5346_s8  ;;  %v737_v14 = vld [vmem:[#allocation2 + $0x122] sm:$0xff] }
  0xbd   : > { %v5876_v17 = vpack.c.bf16 %v737_v14, %v737_v14 }
  0xbe   : > { %v623_v62 = vpop.permute.xlu1 %622  ;;  %851 = vrot.lane.b32.xlu2 %v5860_v48, %s5346_s8 }
  0xbf   : > { %871 = vrot.lane.b32.xlu0 %v776_v49, %s5346_s8  ;;  %700 = vst.msk [vmem:[#allocation3 + $0x4c] sm:$0xf] %vm680_vm4, %v623_v62  ;;  %v5870_v49 = vpack.c.bf16 %v422_v9, %v422_v9 }
  0xc1   : > { %v627_v53 = vpop.permute.xlu0 %626  ;;  %487 = vst.msk [vmem:[#allocation3 + $0x7c] sm:$0xf] %vm455_vm3, %v5870_v49 }
  0xc2   : > { %702 = vst.msk [vmem:[#allocation3 + $0x54] sm:$0xf] %vm680_vm4, %v627_v53 }
  0xc4   : > { %1034 = vrot.lane.b32.xlu1 %v5681_v16, %s5347_s9  ;;  %v740_v16 = vld [vmem:[#allocation2 + $0x142] sm:$0xff] }
  0xc6   : > { %v629_v36 = vpop.permute.xlu1 %628  ;;  %857 = vrot.lane.b32.xlu2 %v5876_v17, %s5346_s8 }
  0xc7   : > { %1038 = vrot.lane.b32.xlu0 %v5678_v12, %s5347_s9  ;;  %703 = vst.msk [vmem:[#allocation3 + $0x58] sm:$0xf] %vm680_vm4, %v629_v36  ;;  %v5887_v12 = vpack.c.bf16 %v740_v16, %v740_v16 }
  0xc8   : > { %v631_v53 = vpop.permute.xlu2 %630 }
  0xc9   : > { %v633_v62 = vpop.permute.xlu0 %632  ;;  %704 = vst.msk [vmem:[#allocation3 + $0x5c] sm:$0xf] %vm680_vm4, %v631_v53 }
  0xca   : > { %705 = vst.msk [vmem:[#allocation3 + $0x60] sm:$0xf] %vm680_vm4, %v633_v62 }
  0xcc   : > { %1040 = vrot.lane.b32.xlu1 %v5698_v34, %s5347_s9  ;;  %v743_v34 = vld [vmem:[#allocation2 + $0x16a] sm:$0xff] }
  0xce   : > { %v635_v9 = vpop.permute.xlu1 %634  ;;  %863 = vrot.lane.b32.xlu2 %v5887_v12, %s5346_s8 }
  0xcf   : > { %1044 = vrot.lane.b32.xlu0 %v5712_v55, %s5347_s9  ;;  %706 = vst.msk [vmem:[#allocation3 + $0x64] sm:$0xf] %vm680_vm4, %v635_v9  ;;  %v5898_v55 = vpack.c.bf16 %v743_v34, %v743_v34 }
  0xd0   : > { %v637_v36 = vpop.permute.xlu2 %636 }
  0xd1   : > { %v639_v14 = vpop.permute.xlu0 %638  ;;  %707 = vst.msk [vmem:[#allocation3 + $0x68] sm:$0xf] %vm680_vm4, %v637_v36 }
  0xd2   : > { %708 = vst.msk [vmem:[#allocation3 + $0x6c] sm:$0xf] %vm680_vm4, %v639_v14  ;;  %v5926_v14 = vld [vmem:[%s5417_s29 + $0xf0] sm:$0xff] }
  0xd3   : > { %7688 = vst [vmem:[#allocation23_spill] sm:$0xff] %v5926_v14 }
  0xd4   : > { %1046 = vrot.lane.b32.xlu1 %v5714_v58, %s5347_s9  ;;  %389 = vst.msk [vmem:[#allocation2 + $0x181] sm:$0xff] %vm280_vm0, %v5926_v14 }
  0xd6   : > { %v641_v62 = vpop.permute.xlu1 %640  ;;  %869 = vrot.lane.b32.xlu2 %v5898_v55, %s5346_s8 }
  0xd7   : > { %1050 = vrot.lane.b32.xlu0 %v5729_v28, %s5347_s9  ;;  %709 = vst.msk [vmem:[#allocation3 + $0x70] sm:$0xf] %vm680_vm4, %v641_v62  ;;  %v1163_v62 = vld [vmem:[#allocation2 + $0x19] sm:$0xff] }
  0xd8   : > { %v643_v58 = vpop.permute.xlu2 %642 }
  0xd9   : > { %v645_v16 = vpop.permute.xlu0 %644  ;;  %710 = vst.msk [vmem:[#allocation3 + $0x74] sm:$0xf] %vm680_vm4, %v643_v58  ;;  %v1164_v58 = vld [vmem:[#allocation2 + $0x21] sm:$0xff] }
  0xda   : > { %711 = vst.msk [vmem:[#allocation3 + $0x78] sm:$0xf] %vm680_vm4, %v645_v16 }
  0xdc   : > { %1052 = vrot.lane.b32.xlu1 %v5733_v37, %s5347_s9 }
  0xde   : > { %v647_v53 = vpop.permute.xlu1 %646  ;;  %1036 = vrot.lane.b32.xlu2 %v5696_v33, %s5347_s9 }
  0xdf   : > { %1056 = vrot.lane.b32.xlu0 %v5747_v6, %s5347_s9  ;;  %712 = vst.msk [vmem:[#allocation3 + $0x7c] sm:$0xf] %vm680_vm4, %v647_v53 }
  0xe0   : > { %v810_v37 = vpop.permute.xlu2 %809 }
  0xe1   : > { %v812_v28 = vpop.permute.xlu0 %811  ;;  %906 = vst.msk [vmem:[#allocation3] sm:$0xf] %vm905_vm5, %v810_v37 }
  0xe2   : > { %907 = vst.msk [vmem:[#allocation3 + $0x4] sm:$0xf] %vm905_vm5, %v812_v28  ;;  %v1166_v28 = vld [vmem:[#allocation2 + $0x39] sm:$0xff] }
  0xe4   : > { %1058 = vrot.lane.b32.xlu1 %v5751_v18, %s5347_s9 }
  0xe6   : > { %v814_v9 = vpop.permute.xlu1 %813  ;;  %1042 = vrot.lane.b32.xlu2 %v5693_v31, %s5347_s9 }
  0xe7   : > { %1062 = vrot.lane.b32.xlu0 %v5768_v51, %s5347_s9  ;;  %908 = vst.msk [vmem:[#allocation3 + $0x8] sm:$0xf] %vm905_vm5, %v814_v9 }
  0xe8   : > { %v816_v33 = vpop.permute.xlu2 %815 }
  0xe9   : > { %v818_v6 = vpop.permute.xlu0 %817  ;;  %909 = vst.msk [vmem:[#allocation3 + $0xc] sm:$0xf] %vm905_vm5, %v816_v33 }
  0xea   : > { %910 = vst.msk [vmem:[#allocation3 + $0x10] sm:$0xf] %vm905_vm5, %v818_v6  ;;  %v1167_v6 = vld [vmem:[#allocation2 + $0x49] sm:$0xff] }
  0xec   : > { %1064 = vrot.lane.b32.xlu1 %v5772_v60, %s5347_s9 }
  0xee   : > { %v820_v18 = vpop.permute.xlu1 %819  ;;  %1048 = vrot.lane.b32.xlu2 %v5709_v54, %s5347_s9 }
  0xef   : > { %1068 = vrot.lane.b32.xlu0 %v5789_v50, %s5347_s9  ;;  %911 = vst.msk [vmem:[#allocation3 + $0x14] sm:$0xf] %vm905_vm5, %v820_v18  ;;  %v1199_v18 = vpack.c.bf16 %v1167_v6, %v1167_v6 }
  0xf0   : > { %v822_v31 = vpop.permute.xlu2 %821 }
  0xf1   : > { %v824_v51 = vpop.permute.xlu0 %823  ;;  %912 = vst.msk [vmem:[#allocation3 + $0x18] sm:$0xf] %vm905_vm5, %v822_v31 }
  0xf2   : > { %913 = vst.msk [vmem:[#allocation3 + $0x1c] sm:$0xf] %vm905_vm5, %v824_v51  ;;  %v1169_v51 = vld [vmem:[#allocation2 + $0x61] sm:$0xff] }
  0xf4   : > { %1070 = vrot.lane.b32.xlu1 %v5793_v63, %s5347_s9 }
  0xf6   : > { %v826_v60 = vpop.permute.xlu1 %825  ;;  %1054 = vrot.lane.b32.xlu2 %v5726_v25, %s5347_s9 }
  0xf7   : > { %1074 = vrot.lane.b32.xlu0 %v5810_v24, %s5347_s9  ;;  %914 = vst.msk [vmem:[#allocation3 + $0x20] sm:$0xf] %vm905_vm5, %v826_v60 }
  0xf8   : > { %v828_v54 = vpop.permute.xlu2 %827 }
  0xf9   : > { %v830_v50 = vpop.permute.xlu0 %829  ;;  %915 = vst.msk [vmem:[#allocation3 + $0x24] sm:$0xf] %vm905_vm5, %v828_v54 }
  0xfa   : > { %916 = vst.msk [vmem:[#allocation3 + $0x28] sm:$0xf] %vm905_vm5, %v830_v50  ;;  %v1170_v50 = vld [vmem:[#allocation2 + $0x69] sm:$0xff] }
  0xfc   : > { %1076 = vrot.lane.b32.xlu1 %v5814_v40, %s5347_s9 }
  0xfe   : > { %v832_v63 = vpop.permute.xlu1 %831  ;;  %1060 = vrot.lane.b32.xlu2 %v5744_v61, %s5347_s9  ;;  %v968_v61 = vld [vmem:[#allocation2 + $0x180] sm:$0xff] }
  0xff   : > { %1080 = vrot.lane.b32.xlu0 %v5831_v39, %s5347_s9  ;;  %917 = vst.msk [vmem:[#allocation3 + $0x2c] sm:$0xf] %vm905_vm5, %v832_v63  ;;  %v5961_v39 = vld [vmem:[%s5417_s29 + $0xf8] sm:$0xff]  ;;  %v1000_v36 = vpack.c.bf16 %v968_v61, %v968_v61  ;;  %v1202_v63 = vpack.c.bf16 %v1170_v50, %v1170_v50 }
 0x100   : > { %v834_v25 = vpop.permute.xlu2 %833  ;;  %7689 = vst [vmem:[#allocation24_spill] sm:$0xff] %v5961_v39 }
 0x101   : > { %v836_v24 = vpop.permute.xlu0 %835  ;;  %918 = vst.msk [vmem:[#allocation3 + $0x30] sm:$0xf] %vm905_vm5, %v834_v25 }
 0x102   : > { %919 = vst.msk [vmem:[#allocation3 + $0x34] sm:$0xf] %vm905_vm5, %v836_v24  ;;  %v1172_v24 = vld [vmem:[#allocation2 + $0x81] sm:$0xff] }
 0x103   : > { %390 = vst.msk [vmem:[#allocation2 + $0x189] sm:$0xff] %vm280_vm0, %v5961_v39 }
 0x104   : > { %1082 = vrot.lane.b32.xlu1 %v5833_v56, %s5347_s9 }
 0x106   : > { %v838_v40 = vpop.permute.xlu1 %837  ;;  %1066 = vrot.lane.b32.xlu2 %v5765_v46, %s5347_s9  ;;  %v1195_v46 = vpack.c.bf16 %v1163_v62, %v1163_v62  ;;  %v1175_v62 = vld [vmem:[#allocation2 + $0xa9] sm:$0xff] }
 0x107   : > { %1086 = vrot.lane.b32.xlu0 %v5851_v11, %s5347_s9  ;;  %920 = vst.msk [vmem:[#allocation3 + $0x38] sm:$0xf] %vm905_vm5, %v838_v40 }
 0x108   : > { %v840_v56 = vpop.permute.xlu2 %839 }
 0x109   : > { %v842_v34 = vpop.permute.xlu0 %841  ;;  %921 = vst.msk [vmem:[#allocation3 + $0x3c] sm:$0xf] %vm905_vm5, %v840_v56  ;;  %v1173_v56 = vld [vmem:[#allocation2 + $0x91] sm:$0xff] }
 0x10a   : > { %922 = vst.msk [vmem:[#allocation3 + $0x40] sm:$0xf] %vm905_vm5, %v842_v34  ;;  %v969_v40 = vld [vmem:[#allocation2 + $0x188] sm:$0xff] }
 0x10c   : > { %1088 = vrot.lane.b32.xlu1 %v5853_v45, %s5347_s9 }
 0x10e   : > { %v844_v11 = vpop.permute.xlu1 %843  ;;  %1072 = vrot.lane.b32.xlu2 %v5786_v41, %s5347_s9  ;;  %v5984_v41 = vpack.c.bf16 %v1166_v28, %v1166_v28 }
 0x10f   : > { %1092 = vrot.lane.b32.xlu0 %v5870_v49, %s5347_s9  ;;  %923 = vst.msk [vmem:[#allocation3 + $0x44] sm:$0xf] %vm905_vm5, %v844_v11  ;;  %v1196_v49 = vpack.c.bf16 %v1164_v58, %v1164_v58  ;;  %v6010_v11 = vpack.c.bf16 %v969_v40, %v969_v40  ;;  %v1176_v58 = vld [vmem:[#allocation2 + $0xb1] sm:$0xff] }
 0x110   : > { %v846_v45 = vpop.permute.xlu2 %845  ;;  %v1208_v28 = vpack.c.bf16 %v1176_v58, %v1176_v58 }
 0x111   : > { %v848_v16 = vpop.permute.xlu0 %847  ;;  %924 = vst.msk [vmem:[#allocation3 + $0x48] sm:$0xf] %vm905_vm5, %v846_v45 }
 0x112   : > { %925 = vst.msk [vmem:[#allocation3 + $0x4c] sm:$0xf] %vm905_vm5, %v848_v16  ;;  %v6016_v16 = vpack.c.bf16 %v1175_v62, %v1175_v62 }
 0x114   : > { %1094 = vrot.lane.b32.xlu1 %v1000_v36, %s5347_s9  ;;  %v1205_v36 = vpack.c.bf16 %v1173_v56, %v1173_v56 }
 0x116   : > { %v850_v53 = vpop.permute.xlu1 %849  ;;  %1078 = vrot.lane.b32.xlu2 %v5807_v0, %s5347_s9  ;;  %v5994_v0 = vpack.c.bf16 %v1169_v51, %v1169_v51  ;;  %v1179_v51 = vld [vmem:[#allocation2 + $0xd9] sm:$0xff] }
 0x117   : > { %1259 = vrot.lane.b32.xlu0 %v1195_v46, %s5348_s10  ;;  %926 = vst.msk [vmem:[#allocation3 + $0x50] sm:$0xf] %vm905_vm5, %v850_v53  ;;  %v1165_v46 = vld [vmem:[#allocation2 + $0x31] sm:$0xff]  ;;  %v1211_v50 = vpack.c.bf16 %v1179_v51, %v1179_v51 }
 0x118   : > { %v852_v9 = vpop.permute.xlu2 %851 }
 0x119   : > { %v854_v37 = vpop.permute.xlu0 %853  ;;  %927 = vst.msk [vmem:[#allocation3 + $0x54] sm:$0xf] %vm905_vm5, %v852_v9 }
 0x11a   : > { %928 = vst.msk [vmem:[#allocation3 + $0x58] sm:$0xf] %vm905_vm5, %v854_v37  ;;  %v1178_v37 = vld [vmem:[#allocation2 + $0xc9] sm:$0xff] }
 0x11b   : > { %v6028_v6 = vpack.c.bf16 %v1178_v37, %v1178_v37 }
 0x11c   : > { %1261 = vrot.lane.b32.xlu1 %v1196_v49, %s5348_s10  ;;  %v6022_v49 = vpack.c.bf16 %v1165_v46, %v1165_v46 }
 0x11e   : > { %v856_v33 = vpop.permute.xlu1 %855  ;;  %1084 = vrot.lane.b32.xlu2 %v5828_v52, %s5347_s9  ;;  %v6004_v52 = vpack.c.bf16 %v1172_v24, %v1172_v24 }
 0x11f   : > { %1265 = vrot.lane.b32.xlu0 %v5984_v41, %s5348_s10  ;;  %929 = vst.msk [vmem:[#allocation3 + $0x5c] sm:$0xf] %vm905_vm5, %v856_v33  ;;  %v1168_v33 = vld [vmem:[#allocation2 + $0x51] sm:$0xff] }
 0x120   : > { %v858_v60 = vpop.permute.xlu2 %857 }
 0x121   : > { %v860_v31 = vpop.permute.xlu0 %859  ;;  %930 = vst.msk [vmem:[#allocation3 + $0x60] sm:$0xf] %vm905_vm5, %v858_v60  ;;  %v6034_v60 = vpack.c.bf16 %v1168_v33, %v1168_v33 }
 0x122   : > { %931 = vst.msk [vmem:[#allocation3 + $0x64] sm:$0xf] %vm905_vm5, %v860_v31 }
 0x124   : > { %1267 = vrot.lane.b32.xlu1 %v1199_v18, %s5348_s10 }
 0x126   : > { %v862_v54 = vpop.permute.xlu1 %861  ;;  %1090 = vrot.lane.b32.xlu2 %v5848_v13, %s5347_s9 }
 0x127   : > { %1271 = vrot.lane.b32.xlu0 %v5994_v0, %s5348_s10  ;;  %932 = vst.msk [vmem:[#allocation3 + $0x68] sm:$0xf] %vm905_vm5, %v862_v54  ;;  %v1181_v54 = vld [vmem:[#allocation2 + $0xf1] sm:$0xff] }
 0x128   : > { %v864_v34 = vpop.permute.xlu2 %863  ;;  %v6040_v24 = vpack.c.bf16 %v1181_v54, %v1181_v54 }
 0x129   : > { %v866_v25 = vpop.permute.xlu0 %865  ;;  %933 = vst.msk [vmem:[#allocation3 + $0x6c] sm:$0xf] %vm905_vm5, %v864_v34  ;;  %v1182_v34 = vld [vmem:[#allocation2 + $0xf9] sm:$0xff] }
 0x12a   : > { %934 = vst.msk [vmem:[#allocation3 + $0x70] sm:$0xf] %vm905_vm5, %v866_v25  ;;  %v1171_v25 = vld [vmem:[#allocation2 + $0x79] sm:$0xff] }
 0x12c   : > { %1273 = vrot.lane.b32.xlu1 %v1202_v63, %s5348_s10 }
 0x12e   : > { %v868_v61 = vpop.permute.xlu1 %867  ;;  %1096 = vrot.lane.b32.xlu2 %v6010_v11, %s5347_s9 }
 0x12f   : > { %1277 = vrot.lane.b32.xlu0 %v6004_v52, %s5348_s10  ;;  %935 = vst.msk [vmem:[#allocation3 + $0x74] sm:$0xf] %vm905_vm5, %v868_v61  ;;  %v6046_v61 = vpack.c.bf16 %v1171_v25, %v1171_v25  ;;  %v1180_v25 = vld [vmem:[#allocation2 + $0xe1] sm:$0xff] }
 0x130   : > { %v870_v45 = vpop.permute.xlu2 %869 }
 0x131   : > { %v872_v13 = vpop.permute.xlu0 %871  ;;  %936 = vst.msk [vmem:[#allocation3 + $0x78] sm:$0xf] %vm905_vm5, %v870_v45  ;;  %v1185_v45 = vld [vmem:[#allocation2 + $0x121] sm:$0xff] }
 0x132   : > { %937 = vst.msk [vmem:[#allocation3 + $0x7c] sm:$0xf] %vm905_vm5, %v872_v13  ;;  %v1174_v13 = vld [vmem:[#allocation2 + $0x99] sm:$0xff] }
 0x134   : > { %1279 = vrot.lane.b32.xlu1 %v1205_v36, %s5348_s10  ;;  %v1214_v36 = vpack.c.bf16 %v1182_v34, %v1182_v34  ;;  %v1191_v34 = vld [vmem:[#allocation2 + $0x169] sm:$0xff] }
 0x136   : > { %v1035_v53 = vpop.permute.xlu1 %1034  ;;  %1263 = vrot.lane.b32.xlu2 %v6022_v49, %s5348_s10 }
 0x137   : > { %1283 = vrot.lane.b32.xlu0 %v6016_v16, %s5348_s10  ;;  %1131 = vst.msk [vmem:[#allocation3] sm:$0xf] %vm1130_vm6, %v1035_v53  ;;  %v6056_v53 = vpack.c.bf16 %v1174_v13, %v1174_v13 }
 0x138   : > { %v1037_v18 = vpop.permute.xlu2 %1036 }
 0x139   : > { %v1039_v9 = vpop.permute.xlu0 %1038  ;;  %1132 = vst.msk [vmem:[#allocation3 + $0x4] sm:$0xf] %vm1130_vm6, %v1037_v18  ;;  %v1188_v18 = vld [vmem:[#allocation2 + $0x141] sm:$0xff] }
 0x13a   : > { %1133 = vst.msk [vmem:[#allocation3 + $0x8] sm:$0xf] %vm1130_vm6, %v1039_v9  ;;  %v1177_v9 = vld [vmem:[#allocation2 + $0xc1] sm:$0xff] }
 0x13c   : > { %1285 = vrot.lane.b32.xlu1 %v1208_v28, %s5348_s10  ;;  %v1217_v28 = vpack.c.bf16 %v1185_v45, %v1185_v45  ;;  %v1183_v45 = vld [vmem:[#allocation2 + $0x109] sm:$0xff] }
 0x13e   : > { %v1041_v31 = vpop.permute.xlu1 %1040  ;;  %1269 = vrot.lane.b32.xlu2 %v6034_v60, %s5348_s10 }
 0x13f   : > { %1289 = vrot.lane.b32.xlu0 %v6028_v6, %s5348_s10  ;;  %1134 = vst.msk [vmem:[#allocation3 + $0xc] sm:$0xf] %vm1130_vm6, %v1041_v31  ;;  %v1220_v31 = vpack.c.bf16 %v1188_v18, %v1188_v18  ;;  %v1389_v18 = vld [vmem:[#allocation2 + $0x22] sm:$0xff] }
 0x140   : > { %v1043_v40 = vpop.permute.xlu2 %1042 }
 0x141   : > { %v1045_v63 = vpop.permute.xlu0 %1044  ;;  %1135 = vst.msk [vmem:[#allocation3 + $0x10] sm:$0xf] %vm1130_vm6, %v1043_v40 }
 0x142   : > { %1136 = vst.msk [vmem:[#allocation3 + $0x14] sm:$0xf] %vm1130_vm6, %v1045_v63 }
 0x144   : > { %1291 = vrot.lane.b32.xlu1 %v1211_v50, %s5348_s10  ;;  %v1190_v50 = vld [vmem:[#allocation2 + $0x159] sm:$0xff] }
 0x145   : > { %v6072_v63 = vpack.c.bf16 %v1190_v50, %v1190_v50  ;;  %v1186_v50 = vld [vmem:[#allocation2 + $0x129] sm:$0xff] }
 0x146   : > { %v1047_v56 = vpop.permute.xlu1 %1046  ;;  %1275 = vrot.lane.b32.xlu2 %v6046_v61, %s5348_s10 }
 0x147   : > { %1295 = vrot.lane.b32.xlu0 %v6040_v24, %s5348_s10  ;;  %1137 = vst.msk [vmem:[#allocation3 + $0x18] sm:$0xf] %vm1130_vm6, %v1047_v56  ;;  %v6078_v56 = vpack.c.bf16 %v1180_v25, %v1180_v25  ;;  %v1390_v25 = vld [vmem:[#allocation2 + $0x32] sm:$0xff] }
 0x148   : > { %v1049_v46 = vpop.permute.xlu2 %1048 }
 0x149   : > { %v1051_v62 = vpop.permute.xlu0 %1050  ;;  %1138 = vst.msk [vmem:[#allocation3 + $0x1c] sm:$0xf] %vm1130_vm6, %v1049_v46 }
 0x14a   : > { %1139 = vst.msk [vmem:[#allocation3 + $0x20] sm:$0xf] %vm1130_vm6, %v1051_v62  ;;  %v1193_v62 = vld [vmem:[#allocation2 + $0x181] sm:$0xff] }
 0x14b   : > { %v6084_v46 = vpack.c.bf16 %v1193_v62, %v1193_v62  ;;  %v1189_v62 = vld [vmem:[#allocation2 + $0x151] sm:$0xff] }
 0x14c   : > { %1297 = vrot.lane.b32.xlu1 %v1214_v36, %s5348_s10  ;;  %v1223_v36 = vpack.c.bf16 %v1191_v34, %v1191_v34  ;;  %v6099_v34 = vpack.c.bf16 %v1186_v50, %v1186_v50 }
 0x14e   : > { %v1053_v58 = vpop.permute.xlu1 %1052  ;;  %1281 = vrot.lane.b32.xlu2 %v6056_v53, %s5348_s10 }
 0x14f   : > { %1301 = vrot.lane.b32.xlu0 %v5674_v59, %s5348_s10  ;;  %1140 = vst.msk [vmem:[#allocation3 + $0x24] sm:$0xf] %vm1130_vm6, %v1053_v58  ;;  %v6066_v59 = vpack.c.bf16 %v1177_v9, %v1177_v9  ;;  %v6090_v9 = vpack.c.bf16 %v1183_v45, %v1183_v45  ;;  %v1393_v45 = vld [vmem:[#allocation2 + $0x52] sm:$0xff] }
 0x150   : > { %v1055_v33 = vpop.permute.xlu2 %1054 }
 0x151   : > { %v1057_v37 = vpop.permute.xlu0 %1056  ;;  %1141 = vst.msk [vmem:[#allocation3 + $0x28] sm:$0xf] %vm1130_vm6, %v1055_v33 }
 0x152   : > { %1142 = vst.msk [vmem:[#allocation3 + $0x2c] sm:$0xf] %vm1130_vm6, %v1057_v37 }
 0x154   : > { %1303 = vrot.lane.b32.xlu1 %v1217_v28, %s5348_s10  ;;  %v1194_v28 = vld [vmem:[#allocation2 + $0x189] sm:$0xff] }
 0x155   : > { %v1226_v33 = vpack.c.bf16 %v1194_v28, %v1194_v28  ;;  %v6109_v28 = vpack.c.bf16 %v1189_v62, %v1189_v62 }
 0x156   : > { %v1059_v51 = vpop.permute.xlu1 %1058  ;;  %1287 = vrot.lane.b32.xlu2 %v6066_v59, %s5348_s10 }
 0x157   : > { %1307 = vrot.lane.b32.xlu0 %v5687_v21, %s5348_s10  ;;  %1143 = vst.msk [vmem:[#allocation3 + $0x30] sm:$0xf] %vm1130_vm6, %v1059_v51 }
 0x158   : > { %v1061_v40 = vpop.permute.xlu2 %1060 }
 0x159   : > { %v1063_v54 = vpop.permute.xlu0 %1062  ;;  %1144 = vst.msk [vmem:[#allocation3 + $0x34] sm:$0xf] %vm1130_vm6, %v1061_v40 }
 0x15a   : > { %1145 = vst.msk [vmem:[#allocation3 + $0x38] sm:$0xf] %vm1130_vm6, %v1063_v54 }
 0x15c   : > { %1309 = vrot.lane.b32.xlu1 %v1220_v31, %s5348_s10  ;;  %v1421_v31 = vpack.c.bf16 %v1389_v18, %v1389_v18  ;;  %v1192_v18 = vld [vmem:[#allocation2 + $0x171] sm:$0xff] }
 0x15e   : > { %v1065_v21 = vpop.permute.xlu1 %1064  ;;  %1293 = vrot.lane.b32.xlu2 %v6078_v56, %s5348_s10 }
 0x15f   : > { %1313 = vrot.lane.b32.xlu0 %v6072_v63, %s5348_s10  ;;  %1146 = vst.msk [vmem:[#allocation3 + $0x3c] sm:$0xf] %vm1130_vm6, %v1065_v21  ;;  %v1422_v21 = vpack.c.bf16 %v1390_v25, %v1390_v25 }
 0x160   : > { %v1067_v58 = vpop.permute.xlu2 %1066 }
 0x161   : > { %v1069_v13 = vpop.permute.xlu0 %1068  ;;  %1147 = vst.msk [vmem:[#allocation3 + $0x40] sm:$0xf] %vm1130_vm6, %v1067_v58 }
 0x162   : > { %1148 = vst.msk [vmem:[#allocation3 + $0x44] sm:$0xf] %vm1130_vm6, %v1069_v13 }
 0x164   : > { %1315 = vrot.lane.b32.xlu1 %v1223_v36, %s5348_s10 }
 0x166   : > { %v1071_v37 = vpop.permute.xlu1 %1070  ;;  %1299 = vrot.lane.b32.xlu2 %v6090_v9, %s5348_s10 }
 0x167   : > { %1319 = vrot.lane.b32.xlu0 %v6084_v46, %s5348_s10  ;;  %1149 = vst.msk [vmem:[#allocation3 + $0x48] sm:$0xf] %vm1130_vm6, %v1071_v37  ;;  %v1425_v37 = vpack.c.bf16 %v1393_v45, %v1393_v45 }
 0x168   : > { %v1073_v54 = vpop.permute.xlu2 %1072 }
 0x169   : > { %v1075_v51 = vpop.permute.xlu0 %1074  ;;  %1150 = vst.msk [vmem:[#allocation3 + $0x4c] sm:$0xf] %vm1130_vm6, %v1073_v54 }
 0x16a   : > { %1151 = vst.msk [vmem:[#allocation3 + $0x50] sm:$0xf] %vm1130_vm6, %v1075_v51 }
 0x16c   : > { %1321 = vrot.lane.b32.xlu1 %v1226_v33, %s5348_s10 }
 0x16e   : > { %v1077_v40 = vpop.permute.xlu1 %1076  ;;  %1305 = vrot.lane.b32.xlu2 %v6099_v34, %s5348_s10 }
 0x16f   : > { %1486 = vrot.lane.b32.xlu0 %v1421_v31, %s5349_s11  ;;  %1152 = vst.msk [vmem:[#allocation3 + $0x54] sm:$0xf] %vm1130_vm6, %v1077_v40  ;;  %v1396_v31 = vld [vmem:[#allocation2 + $0x7a] sm:$0xff] }
 0x170   : > { %v1079_v13 = vpop.permute.xlu2 %1078  ;;  %v1428_v54 = vpack.c.bf16 %v1396_v31, %v1396_v31  ;;  %v1388_v40 = vld [vmem:[#allocation2 + $0x1a] sm:$0xff] }
 0x171   : > { %v1081_v36 = vpop.permute.xlu0 %1080  ;;  %1153 = vst.msk [vmem:[#allocation3 + $0x58] sm:$0xf] %vm1130_vm6, %v1079_v13 }
 0x172   : > { %1154 = vst.msk [vmem:[#allocation3 + $0x5c] sm:$0xf] %vm1130_vm6, %v1081_v36  ;;  %v1399_v36 = vld [vmem:[#allocation2 + $0x9a] sm:$0xff] }
 0x173   : > { %v1431_v13 = vpack.c.bf16 %v1399_v36, %v1399_v36 }
 0x174   : > { %1488 = vrot.lane.b32.xlu1 %v1422_v21, %s5349_s11 }
 0x176   : > { %v1083_v58 = vpop.permute.xlu1 %1082  ;;  %1311 = vrot.lane.b32.xlu2 %v6109_v28, %s5348_s10 }
 0x177   : > { %1492 = vrot.lane.b32.xlu0 %v5755_v23, %s5349_s11  ;;  %1155 = vst.msk [vmem:[#allocation3 + $0x60] sm:$0xf] %vm1130_vm6, %v1083_v58  ;;  %v6119_v23 = vpack.c.bf16 %v1192_v18, %v1192_v18  ;;  %v1391_v58 = vld [vmem:[#allocation2 + $0x3a] sm:$0xff] }
 0x178   : > { %v1085_v51 = vpop.permute.xlu2 %1084 }
 0x179   : > { %v1087_v33 = vpop.permute.xlu0 %1086  ;;  %1156 = vst.msk [vmem:[#allocation3 + $0x64] sm:$0xf] %vm1130_vm6, %v1085_v51 }
 0x17a   : > { %1157 = vst.msk [vmem:[#allocation3 + $0x68] sm:$0xf] %vm1130_vm6, %v1087_v33  ;;  %v1402_v33 = vld [vmem:[#allocation2 + $0xc2] sm:$0xff] }
 0x17b   : > { %v1434_v51 = vpack.c.bf16 %v1402_v33, %v1402_v33  ;;  %v1400_v33 = vld [vmem:[#allocation2 + $0xaa] sm:$0xff] }
 0x17c   : > { %1494 = vrot.lane.b32.xlu1 %v1425_v37, %s5349_s11 }
 0x17e   : > { %v1089_v50 = vpop.permute.xlu1 %1088  ;;  %1317 = vrot.lane.b32.xlu2 %v6119_v23, %s5348_s10 }
 0x17f   : > { %1498 = vrot.lane.b32.xlu0 %v5776_v8, %s5349_s11  ;;  %1158 = vst.msk [vmem:[#allocation3 + $0x6c] sm:$0xf] %vm1130_vm6, %v1089_v50  ;;  %v1420_v8 = vpack.c.bf16 %v1388_v40, %v1388_v40  ;;  %v1394_v50 = vld [vmem:[#allocation2 + $0x62] sm:$0xff] }
 0x180   : > { %v1091_v21 = vpop.permute.xlu2 %1090 }
 0x181   : > { %v1093_v25 = vpop.permute.xlu0 %1092  ;;  %1159 = vst.msk [vmem:[#allocation3 + $0x70] sm:$0xf] %vm1130_vm6, %v1091_v21 }
 0x182   : > { %1160 = vst.msk [vmem:[#allocation3 + $0x74] sm:$0xf] %vm1130_vm6, %v1093_v25  ;;  %v1405_v25 = vld [vmem:[#allocation2 + $0xe2] sm:$0xff] }
 0x183   : > { %v1437_v21 = vpack.c.bf16 %v1405_v25, %v1405_v25  ;;  %v1403_v25 = vld [vmem:[#allocation2 + $0xca] sm:$0xff] }
 0x184   : > { %1500 = vrot.lane.b32.xlu1 %v1428_v54, %s5349_s11 }
 0x186   : > { %v1095_v62 = vpop.permute.xlu1 %1094  ;;  %1484 = vrot.lane.b32.xlu2 %v1420_v8, %s5349_s11 }
 0x187   : > { %1504 = vrot.lane.b32.xlu0 %v5797_v22, %s5349_s11  ;;  %1161 = vst.msk [vmem:[#allocation3 + $0x78] sm:$0xf] %vm1130_vm6, %v1095_v62  ;;  %v6136_v22 = vpack.c.bf16 %v1391_v58, %v1391_v58  ;;  %v1397_v62 = vld [vmem:[#allocation2 + $0x82] sm:$0xff] }
 0x188   : > { %v1097_v37 = vpop.permute.xlu2 %1096 }
 0x189   : > { %v1260_v45 = vpop.permute.xlu0 %1259  ;;  %1162 = vst.msk [vmem:[#allocation3 + $0x7c] sm:$0xf] %vm1130_vm6, %v1097_v37 }
 0x18a   : > { %1356 = vst.msk [vmem:[#allocation3] sm:$0xf] %vm1355_vm7, %v1260_v45 }
 0x18c   : > { %1506 = vrot.lane.b32.xlu1 %v1431_v13, %s5349_s11  ;;  %v1408_v13 = vld [vmem:[#allocation2 + $0x10a] sm:$0xff] }
 0x18d   : > { %v1440_v58 = vpack.c.bf16 %v1408_v13, %v1408_v13  ;;  %v1406_v13 = vld [vmem:[#allocation2 + $0xf2] sm:$0xff] }
 0x18e   : > { %v1262_v18 = vpop.permute.xlu1 %1261  ;;  %1490 = vrot.lane.b32.xlu2 %v6136_v22, %s5349_s11 }
 0x18f   : > { %1510 = vrot.lane.b32.xlu0 %v5818_v27, %s5349_s11  ;;  %1357 = vst.msk [vmem:[#allocation3 + $0x4] sm:$0xf] %vm1355_vm7, %v1262_v18  ;;  %v6146_v27 = vpack.c.bf16 %v1394_v50, %v1394_v50 }
 0x190   : > { %v1264_v54 = vpop.permute.xlu2 %1263 }
 0x191   : > { %v1266_v31 = vpop.permute.xlu0 %1265  ;;  %1358 = vst.msk [vmem:[#allocation3 + $0x8] sm:$0xf] %vm1355_vm7, %v1264_v54 }
 0x192   : > { %1359 = vst.msk [vmem:[#allocation3 + $0xc] sm:$0xf] %vm1355_vm7, %v1266_v31 }
 0x194   : > { %1512 = vrot.lane.b32.xlu1 %v1434_v51, %s5349_s11  ;;  %v1411_v51 = vld [vmem:[#allocation2 + $0x12a] sm:$0xff] }
 0x195   : > { %v1443_v50 = vpack.c.bf16 %v1411_v51, %v1411_v51 }
 0x196   : > { %v1268_v40 = vpop.permute.xlu1 %1267  ;;  %1496 = vrot.lane.b32.xlu2 %v6146_v27, %s5349_s11 }
 0x197   : > { %1516 = vrot.lane.b32.xlu0 %v5840_v32, %s5349_s11  ;;  %1360 = vst.msk [vmem:[#allocation3 + $0x10] sm:$0xf] %vm1355_vm7, %v1268_v40  ;;  %v6156_v32 = vpack.c.bf16 %v1397_v62, %v1397_v62 }
 0x198   : > { %v1270_v8 = vpop.permute.xlu2 %1269 }
 0x199   : > { %v1272_v36 = vpop.permute.xlu0 %1271  ;;  %1361 = vst.msk [vmem:[#allocation3 + $0x14] sm:$0xf] %vm1355_vm7, %v1270_v8 }
 0x19a   : > { %1362 = vst.msk [vmem:[#allocation3 + $0x18] sm:$0xf] %vm1355_vm7, %v1272_v36 }
 0x19c   : > { %1518 = vrot.lane.b32.xlu1 %v1437_v21, %s5349_s11  ;;  %v1414_v21 = vld [vmem:[#allocation2 + $0x152] sm:$0xff] }
 0x19d   : > { %v1446_v62 = vpack.c.bf16 %v1414_v21, %v1414_v21 }
 0x19e   : > { %v1274_v45 = vpop.permute.xlu1 %1273  ;;  %1502 = vrot.lane.b32.xlu2 %v6156_v32, %s5349_s11 }
 0x19f   : > { %1522 = vrot.lane.b32.xlu0 %v5860_v48, %s5349_s11  ;;  %1363 = vst.msk [vmem:[#allocation3 + $0x1c] sm:$0xf] %vm1355_vm7, %v1274_v45  ;;  %v6166_v48 = vpack.c.bf16 %v1400_v33, %v1400_v33 }
 0x1a0   : > { %v1276_v18 = vpop.permute.xlu2 %1275 }
 0x1a1   : > { %v1278_v37 = vpop.permute.xlu0 %1277  ;;  %1364 = vst.msk [vmem:[#allocation3 + $0x20] sm:$0xf] %vm1355_vm7, %v1276_v18  ;;  %v1419_v18 = vld [vmem:[#allocation2 + $0x18a] sm:$0xff] }
 0x1a2   : > { %1365 = vst.msk [vmem:[#allocation3 + $0x24] sm:$0xf] %vm1355_vm7, %v1278_v37 }
 0x1a4   : > { %1524 = vrot.lane.b32.xlu1 %v1440_v58, %s5349_s11  ;;  %v1417_v58 = vld [vmem:[#allocation2 + $0x172] sm:$0xff] }
 0x1a5   : > { %v1449_v33 = vpack.c.bf16 %v1417_v58, %v1417_v58  ;;  %v1617_v58 = vld [vmem:[#allocation2 + $0x50] sm:$0xff] }
 0x1a6   : > { %v1280_v31 = vpop.permute.xlu1 %1279  ;;  %1508 = vrot.lane.b32.xlu2 %v6166_v48, %s5349_s11 }
 0x1a7   : > { %1528 = vrot.lane.b32.xlu0 %v5876_v17, %s5349_s11  ;;  %1366 = vst.msk [vmem:[#allocation3 + $0x28] sm:$0xf] %vm1355_vm7, %v1280_v31  ;;  %v6176_v17 = vpack.c.bf16 %v1403_v25, %v1403_v25  ;;  %v1451_v31 = vpack.c.bf16 %v1419_v18, %v1419_v18  ;;  %v1614_v25 = vld [vmem:[#allocation2 + $0x30] sm:$0xff]  ;;  %v1649_v18 = vpack.c.bf16 %v1617_v58, %v1617_v58  ;;  %v1418_v58 = vld [vmem:[#allocation2 + $0x182] sm:$0xff] }
 0x1a8   : > { %v1282_v40 = vpop.permute.xlu2 %1281  ;;  %v1646_v21 = vpack.c.bf16 %v1614_v25, %v1614_v25 }
 0x1a9   : > { %v1284_v54 = vpop.permute.xlu0 %1283  ;;  %1367 = vst.msk [vmem:[#allocation3 + $0x2c] sm:$0xf] %vm1355_vm7, %v1282_v40 }
 0x1aa   : > { %1368 = vst.msk [vmem:[#allocation3 + $0x30] sm:$0xf] %vm1355_vm7, %v1284_v54 }
 0x1ac   : > { %1530 = vrot.lane.b32.xlu1 %v1443_v50, %s5349_s11  ;;  %v1409_v50 = vld [vmem:[#allocation2 + $0x112] sm:$0xff] }
 0x1ad   : > { %v6195_v40 = vpack.c.bf16 %v1409_v50, %v1409_v50 }
 0x1ae   : > { %v1286_v36 = vpop.permute.xlu1 %1285  ;;  %1514 = vrot.lane.b32.xlu2 %v6176_v17, %s5349_s11 }
 0x1af   : > { %1534 = vrot.lane.b32.xlu0 %v5887_v12, %s5349_s11  ;;  %1369 = vst.msk [vmem:[#allocation3 + $0x34] sm:$0xf] %vm1355_vm7, %v1286_v36  ;;  %v6186_v12 = vpack.c.bf16 %v1406_v13, %v1406_v13  ;;  %v1616_v36 = vld [vmem:[#allocation2 + $0x48] sm:$0xff]  ;;  %v1412_v13 = vld [vmem:[#allocation2 + $0x13a] sm:$0xff] }
 0x1b0   : > { %v1288_v45 = vpop.permute.xlu2 %1287 }
 0x1b1   : > { %v1290_v8 = vpop.permute.xlu0 %1289  ;;  %1370 = vst.msk [vmem:[#allocation3 + $0x38] sm:$0xf] %vm1355_vm7, %v1288_v45 }
 0x1b2   : > { %1371 = vst.msk [vmem:[#allocation3 + $0x3c] sm:$0xf] %vm1355_vm7, %v1290_v8  ;;  %v1648_v8 = vpack.c.bf16 %v1616_v36, %v1616_v36 }
 0x1b4   : > { %1536 = vrot.lane.b32.xlu1 %v1446_v62, %s5349_s11 }
 0x1b6   : > { %v1292_v37 = vpop.permute.xlu1 %1291  ;;  %1520 = vrot.lane.b32.xlu2 %v6186_v12, %s5349_s11 }
 0x1b7   : > { %1540 = vrot.lane.b32.xlu0 %v5898_v55, %s5349_s11  ;;  %1372 = vst.msk [vmem:[#allocation3 + $0x40] sm:$0xf] %vm1355_vm7, %v1292_v37 }
 0x1b8   : > { %v1294_v54 = vpop.permute.xlu2 %1293 }
 0x1b9   : > { %v1296_v51 = vpop.permute.xlu0 %1295  ;;  %1373 = vst.msk [vmem:[#allocation3 + $0x44] sm:$0xf] %vm1355_vm7, %v1294_v54  ;;  %v1415_v54 = vld [vmem:[#allocation2 + $0x15a] sm:$0xff] }
 0x1ba   : > { %1374 = vst.msk [vmem:[#allocation3 + $0x48] sm:$0xf] %vm1355_vm7, %v1296_v51  ;;  %v1619_v51 = vld [vmem:[#allocation2 + $0x68] sm:$0xff]  ;;  %v6213_v36 = vpack.c.bf16 %v1415_v54, %v1415_v54  ;;  %v1625_v54 = vld [vmem:[#allocation2 + $0xb0] sm:$0xff] }
 0x1bb   : > { %v1651_v50 = vpack.c.bf16 %v1619_v51, %v1619_v51 }
 0x1bc   : > { %1542 = vrot.lane.b32.xlu1 %v1449_v33, %s5349_s11  ;;  %v6204_v33 = vpack.c.bf16 %v1412_v13, %v1412_v13 }
 0x1be   : > { %v1298_v55 = vpop.permute.xlu1 %1297  ;;  %1526 = vrot.lane.b32.xlu2 %v6195_v40, %s5349_s11 }
 0x1bf   : > { %1546 = vrot.lane.b32.xlu0 %v1451_v31, %s5349_s11  ;;  %1375 = vst.msk [vmem:[#allocation3 + $0x4c] sm:$0xf] %vm1355_vm7, %v1298_v55  ;;  %v1620_v55 = vld [vmem:[#allocation2 + $0x78] sm:$0xff] }
 0x1c0   : > { %v1300_v45 = vpop.permute.xlu2 %1299 }
 0x1c1   : > { %v1302_v62 = vpop.permute.xlu0 %1301  ;;  %1376 = vst.msk [vmem:[#allocation3 + $0x50] sm:$0xf] %vm1355_vm7, %v1300_v45 }
 0x1c2   : > { %1377 = vst.msk [vmem:[#allocation3 + $0x54] sm:$0xf] %vm1355_vm7, %v1302_v62  ;;  %v1652_v62 = vpack.c.bf16 %v1620_v55, %v1620_v55  ;;  %v1657_v55 = vpack.c.bf16 %v1625_v54, %v1625_v54  ;;  %v1629_v54 = vld [vmem:[#allocation2 + $0xe0] sm:$0xff] }
 0x1c4   : > { %1710 = vrot.lane.b32.xlu1 %v1646_v21, %s5350_s12 }
 0x1c6   : > { %v1304_v37 = vpop.permute.xlu1 %1303  ;;  %1532 = vrot.lane.b32.xlu2 %v6204_v33, %s5349_s11 }
 0x1c7   : > { %1714 = vrot.lane.b32.xlu0 %v1648_v8, %s5350_s12  ;;  %1378 = vst.msk [vmem:[#allocation3 + $0x58] sm:$0xf] %vm1355_vm7, %v1304_v37  ;;  %v1622_v8 = vld [vmem:[#allocation2 + $0x90] sm:$0xff] }
 0x1c8   : > { %v1306_v25 = vpop.permute.xlu2 %1305  ;;  %v1654_v45 = vpack.c.bf16 %v1622_v8, %v1622_v8  ;;  %v1626_v8 = vld [vmem:[#allocation2 + $0xc0] sm:$0xff] }
 0x1c9   : > { %v1308_v31 = vpop.permute.xlu0 %1307  ;;  %1379 = vst.msk [vmem:[#allocation3 + $0x5c] sm:$0xf] %vm1355_vm7, %v1306_v25 }
 0x1ca   : > { %1380 = vst.msk [vmem:[#allocation3 + $0x60] sm:$0xf] %vm1355_vm7, %v1308_v31  ;;  %v1450_v31 = vpack.c.bf16 %v1418_v58, %v1418_v58  ;;  %v1658_v58 = vpack.c.bf16 %v1626_v8, %v1626_v8 }
 0x1cc   : > { %1716 = vrot.lane.b32.xlu1 %v1649_v18, %s5350_s12  ;;  %v1623_v18 = vld [vmem:[#allocation2 + $0x98] sm:$0xff] }
 0x1ce   : > { %v1310_v21 = vpop.permute.xlu1 %1309  ;;  %1538 = vrot.lane.b32.xlu2 %v6213_v36, %s5349_s11 }
 0x1cf   : > { %1720 = vrot.lane.b32.xlu0 %v1651_v50, %s5350_s12  ;;  %1381 = vst.msk [vmem:[#allocation3 + $0x64] sm:$0xf] %vm1355_vm7, %v1310_v21  ;;  %v1655_v50 = vpack.c.bf16 %v1623_v18, %v1623_v18  ;;  %v1615_v21 = vld [vmem:[#allocation2 + $0x38] sm:$0xff] }
 0x1d0   : > { %v1312_v37 = vpop.permute.xlu2 %1311 }
 0x1d1   : > { %v1314_v13 = vpop.permute.xlu0 %1313  ;;  %1382 = vst.msk [vmem:[#allocation3 + $0x68] sm:$0xf] %vm1355_vm7, %v1312_v37  ;;  %v1628_v37 = vld [vmem:[#allocation2 + $0xd8] sm:$0xff] }
 0x1d2   : > { %1383 = vst.msk [vmem:[#allocation3 + $0x6c] sm:$0xf] %vm1355_vm7, %v1314_v13 }
 0x1d4   : > { %1722 = vrot.lane.b32.xlu1 %v1652_v62, %s5350_s12 }
 0x1d6   : > { %v1316_v51 = vpop.permute.xlu1 %1315  ;;  %1544 = vrot.lane.b32.xlu2 %v1450_v31, %s5349_s11  ;;  %v1618_v31 = vld [vmem:[#allocation2 + $0x60] sm:$0xff] }
 0x1d7   : > { %1726 = vrot.lane.b32.xlu0 %v1654_v45, %s5350_s12  ;;  %1384 = vst.msk [vmem:[#allocation3 + $0x70] sm:$0xf] %vm1355_vm7, %v1316_v51  ;;  %v1647_v45 = vpack.c.bf16 %v1615_v21, %v1615_v21  ;;  %v1660_v51 = vpack.c.bf16 %v1628_v37, %v1628_v37  ;;  %v1661_v21 = vpack.c.bf16 %v1629_v54, %v1629_v54  ;;  %v1632_v37 = vld [vmem:[#allocation2 + $0x108] sm:$0xff] }
 0x1d8   : > { %v1318_v62 = vpop.permute.xlu2 %1317 }
 0x1d9   : > { %v1320_v25 = vpop.permute.xlu0 %1319  ;;  %1385 = vst.msk [vmem:[#allocation3 + $0x74] sm:$0xf] %vm1355_vm7, %v1318_v62  ;;  %v1631_v62 = vld [vmem:[#allocation2 + $0xf8] sm:$0xff] }
 0x1da   : > { %1386 = vst.msk [vmem:[#allocation3 + $0x78] sm:$0xf] %vm1355_vm7, %v1320_v25 }
 0x1dc   : > { %1728 = vrot.lane.b32.xlu1 %v1655_v50, %s5350_s12 }
 0x1de   : > { %v1322_v13 = vpop.permute.xlu1 %1321  ;;  %1712 = vrot.lane.b32.xlu2 %v1647_v45, %s5350_s12  ;;  %v1621_v45 = vld [vmem:[#allocation2 + $0x80] sm:$0xff] }
 0x1df   : > { %1732 = vrot.lane.b32.xlu0 %v1657_v55, %s5350_s12  ;;  %1387 = vst.msk [vmem:[#allocation3 + $0x7c] sm:$0xf] %vm1355_vm7, %v1322_v13  ;;  %v1650_v55 = vpack.c.bf16 %v1618_v31, %v1618_v31  ;;  %v1663_v13 = vpack.c.bf16 %v1631_v62, %v1631_v62  ;;  %v1664_v31 = vpack.c.bf16 %v1632_v37, %v1632_v37  ;;  %v1635_v62 = vld [vmem:[#allocation2 + $0x128] sm:$0xff] }
 0x1e0   : > { %v1485_v50 = vpop.permute.xlu2 %1484 }
 0x1e1   : > { %v1487_v18 = vpop.permute.xlu0 %1486  ;;  %1581 = vst.msk [vmem:[#allocation3] sm:$0xf] %vm1580_vm8, %v1485_v50  ;;  %v1634_v50 = vld [vmem:[#allocation2 + $0x120] sm:$0xff] }
 0x1e2   : > { %1582 = vst.msk [vmem:[#allocation3 + $0x4] sm:$0xf] %vm1580_vm8, %v1487_v18 }
 0x1e4   : > { %1734 = vrot.lane.b32.xlu1 %v1658_v58, %s5350_s12 }
 0x1e6   : > { %v1489_v25 = vpop.permute.xlu1 %1488  ;;  %1718 = vrot.lane.b32.xlu2 %v1650_v55, %s5350_s12  ;;  %v1624_v55 = vld [vmem:[#allocation2 + $0xa8] sm:$0xff] }
 0x1e7   : > { %1738 = vrot.lane.b32.xlu0 %v1660_v51, %s5350_s12  ;;  %1583 = vst.msk [vmem:[#allocation3 + $0x8] sm:$0xf] %vm1580_vm8, %v1489_v25  ;;  %v1653_v51 = vpack.c.bf16 %v1621_v45, %v1621_v45  ;;  %v1666_v25 = vpack.c.bf16 %v1634_v50, %v1634_v50  ;;  %v1667_v45 = vpack.c.bf16 %v1635_v62, %v1635_v62  ;;  %v1638_v50 = vld [vmem:[#allocation2 + $0x150] sm:$0xff] }
 0x1e8   : > { %v1491_v58 = vpop.permute.xlu2 %1490 }
 0x1e9   : > { %v1493_v8 = vpop.permute.xlu0 %1492  ;;  %1584 = vst.msk [vmem:[#allocation3 + $0xc] sm:$0xf] %vm1580_vm8, %v1491_v58  ;;  %v1637_v58 = vld [vmem:[#allocation2 + $0x140] sm:$0xff] }
 0x1ea   : > { %1585 = vst.msk [vmem:[#allocation3 + $0x10] sm:$0xf] %vm1580_vm8, %v1493_v8 }
 0x1ec   : > { %1740 = vrot.lane.b32.xlu1 %v1661_v21, %s5350_s12 }
 0x1ee   : > { %v1495_v18 = vpop.permute.xlu1 %1494  ;;  %1724 = vrot.lane.b32.xlu2 %v1653_v51, %s5350_s12  ;;  %v1627_v51 = vld [vmem:[#allocation2 + $0xc8] sm:$0xff] }
 0x1ef   : > { %1744 = vrot.lane.b32.xlu0 %v1663_v13, %s5350_s12  ;;  %1586 = vst.msk [vmem:[#allocation3 + $0x14] sm:$0xf] %vm1580_vm8, %v1495_v18  ;;  %v1656_v13 = vpack.c.bf16 %v1624_v55, %v1624_v55  ;;  %v1669_v18 = vpack.c.bf16 %v1637_v58, %v1637_v58  ;;  %v1670_v55 = vpack.c.bf16 %v1638_v50, %v1638_v50  ;;  %v1641_v58 = vld [vmem:[#allocation2 + $0x170] sm:$0xff] }
 0x1f0   : > { %v1497_v21 = vpop.permute.xlu2 %1496  ;;  %v1633_v50 = vld [vmem:[#allocation2 + $0x110] sm:$0xff] }
 0x1f1   : > { %v1499_v54 = vpop.permute.xlu0 %1498  ;;  %1587 = vst.msk [vmem:[#allocation3 + $0x18] sm:$0xf] %vm1580_vm8, %v1497_v21  ;;  %v1640_v21 = vld [vmem:[#allocation2 + $0x168] sm:$0xff] }
 0x1f2   : > { %1588 = vst.msk [vmem:[#allocation3 + $0x1c] sm:$0xf] %vm1580_vm8, %v1499_v54 }
 0x1f4   : > { %1746 = vrot.lane.b32.xlu1 %v1664_v31, %s5350_s12 }
 0x1f6   : > { %v1501_v8 = vpop.permute.xlu1 %1500  ;;  %1730 = vrot.lane.b32.xlu2 %v1656_v13, %s5350_s12  ;;  %v1630_v13 = vld [vmem:[#allocation2 + $0xf0] sm:$0xff] }
 0x1f7   : > { %1750 = vrot.lane.b32.xlu0 %v1666_v25, %s5350_s12  ;;  %1589 = vst.msk [vmem:[#allocation3 + $0x20] sm:$0xf] %vm1580_vm8, %v1501_v8  ;;  %v1659_v25 = vpack.c.bf16 %v1627_v51, %v1627_v51  ;;  %v1672_v8 = vpack.c.bf16 %v1640_v21, %v1640_v21  ;;  %v1673_v51 = vpack.c.bf16 %v1641_v58, %v1641_v58 }
 0x1f8   : > { %v1503_v31 = vpop.permute.xlu2 %1502  ;;  %v1665_v21 = vpack.c.bf16 %v1633_v50, %v1633_v50 }
 0x1f9   : > { %v1505_v37 = vpop.permute.xlu0 %1504  ;;  %1590 = vst.msk [vmem:[#allocation3 + $0x24] sm:$0xf] %vm1580_vm8, %v1503_v31 }
 0x1fa   : > { %1591 = vst.msk [vmem:[#allocation3 + $0x28] sm:$0xf] %vm1580_vm8, %v1505_v37 }
 0x1fc   : > { %1752 = vrot.lane.b32.xlu1 %v1667_v45, %s5350_s12 }
 0x1fe   : > { %v1507_v54 = vpop.permute.xlu1 %1506  ;;  %1736 = vrot.lane.b32.xlu2 %v1659_v25, %s5350_s12  ;;  %v1644_v25 = vld [vmem:[#allocation2 + $0x198] sm:$0xff] }
 0x1ff   : > { %1756 = vrot.lane.b32.xlu0 %v1669_v18, %s5350_s12  ;;  %1592 = vst.msk [vmem:[#allocation3 + $0x2c] sm:$0xf] %vm1580_vm8, %v1507_v54  ;;  %v1662_v18 = vpack.c.bf16 %v1630_v13, %v1630_v13  ;;  %v1636_v13 = vld [vmem:[#allocation2 + $0x138] sm:$0xff] }
 0x200   : > { %v1509_v45 = vpop.permute.xlu2 %1508 }
 0x201   : > { %v1511_v62 = vpop.permute.xlu0 %1510  ;;  %1593 = vst.msk [vmem:[#allocation3 + $0x30] sm:$0xf] %vm1580_vm8, %v1509_v45 }
 0x202   : > { %1594 = vst.msk [vmem:[#allocation3 + $0x34] sm:$0xf] %vm1580_vm8, %v1511_v62  ;;  %v1676_v62 = vpack.c.bf16 %v1644_v25, %v1644_v25 }
 0x204   : > { %1758 = vrot.lane.b32.xlu1 %v1670_v55, %s5350_s12 }
 0x206   : > { %v1513_v37 = vpop.permute.xlu1 %1512  ;;  %1742 = vrot.lane.b32.xlu2 %v1662_v18, %s5350_s12  ;;  %v1639_v18 = vld [vmem:[#allocation2 + $0x158] sm:$0xff] }
 0x207   : > { %1762 = vrot.lane.b32.xlu0 %v1672_v8, %s5350_s12  ;;  %1595 = vst.msk [vmem:[#allocation3 + $0x38] sm:$0xf] %vm1580_vm8, %v1513_v37 }
 0x208   : > { %v1515_v54 = vpop.permute.xlu2 %1514 }
 0x209   : > { %v1517_v31 = vpop.permute.xlu0 %1516  ;;  %1596 = vst.msk [vmem:[#allocation3 + $0x3c] sm:$0xf] %vm1580_vm8, %v1515_v54 }
 0x20a   : > { %1597 = vst.msk [vmem:[#allocation3 + $0x40] sm:$0xf] %vm1580_vm8, %v1517_v31 }
 0x20c   : > { %1764 = vrot.lane.b32.xlu1 %v1673_v51, %s5350_s12 }
 0x20e   : > { %v1519_v55 = vpop.permute.xlu1 %1518  ;;  %1748 = vrot.lane.b32.xlu2 %v1665_v21, %s5350_s12 }
 0x20f   : > { %1768 = vrot.lane.b32.xlu0 %v6010_v11, %s5350_s12  ;;  %1598 = vst.msk [vmem:[#allocation3 + $0x44] sm:$0xf] %vm1580_vm8, %v1519_v55  ;;  %v1668_v11 = vpack.c.bf16 %v1636_v13, %v1636_v13 }
 0x210   : > { %v1521_v45 = vpop.permute.xlu2 %1520 }
 0x211   : > { %v1523_v8 = vpop.permute.xlu0 %1522  ;;  %1599 = vst.msk [vmem:[#allocation3 + $0x48] sm:$0xf] %vm1580_vm8, %v1521_v45 }
 0x212   : > { %1600 = vst.msk [vmem:[#allocation3 + $0x4c] sm:$0xf] %vm1580_vm8, %v1523_v8 }
 0x214   : > { %1770 = vrot.lane.b32.xlu1 %v1676_v62, %s5350_s12 }
 0x216   : > { %v1525_v58 = vpop.permute.xlu1 %1524  ;;  %1754 = vrot.lane.b32.xlu2 %v1668_v11, %s5350_s12 }
 0x217   : > { %1935 = vrot.lane.b32.xlu0 %v6022_v49, %s5351_s13  ;;  %1601 = vst.msk [vmem:[#allocation3 + $0x50] sm:$0xf] %vm1580_vm8, %v1525_v58  ;;  %v1671_v49 = vpack.c.bf16 %v1639_v18, %v1639_v18 }
 0x218   : > { %v1527_v51 = vpop.permute.xlu2 %1526 }
 0x219   : > { %v1529_v37 = vpop.permute.xlu0 %1528  ;;  %1602 = vst.msk [vmem:[#allocation3 + $0x54] sm:$0xf] %vm1580_vm8, %v1527_v51 }
 0x21a   : > { %1603 = vst.msk [vmem:[#allocation3 + $0x58] sm:$0xf] %vm1580_vm8, %v1529_v37 }
 0x21c   : > { %1937 = vrot.lane.b32.xlu1 %v5984_v41, %s5351_s13  ;;  %v1642_v41 = vld [vmem:[#allocation2 + $0x180] sm:$0xff] }
 0x21e   : > { %v1531_v31 = vpop.permute.xlu1 %1530  ;;  %1760 = vrot.lane.b32.xlu2 %v1671_v49, %s5350_s12 }
 0x21f   : > { %1941 = vrot.lane.b32.xlu0 %v6034_v60, %s5351_s13  ;;  %1604 = vst.msk [vmem:[#allocation3 + $0x5c] sm:$0xf] %vm1580_vm8, %v1531_v31  ;;  %v1674_v60 = vpack.c.bf16 %v1642_v41, %v1642_v41  ;;  %v1858_v31 = vld [vmem:[#allocation2 + $0x111] sm:$0xff] }
 0x220   : > { %v1533_v54 = vpop.permute.xlu2 %1532 }
 0x221   : > { %v1535_v50 = vpop.permute.xlu0 %1534  ;;  %1605 = vst.msk [vmem:[#allocation3 + $0x60] sm:$0xf] %vm1580_vm8, %v1533_v54 }
 0x222   : > { %1606 = vst.msk [vmem:[#allocation3 + $0x64] sm:$0xf] %vm1580_vm8, %v1535_v50  ;;  %v1890_v50 = vpack.c.bf16 %v1858_v31, %v1858_v31  ;;  %v2066_v31 = vld [vmem:[#allocation2 + $0x4a] sm:$0xff] }
 0x224   : > { %1943 = vrot.lane.b32.xlu1 %v5994_v0, %s5351_s13  ;;  %v1645_v0 = vld [vmem:[#allocation2 + $0x1a0] sm:$0xff] }
 0x226   : > { %v1537_v25 = vpop.permute.xlu1 %1536  ;;  %1766 = vrot.lane.b32.xlu2 %v1674_v60, %s5350_s12 }
 0x227   : > { %1947 = vrot.lane.b32.xlu0 %v6046_v61, %s5351_s13  ;;  %1607 = vst.msk [vmem:[#allocation3 + $0x68] sm:$0xf] %vm1580_vm8, %v1537_v25  ;;  %v1677_v61 = vpack.c.bf16 %v1645_v0, %v1645_v0  ;;  %v1861_v25 = vld [vmem:[#allocation2 + $0x139] sm:$0xff] }
 0x228   : > { %v1539_v21 = vpop.permute.xlu2 %1538 }
 0x229   : > { %v1541_v55 = vpop.permute.xlu0 %1540  ;;  %1608 = vst.msk [vmem:[#allocation3 + $0x6c] sm:$0xf] %vm1580_vm8, %v1539_v21  ;;  %v1853_v21 = vld [vmem:[#allocation2 + $0xd9] sm:$0xff] }
 0x22a   : > { %1609 = vst.msk [vmem:[#allocation3 + $0x70] sm:$0xf] %vm1580_vm8, %v1541_v55  ;;  %v1893_v55 = vpack.c.bf16 %v1861_v25, %v1861_v25  ;;  %v2069_v25 = vld [vmem:[#allocation2 + $0x6a] sm:$0xff] }
 0x22c   : > { %1949 = vrot.lane.b32.xlu1 %v6004_v52, %s5351_s13  ;;  %v1841_v52 = vld [vmem:[#allocation2 + $0x49] sm:$0xff] }
 0x22e   : > { %v1543_v62 = vpop.permute.xlu1 %1542  ;;  %1772 = vrot.lane.b32.xlu2 %v1677_v61, %s5350_s12 }
 0x22f   : > { %1953 = vrot.lane.b32.xlu0 %v6056_v53, %s5351_s13  ;;  %1610 = vst.msk [vmem:[#allocation3 + $0x74] sm:$0xf] %vm1580_vm8, %v1543_v62  ;;  %v1873_v53 = vpack.c.bf16 %v1841_v52, %v1841_v52  ;;  %v1856_v52 = vld [vmem:[#allocation2 + $0xf9] sm:$0xff] }
 0x230   : > { %v1545_v13 = vpop.permute.xlu2 %1544 }
 0x231   : > { %v1547_v8 = vpop.permute.xlu0 %1546  ;;  %1611 = vst.msk [vmem:[#allocation3 + $0x78] sm:$0xf] %vm1580_vm8, %v1545_v13 }
 0x232   : > { %1612 = vst.msk [vmem:[#allocation3 + $0x7c] sm:$0xf] %vm1580_vm8, %v1547_v8 }
 0x234   : > { %1955 = vrot.lane.b32.xlu1 %v6016_v16, %s5351_s13  ;;  %v1844_v16 = vld [vmem:[#allocation2 + $0x69] sm:$0xff] }
 0x236   : > { %v1711_v45 = vpop.permute.xlu1 %1710  ;;  %1939 = vrot.lane.b32.xlu2 %v1873_v53, %s5351_s13  ;;  %v1869_v53 = vld [vmem:[#allocation2 + $0x199] sm:$0xff] }
 0x237   : > { %1959 = vrot.lane.b32.xlu0 %v6066_v59, %s5351_s13  ;;  %1807 = vst.msk [vmem:[#allocation3] sm:$0xf] %vm1806_vm9, %v1711_v45  ;;  %v1876_v59 = vpack.c.bf16 %v1844_v16, %v1844_v16  ;;  %v1901_v16 = vpack.c.bf16 %v1869_v53, %v1869_v53 }
 0x238   : > { %v1713_v11 = vpop.permute.xlu2 %1712 }
 0x239   : > { %v1715_v58 = vpop.permute.xlu0 %1714  ;;  %1808 = vst.msk [vmem:[#allocation3 + $0x4] sm:$0xf] %vm1806_vm9, %v1713_v11 }
 0x23a   : > { %1809 = vst.msk [vmem:[#allocation3 + $0x8] sm:$0xf] %vm1806_vm9, %v1715_v58 }
 0x23c   : > { %1961 = vrot.lane.b32.xlu1 %v6028_v6, %s5351_s13  ;;  %v1847_v6 = vld [vmem:[#allocation2 + $0x91] sm:$0xff] }
 0x23e   : > { %v1717_v37 = vpop.permute.xlu1 %1716  ;;  %1945 = vrot.lane.b32.xlu2 %v1876_v59, %s5351_s13 }
 0x23f   : > { %1965 = vrot.lane.b32.xlu0 %v6078_v56, %s5351_s13  ;;  %1810 = vst.msk [vmem:[#allocation3 + $0xc] sm:$0xf] %vm1806_vm9, %v1717_v37  ;;  %v1879_v56 = vpack.c.bf16 %v1847_v6, %v1847_v6  ;;  %v1870_v37 = vld [vmem:[#allocation2 + $0x1a1] sm:$0xff] }
 0x240   : > { %v1719_v51 = vpop.permute.xlu2 %1718 }
 0x241   : > { %v1721_v18 = vpop.permute.xlu0 %1720  ;;  %1811 = vst.msk [vmem:[#allocation3 + $0x10] sm:$0xf] %vm1806_vm9, %v1719_v51 }
 0x242   : > { %1812 = vst.msk [vmem:[#allocation3 + $0x14] sm:$0xf] %vm1806_vm9, %v1721_v18  ;;  %v1902_v18 = vpack.c.bf16 %v1870_v37, %v1870_v37 }
 0x244   : > { %1967 = vrot.lane.b32.xlu1 %v6040_v24, %s5351_s13  ;;  %v1850_v24 = vld [vmem:[#allocation2 + $0xb1] sm:$0xff] }
 0x246   : > { %v1723_v49 = vpop.permute.xlu1 %1722  ;;  %1951 = vrot.lane.b32.xlu2 %v1879_v56, %s5351_s13 }
 0x247   : > { %1971 = vrot.lane.b32.xlu0 %v6090_v9, %s5351_s13  ;;  %1813 = vst.msk [vmem:[#allocation3 + $0x18] sm:$0xf] %vm1806_vm9, %v1723_v49  ;;  %v1882_v9 = vpack.c.bf16 %v1850_v24, %v1850_v24  ;;  %v1865_v24 = vld [vmem:[#allocation2 + $0x169] sm:$0xff] }
 0x248   : > { %v1725_v54 = vpop.permute.xlu2 %1724 }
 0x249   : > { %v1727_v41 = vpop.permute.xlu0 %1726  ;;  %1814 = vst.msk [vmem:[#allocation3 + $0x1c] sm:$0xf] %vm1806_vm9, %v1725_v54 }
 0x24a   : > { %1815 = vst.msk [vmem:[#allocation3 + $0x20] sm:$0xf] %vm1806_vm9, %v1727_v41 }
 0x24c   : > { %1973 = vrot.lane.b32.xlu1 %v1890_v50, %s5351_s13  ;;  %v2098_v50 = vpack.c.bf16 %v2066_v31, %v2066_v31 }
 0x24e   : > { %v1729_v60 = vpop.permute.xlu1 %1728  ;;  %1957 = vrot.lane.b32.xlu2 %v1882_v9, %s5351_s13  ;;  %v1897_v9 = vpack.c.bf16 %v1865_v24, %v1865_v24  ;;  %v2084_v24 = vld [vmem:[#allocation2 + $0x122] sm:$0xff] }
 0x24f   : > { %1977 = vrot.lane.b32.xlu0 %v6099_v34, %s5351_s13  ;;  %1816 = vst.msk [vmem:[#allocation3 + $0x24] sm:$0xf] %vm1806_vm9, %v1729_v60  ;;  %v1885_v34 = vpack.c.bf16 %v1853_v21, %v1853_v21 }
 0x250   : > { %v1731_v62 = vpop.permute.xlu2 %1730 }
 0x251   : > { %v1733_v0 = vpop.permute.xlu0 %1732  ;;  %1817 = vst.msk [vmem:[#allocation3 + $0x28] sm:$0xf] %vm1806_vm9, %v1731_v62  ;;  %v2072_v62 = vld [vmem:[#allocation2 + $0x92] sm:$0xff] }
 0x252   : > { %1818 = vst.msk [vmem:[#allocation3 + $0x2c] sm:$0xf] %vm1806_vm9, %v1733_v0  ;;  %v1868_v0 = vld [vmem:[#allocation2 + $0x189] sm:$0xff] }
 0x254   : > { %1979 = vrot.lane.b32.xlu1 %v1893_v55, %s5351_s13 }
 0x256   : > { %v1735_v61 = vpop.permute.xlu1 %1734  ;;  %1963 = vrot.lane.b32.xlu2 %v1885_v34, %s5351_s13  ;;  %v1900_v34 = vpack.c.bf16 %v1868_v0, %v1868_v0  ;;  %v2079_v0 = vld [vmem:[#allocation2 + $0xe2] sm:$0xff] }
 0x257   : > { %1983 = vrot.lane.b32.xlu0 %v6109_v28, %s5351_s13  ;;  %1819 = vst.msk [vmem:[#allocation3 + $0x30] sm:$0xf] %vm1806_vm9, %v1735_v61  ;;  %v1888_v28 = vpack.c.bf16 %v1856_v52, %v1856_v52  ;;  %v2064_v52 = vld [vmem:[#allocation2 + $0x32] sm:$0xff] }
 0x258   : > { %v1737_v13 = vpop.permute.xlu2 %1736  ;;  %v2096_v53 = vpack.c.bf16 %v2064_v52, %v2064_v52 }
 0x259   : > { %v1739_v8 = vpop.permute.xlu0 %1738  ;;  %1820 = vst.msk [vmem:[#allocation3 + $0x34] sm:$0xf] %vm1806_vm9, %v1737_v13 }
 0x25a   : > { %1821 = vst.msk [vmem:[#allocation3 + $0x38] sm:$0xf] %vm1806_vm9, %v1739_v8 }
 0x25c   : > { %1985 = vrot.lane.b32.xlu1 %v6072_v63, %s5351_s13  ;;  %v1859_v63 = vld [vmem:[#allocation2 + $0x121] sm:$0xff] }
 0x25e   : > { %v1741_v45 = vpop.permute.xlu1 %1740  ;;  %1969 = vrot.lane.b32.xlu2 %v1888_v28, %s5351_s13 }
 0x25f   : > { %1989 = vrot.lane.b32.xlu0 %v6119_v23, %s5351_s13  ;;  %1822 = vst.msk [vmem:[#allocation3 + $0x3c] sm:$0xf] %vm1806_vm9, %v1741_v45  ;;  %v1891_v23 = vpack.c.bf16 %v1859_v63, %v1859_v63  ;;  %v2075_v45 = vld [vmem:[#allocation2 + $0xb2] sm:$0xff] }
 0x260   : > { %v1743_v11 = vpop.permute.xlu2 %1742 }
 0x261   : > { %v1745_v58 = vpop.permute.xlu0 %1744  ;;  %1823 = vst.msk [vmem:[#allocation3 + $0x40] sm:$0xf] %vm1806_vm9, %v1743_v11  ;;  %v2078_v11 = vld [vmem:[#allocation2 + $0xda] sm:$0xff] }
 0x262   : > { %1824 = vst.msk [vmem:[#allocation3 + $0x44] sm:$0xf] %vm1806_vm9, %v1745_v58 }
 0x264   : > { %1991 = vrot.lane.b32.xlu1 %v6084_v46, %s5351_s13  ;;  %v1862_v46 = vld [vmem:[#allocation2 + $0x141] sm:$0xff] }
 0x265   : > { %v1894_v56 = vpack.c.bf16 %v1862_v46, %v1862_v46  ;;  %v2081_v46 = vld [vmem:[#allocation2 + $0xfa] sm:$0xff] }
 0x266   : > { %v1747_v59 = vpop.permute.xlu1 %1746  ;;  %1975 = vrot.lane.b32.xlu2 %v1891_v23, %s5351_s13 }
 0x267   : > { %1995 = vrot.lane.b32.xlu0 %v1901_v16, %s5351_s13  ;;  %1825 = vst.msk [vmem:[#allocation3 + $0x48] sm:$0xf] %vm1806_vm9, %v1747_v59  ;;  %v2067_v16 = vld [vmem:[#allocation2 + $0x52] sm:$0xff] }
 0x268   : > { %v1749_v51 = vpop.permute.xlu2 %1748  ;;  %v2099_v59 = vpack.c.bf16 %v2067_v16, %v2067_v16  ;;  %v2327_v16 = vld [vmem:[%s7641_s1 + $0x10] sm:$0x3] }
 0x269   : > { %v1751_v6 = vpop.permute.xlu0 %1750  ;;  %1826 = vst.msk [vmem:[#allocation3 + $0x4c] sm:$0xf] %vm1806_vm9, %v1749_v51 }
 0x26a   : > { %1827 = vst.msk [vmem:[#allocation3 + $0x50] sm:$0xf] %vm1806_vm9, %v1751_v6 }
 0x26c   : > { %1997 = vrot.lane.b32.xlu1 %v1902_v18, %s5351_s13  ;;  %v2070_v18 = vld [vmem:[#allocation2 + $0x7a] sm:$0xff] }
 0x26d   : > { %v2102_v31 = vpack.c.bf16 %v2070_v18, %v2070_v18  ;;  %v5288_v18 = vld [vmem:[%s7641_s1 + $0x8] sm:$0xff] }
 0x26e   : > { %v1753_v49 = vpop.permute.xlu1 %1752  ;;  %1981 = vrot.lane.b32.xlu2 %v1894_v56, %s5351_s13  ;;  %v2073_v56 = vld [vmem:[#allocation2 + $0x9a] sm:$0xff] }
 0x26f   : > { %2162 = vrot.lane.b32.xlu0 %v6136_v22, %s5352_s14  ;;  %1828 = vst.msk [vmem:[#allocation3 + $0x54] sm:$0xf] %vm1806_vm9, %v1753_v49  ;;  %v2101_v22 = vpack.c.bf16 %v2069_v25, %v2069_v25 }
 0x270   : > { %v1755_v54 = vpop.permute.xlu2 %1754 }
 0x271   : > { %v1757_v41 = vpop.permute.xlu0 %1756  ;;  %1829 = vst.msk [vmem:[#allocation3 + $0x58] sm:$0xf] %vm1806_vm9, %v1755_v54  ;;  %v2105_v54 = vpack.c.bf16 %v2073_v56, %v2073_v56 }
 0x272   : > { %1830 = vst.msk [vmem:[#allocation3 + $0x5c] sm:$0xf] %vm1806_vm9, %v1757_v41 }
 0x274   : > { %2164 = vrot.lane.b32.xlu1 %v2098_v50, %s5352_s14 }
 0x276   : > { %v1759_v60 = vpop.permute.xlu1 %1758  ;;  %1987 = vrot.lane.b32.xlu2 %v1897_v9, %s5351_s13 }
 0x277   : > { %1831 = vst.msk [vmem:[#allocation3 + $0x60] sm:$0xf] %vm1806_vm9, %v1759_v60  ;;  %2168 = vrot.lane.b32.xlu0 %v6146_v27, %s5352_s14  ;;  %v2104_v27 = vpack.c.bf16 %v2072_v62, %v2072_v62  ;;  %v2076_v60 = vld [vmem:[#allocation2 + $0xc2] sm:$0xff] }
 0x278   : > { %v1761_v21 = vpop.permute.xlu2 %1760 }
 0x279   : > { %v1763_v55 = vpop.permute.xlu0 %1762  ;;  %1832 = vst.msk [vmem:[#allocation3 + $0x64] sm:$0xf] %vm1806_vm9, %v1761_v21 }
 0x27a   : > { %1833 = vst.msk [vmem:[#allocation3 + $0x68] sm:$0xf] %vm1806_vm9, %v1763_v55  ;;  %v2108_v55 = vpack.c.bf16 %v2076_v60, %v2076_v60 }
 0x27c   : > { %2170 = vrot.lane.b32.xlu1 %v2101_v22, %s5352_s14 }
 0x27e   : > { %v1765_v61 = vpop.permute.xlu1 %1764  ;;  %1993 = vrot.lane.b32.xlu2 %v1900_v34, %s5351_s13  ;;  %v2111_v34 = vpack.c.bf16 %v2079_v0, %v2079_v0 }
 0x27f   : > { %1834 = vst.msk [vmem:[#allocation3 + $0x6c] sm:$0xf] %vm1806_vm9, %v1765_v61  ;;  %2174 = vrot.lane.b32.xlu0 %v6156_v32, %s5352_s14  ;;  %v2107_v32 = vpack.c.bf16 %v2075_v45, %v2075_v45  ;;  %v2087_v61 = vld [vmem:[#allocation2 + $0x142] sm:$0xff] }
 0x280   : > { %v1767_v13 = vpop.permute.xlu2 %1766 }
 0x281   : > { %v1769_v8 = vpop.permute.xlu0 %1768  ;;  %1835 = vst.msk [vmem:[#allocation3 + $0x70] sm:$0xf] %vm1806_vm9, %v1767_v13 }
 0x282   : > { %1836 = vst.msk [vmem:[#allocation3 + $0x74] sm:$0xf] %vm1806_vm9, %v1769_v8 }
 0x284   : > { %2176 = vrot.lane.b32.xlu1 %v2104_v27, %s5352_s14  ;;  %v2119_v27 = vpack.c.bf16 %v2087_v61, %v2087_v61 }
 0x286   : > { %v1771_v28 = vpop.permute.xlu1 %1770  ;;  %2160 = vrot.lane.b32.xlu2 %v2096_v53, %s5352_s14 }
 0x287   : > { %1837 = vst.msk [vmem:[#allocation3 + $0x78] sm:$0xf] %vm1806_vm9, %v1771_v28  ;;  %2180 = vrot.lane.b32.xlu0 %v6166_v48, %s5352_s14  ;;  %v2110_v48 = vpack.c.bf16 %v2078_v11, %v2078_v11 }
 0x288   : > { %v1773_v63 = vpop.permute.xlu2 %1772 }
 0x289   : > { %v1936_v58 = vpop.permute.xlu0 %1935  ;;  %1838 = vst.msk [vmem:[#allocation3 + $0x7c] sm:$0xf] %vm1806_vm9, %v1773_v63  ;;  %v2417_v63 = vunpack.c.l.b16 %v2327_v16 }
 0x28a   : > { %2032 = vst.msk [vmem:[#allocation3] sm:$0xf] %vm2031_vm10, %v1936_v58 }
 0x28c   : > { %2182 = vrot.lane.b32.xlu1 %v2107_v32, %s5352_s14 }
 0x28e   : > { %v1938_v37 = vpop.permute.xlu1 %1937  ;;  %2166 = vrot.lane.b32.xlu2 %v2099_v59, %s5352_s14 }
 0x28f   : > { %2033 = vst.msk [vmem:[#allocation3 + $0x4] sm:$0xf] %vm2031_vm10, %v1938_v37  ;;  %2186 = vrot.lane.b32.xlu0 %v6176_v17, %s5352_s14  ;;  %v2113_v17 = vpack.c.bf16 %v2081_v46, %v2081_v46  ;;  %v2420_v37 = vpack.c.b16 %v2417_v63, %v2417_v63  ;;  %v5287_v46 = vld [vmem:[%s7641_s1] sm:$0xff] }
 0x290   : > { %v1940_v6 = vpop.permute.xlu2 %1939 }
 0x291   : > { %v1942_v23 = vpop.permute.xlu0 %1941  ;;  %2034 = vst.msk [vmem:[#allocation3 + $0x8] sm:$0xf] %vm2031_vm10, %v1940_v6  ;;  %v2474_v59 = vsel %vm2472_vm11, %v2420_v37, 0 }
 0x292   : > { %2035 = vst.msk [vmem:[#allocation3 + $0xc] sm:$0xf] %vm2031_vm10, %v1942_v23  ;;  %2481 = vmatpush.bf16.msra.mxu0 %v2474_v59  ;;  %5307 = vmatpush.bf16.msra.mxu2 %v2474_v59 }
 0x294   : > { %2188 = vrot.lane.b32.xlu1 %v2110_v48, %s5352_s14 }
 0x296   : > { %v1944_v51 = vpop.permute.xlu1 %1943  ;;  %2172 = vrot.lane.b32.xlu2 %v2102_v31, %s5352_s14  ;;  %2482 = vmatpush.bf16.msra.mxu0 %v5288_v18 }
 0x297   : > { %2036 = vst.msk [vmem:[#allocation3 + $0x10] sm:$0xf] %vm2031_vm10, %v1944_v51  ;;  %2192 = vrot.lane.b32.xlu0 %v6186_v12, %s5352_s14  ;;  %v2116_v12 = vpack.c.bf16 %v2084_v24, %v2084_v24  ;;  %5308 = vmatpush.bf16.msra.mxu2 %v5288_v18  ;;  %v2088_v24 = vld [vmem:[#allocation2 + $0x152] sm:$0xff] }
 0x298   : > { %v1946_v50 = vpop.permute.xlu2 %1945 }
 0x299   : > { %v1948_v49 = vpop.permute.xlu0 %1947  ;;  %2037 = vst.msk [vmem:[#allocation3 + $0x14] sm:$0xf] %vm2031_vm10, %v1946_v50 }
 0x29a   : > { %2038 = vst.msk [vmem:[#allocation3 + $0x18] sm:$0xf] %vm2031_vm10, %v1948_v49  ;;  %2483 = vmatpush.bf16.msra.mxu0 %v5287_v46 }
 0x29b   : > { %5309 = vmatpush.bf16.msra.mxu2 %v5287_v46 }
 0x29c   : > { %2194 = vrot.lane.b32.xlu1 %v2113_v17, %s5352_s14  ;;  %v2090_v17 = vld [vmem:[#allocation2 + $0x16a] sm:$0xff] }
 0x29d   : > { %v2122_v49 = vpack.c.bf16 %v2090_v17, %v2090_v17 }
 0x29e   : > { %v1950_v41 = vpop.permute.xlu1 %1949  ;;  %2178 = vrot.lane.b32.xlu2 %v2105_v54, %s5352_s14  ;;  %v2120_v54 = vpack.c.bf16 %v2088_v24, %v2088_v24 }
 0x29f   : > { %2039 = vst.msk [vmem:[#allocation3 + $0x1c] sm:$0xf] %vm2031_vm10, %v1950_v41  ;;  %2198 = vrot.lane.b32.xlu0 %v6195_v40, %s5352_s14 }
 0x2a0   : > { %v1952_v9 = vpop.permute.xlu2 %1951 }
 0x2a1   : > { %v1954_v25 = vpop.permute.xlu0 %1953  ;;  %2040 = vst.msk [vmem:[#allocation3 + $0x20] sm:$0xf] %vm2031_vm10, %v1952_v9  ;;  %v2092_v9 = vld [vmem:[#allocation2 + $0x182] sm:$0xff] }
 0x2a2   : > { %2041 = vst.msk [vmem:[#allocation3 + $0x24] sm:$0xf] %vm2031_vm10, %v1954_v25 }
 0x2a4   : > { %2200 = vrot.lane.b32.xlu1 %v2116_v12, %s5352_s14 }
 0x2a6   : > { %v1956_v22 = vpop.permute.xlu1 %1955  ;;  %2184 = vrot.lane.b32.xlu2 %v2108_v55, %s5352_s14  ;;  %v2124_v55 = vpack.c.bf16 %v2092_v9, %v2092_v9 }
 0x2a7   : > { %2042 = vst.msk [vmem:[#allocation3 + $0x28] sm:$0xf] %vm2031_vm10, %v1956_v22  ;;  %2204 = vrot.lane.b32.xlu0 %v6204_v33, %s5352_s14  ;;  %v2082_v33 = vld [vmem:[#allocation2 + $0x10a] sm:$0xff] }
 0x2a8   : > { %v1958_v21 = vpop.permute.xlu2 %1957  ;;  %v2114_v45 = vpack.c.bf16 %v2082_v33, %v2082_v33  ;;  %v2093_v22 = vld [vmem:[#allocation2 + $0x18a] sm:$0xff] }
 0x2a9   : > { %v1960_v40 = vpop.permute.xlu0 %1959  ;;  %2043 = vst.msk [vmem:[#allocation3 + $0x2c] sm:$0xf] %vm2031_vm10, %v1958_v21  ;;  %v2700_v21 = vld [vmem:[#allocation2 + $0x8] sm:$0xff] }
 0x2aa   : > { %2044 = vst.msk [vmem:[#allocation3 + $0x30] sm:$0xf] %vm2031_vm10, %v1960_v40  ;;  %v2125_v40 = vpack.c.bf16 %v2093_v22, %v2093_v22  ;;  %v2732_v61 = vpack.c.bf16 %v2700_v21, %v2700_v21 }
 0x2ac   : > { %2206 = vrot.lane.b32.xlu1 %v2119_v27, %s5352_s14  ;;  %v2091_v27 = vld [vmem:[#allocation2 + $0x172] sm:$0xff] }
 0x2ad   : > { %v2123_v33 = vpack.c.bf16 %v2091_v27, %v2091_v27 }
 0x2ae   : > { %v1962_v62 = vpop.permute.xlu1 %1961  ;;  %2190 = vrot.lane.b32.xlu2 %v2111_v34, %s5352_s14 }
 0x2af   : > { %2045 = vst.msk [vmem:[#allocation3 + $0x34] sm:$0xf] %vm2031_vm10, %v1962_v62  ;;  %2210 = vrot.lane.b32.xlu0 %v6213_v36, %s5352_s14  ;;  %v2085_v36 = vld [vmem:[#allocation2 + $0x12a] sm:$0xff] }
 0x2b0   : > { %v1964_v52 = vpop.permute.xlu2 %1963  ;;  %v2117_v58 = vpack.c.bf16 %v2085_v36, %v2085_v36 }
 0x2b1   : > { %v1966_v8 = vpop.permute.xlu0 %1965  ;;  %2046 = vst.msk [vmem:[#allocation3 + $0x38] sm:$0xf] %vm2031_vm10, %v1964_v52 }
 0x2b2   : > { %2047 = vst.msk [vmem:[#allocation3 + $0x3c] sm:$0xf] %vm2031_vm10, %v1966_v8  ;;  %v2699_v8 = vld [vmem:[#allocation2] sm:$0xff] }
 0x2b4   : > { %2212 = vrot.lane.b32.xlu1 %v2122_v49, %s5352_s14 }
 0x2b6   : > { %v1968_v13 = vpop.permute.xlu1 %1967  ;;  %2196 = vrot.lane.b32.xlu2 %v2114_v45, %s5352_s14  ;;  %v2731_v45 = vpack.c.bf16 %v2699_v8, %v2699_v8 }
 0x2b7   : > { %2048 = vst.msk [vmem:[#allocation3 + $0x40] sm:$0xf] %vm2031_vm10, %v1968_v13  ;;  %2216 = vrot.lane.b32.xlu0 %v2124_v55, %s5352_s14 }
 0x2b8   : > { %v1970_v53 = vpop.permute.xlu2 %1969 }
 0x2b9   : > { %v1972_v28 = vpop.permute.xlu0 %1971  ;;  %2049 = vst.msk [vmem:[#allocation3 + $0x44] sm:$0xf] %vm2031_vm10, %v1970_v53 }
 0x2ba   : > { %2050 = vst.msk [vmem:[#allocation3 + $0x48] sm:$0xf] %vm2031_vm10, %v1972_v28 }
 0x2bc   : > { %2218 = vrot.lane.b32.xlu1 %v2125_v40, %s5352_s14 }
 0x2be   : > { %v1974_v32 = vpop.permute.xlu1 %1973  ;;  %2202 = vrot.lane.b32.xlu2 %v2117_v58, %s5352_s14 }
 0x2bf   : > { %2051 = vst.msk [vmem:[#allocation3 + $0x4c] sm:$0xf] %vm2031_vm10, %v1974_v32 }
 0x2c0   : > { %v1976_v48 = vpop.permute.xlu2 %1975 }
 0x2c1   : > { %v1978_v11 = vpop.permute.xlu0 %1977  ;;  %2052 = vst.msk [vmem:[#allocation3 + $0x50] sm:$0xf] %vm2031_vm10, %v1976_v48 }
 0x2c2   : > { %2053 = vst.msk [vmem:[#allocation3 + $0x54] sm:$0xf] %vm2031_vm10, %v1978_v11 }
 0x2c6   : > { %v1980_v23 = vpop.permute.xlu1 %1979  ;;  %2208 = vrot.lane.b32.xlu2 %v2120_v54, %s5352_s14 }
 0x2c7   : > { %2054 = vst.msk [vmem:[#allocation3 + $0x58] sm:$0xf] %vm2031_vm10, %v1980_v23 }
 0x2c8   : > { %v1982_v51 = vpop.permute.xlu2 %1981 }
 0x2c9   : > { %v1984_v6 = vpop.permute.xlu0 %1983  ;;  %2055 = vst.msk [vmem:[#allocation3 + $0x5c] sm:$0xf] %vm2031_vm10, %v1982_v51 }
 0x2ca   : > { %2056 = vst.msk [vmem:[#allocation3 + $0x60] sm:$0xf] %vm2031_vm10, %v1984_v6 }
 0x2ce   : > { %v1986_v31 = vpop.permute.xlu1 %1985  ;;  %2214 = vrot.lane.b32.xlu2 %v2123_v33, %s5352_s14  ;;  %v2095_v33 = vld [vmem:[#allocation2 + $0x1a2] sm:$0xff] }
 0x2cf   : > { %2057 = vst.msk [vmem:[#allocation3 + $0x64] sm:$0xf] %vm2031_vm10, %v1986_v31 }
 0x2d0   : > { %v1988_v50 = vpop.permute.xlu2 %1987 }
 0x2d1   : > { %v1990_v56 = vpop.permute.xlu0 %1989  ;;  %2058 = vst.msk [vmem:[#allocation3 + $0x68] sm:$0xf] %vm2031_vm10, %v1988_v50 }
 0x2d2   : > { %2059 = vst.msk [vmem:[#allocation3 + $0x6c] sm:$0xf] %vm2031_vm10, %v1990_v56 }
 0x2d6   : > { %v1992_v41 = vpop.permute.xlu1 %1991 }
 0x2d7   : > { %2060 = vst.msk [vmem:[#allocation3 + $0x70] sm:$0xf] %vm2031_vm10, %v1992_v41 }
 0x2d8   : > { %v1994_v25 = vpop.permute.xlu2 %1993 }
 0x2d9   : > { %v1996_v12 = vpop.permute.xlu0 %1995  ;;  %2061 = vst.msk [vmem:[#allocation3 + $0x74] sm:$0xf] %vm2031_vm10, %v1994_v25 }
 0x2da   : > { %2062 = vst.msk [vmem:[#allocation3 + $0x78] sm:$0xf] %vm2031_vm10, %v1996_v12 }
 0x2de   : > { %v1998_v60 = vpop.permute.xlu1 %1997 }
 0x2df   : > { %2063 = vst.msk [vmem:[#allocation3 + $0x7c] sm:$0xf] %vm2031_vm10, %v1998_v60 }
 0x2e0   : > { %v2161_v62 = vpop.permute.xlu2 %2160 }
 0x2e1   : > { %v2163_v0 = vpop.permute.xlu0 %2162  ;;  %2257 = vst.msk [vmem:[#allocation3] sm:$0xf] %vm2256_vm12, %v2161_v62 }
 0x2e2   : > { %2258 = vst.msk [vmem:[#allocation3 + $0x4] sm:$0xf] %vm2256_vm12, %v2163_v0 }
 0x2e6   : > { %v2165_v34 = vpop.permute.xlu1 %2164 }
 0x2e7   : > { %2259 = vst.msk [vmem:[#allocation3 + $0x8] sm:$0xf] %vm2256_vm12, %v2165_v34 }
 0x2e8   : > { %v5093_v28 = vld [vmem:[#allocation3] sm:$0xf]  ;;  %v2167_v36 = vpop.permute.xlu2 %2166 }
 0x2e9   : > { %v5271_v52 = vld [vmem:[#allocation3] sm:$0xf0]  ;;  %v2169_v13 = vpop.permute.xlu0 %2168  ;;  %2763 = vst.msk [vmem:[#allocation3] sm:$0xf] %vm455_vm3, %v2731_v45  ;;  %v2094_v45 = vld [vmem:[#allocation2 + $0x19a] sm:$0xff] }
 0x2ea   : > { %2764 = vst.msk [vmem:[#allocation3 + $0x4] sm:$0xf] %vm455_vm3, %v2732_v61  ;;  %v5094_v53 = vor.u32 %v5271_v52, %v5093_v28  ;;  %v2795_v28 = vld [vmem:[#allocation2 + $0x1] sm:$0xff] }
 0x2eb   : > { %2261 = vst.msk [vmem:[#allocation3 + $0x10] sm:$0xf] %vm2256_vm12, %v2169_v13  ;;  %v2127_v13 = vpack.c.bf16 %v2095_v33, %v2095_v33 }
 0x2ec   : > { %2260 = vst.msk [vmem:[#allocation3 + $0xc] sm:$0xf] %vm2256_vm12, %v2167_v36  ;;  %5163 = vmatmul.msk.bf16.vlgmr.msra.gmra.mxu0 %vm2423_vm13, %v5094_v53  ;;  %v2126_v36 = vpack.c.bf16 %v2094_v45, %v2094_v45  ;;  %v2827_v53 = vpack.c.bf16 %v2795_v28, %v2795_v28 }
 0x2ed   : > { %2222 = vrot.lane.b32.xlu0 %v2127_v13, %s5352_s14 }
 0x2ee   : > { %v2171_v32 = vpop.permute.xlu1 %2170  ;;  %2220 = vrot.lane.b32.xlu2 %v2126_v36, %s5352_s14  ;;  %2891 = vrot.lane.b32.xlu1 %v2827_v53, %s5345_s30 }
 0x2ef   : > { %2262 = vst.msk [vmem:[#allocation3 + $0x14] sm:$0xf] %vm2256_vm12, %v2171_v32 }
 0x2f0   : > { %v2173_v16 = vpop.permute.xlu2 %2172 }
 0x2f1   : > { %v2175_v58 = vpop.permute.xlu0 %2174  ;;  %2263 = vst.msk [vmem:[#allocation3 + $0x18] sm:$0xf] %vm2256_vm12, %v2173_v16 }
 0x2f2   : > { %2264 = vst.msk [vmem:[#allocation3 + $0x1c] sm:$0xf] %vm2256_vm12, %v2175_v58  ;;  %v2796_v58 = vld [vmem:[#allocation2 + $0x9] sm:$0xff] }
 0x2f3   : > { %v5272_v59 = vld [vmem:[#allocation3 + $0x8] sm:$0xff] }
 0x2f6   : > { %v2177_v63 = vpop.permute.xlu1 %2176  ;;  %v5273_v31 = vld [vmem:[#allocation3 + $0x10] sm:$0xff] }
 0x2f7   : > { %2265 = vst.msk [vmem:[#allocation3 + $0x20] sm:$0xf] %vm2256_vm12, %v2177_v63  ;;  %v2828_v63 = vpack.c.bf16 %v2796_v58, %v2796_v58 }
 0x2f8   : > { %v2179_v37 = vpop.permute.xlu2 %2178 }
 0x2f9   : > { %v2181_v11 = vpop.permute.xlu0 %2180  ;;  %2266 = vst.msk [vmem:[#allocation3 + $0x24] sm:$0xf] %vm2256_vm12, %v2179_v37  ;;  %v5274_v54 = vld [vmem:[#allocation3 + $0x18] sm:$0xff]  ;;  %2893 = vrot.lane.b32.xlu2 %v2828_v63, %s5345_s30  ;;  %v6507_v37 = vld [vmem:[%s7643_s3] ss:$0 sm:$0xff] }
 0x2fa   : > { %2267 = vst.msk [vmem:[#allocation3 + $0x28] sm:$0xf] %vm2256_vm12, %v2181_v11  ;;  %v6502_v11 = vld [vmem:[%s7642_s2] ss:$0 sm:$0xff] }
 0x2fc   : > { %5164 = vmatmul.msk.bf16.gmra.mxu0 %vm2423_vm13, %v5272_v59 }
 0x2fe   : > { %v2183_v48 = vpop.permute.xlu1 %2182 }
 0x2ff   : > { %2268 = vst.msk [vmem:[#allocation3 + $0x2c] sm:$0xf] %vm2256_vm12, %v2183_v48 }
 0x300   : > { %v2185_v18 = vpop.permute.xlu2 %2184  ;;  %v5275_v9 = vld [vmem:[#allocation3 + $0x20] sm:$0xff] }
 0x301   : > { %v2187_v23 = vpop.permute.xlu0 %2186  ;;  %2269 = vst.msk [vmem:[#allocation3 + $0x30] sm:$0xf] %vm2256_vm12, %v2185_v18 }
 0x302   : > { %2270 = vst.msk [vmem:[#allocation3 + $0x34] sm:$0xf] %vm2256_vm12, %v2187_v23 }
 0x306   : > { %v2189_v6 = vpop.permute.xlu1 %2188  ;;  %v5276_v0 = vld [vmem:[#allocation3 + $0x28] sm:$0xff] }
 0x307   : > { %2271 = vst.msk [vmem:[#allocation3 + $0x38] sm:$0xf] %vm2256_vm12, %v2189_v6 }
 0x308   : > { %v2191_v51 = vpop.permute.xlu2 %2190 }
 0x309   : > { %v2193_v46 = vpop.permute.xlu0 %2192  ;;  %2272 = vst.msk [vmem:[#allocation3 + $0x3c] sm:$0xf] %vm2256_vm12, %v2191_v51  ;;  %v5277_v34 = vld [vmem:[#allocation3 + $0x30] sm:$0xff] }
 0x30a   : > { %2273 = vst.msk [vmem:[#allocation3 + $0x40] sm:$0xf] %vm2256_vm12, %v2193_v46 }
 0x30c   : > { %5165 = vmatmul.msk.bf16.gmra.mxu0 %vm2423_vm13, %v5273_v31 }
 0x30e   : > { %v2195_v17 = vpop.permute.xlu1 %2194 }
 0x30f   : > { %2274 = vst.msk [vmem:[#allocation3 + $0x44] sm:$0xf] %vm2256_vm12, %v2195_v17 }
 0x310   : > { %v2197_v56 = vpop.permute.xlu2 %2196  ;;  %v5278_v32 = vld [vmem:[#allocation3 + $0x38] sm:$0xff] }
 0x311   : > { %v2199_v49 = vpop.permute.xlu0 %2198  ;;  %2275 = vst.msk [vmem:[#allocation3 + $0x48] sm:$0xf] %vm2256_vm12, %v2197_v56 }
 0x312   : > { %2276 = vst.msk [vmem:[#allocation3 + $0x4c] sm:$0xf] %vm2256_vm12, %v2199_v49 }
 0x316   : > { %v5279_v50 = vld [vmem:[#allocation3 + $0x40] sm:$0xff]  ;;  %v2201_v41 = vpop.permute.xlu1 %2200 }
 0x317   : > { %2277 = vst.msk [vmem:[#allocation3 + $0x50] sm:$0xf] %vm2256_vm12, %v2201_v41  ;;  %5171 = vmatmul.msk.bf16.vlgmr.msra.gmra.mxu2 %vm2423_vm13, %v5279_v50 }
 0x318   : > { %v2203_v24 = vpop.permute.xlu2 %2202 }
 0x319   : > { %2278 = vst.msk [vmem:[#allocation3 + $0x54] sm:$0xf] %vm2256_vm12, %v2203_v24  ;;  %v2205_v12 = vpop.permute.xlu0 %2204  ;;  %v5280_v60 = vld [vmem:[#allocation3 + $0x48] sm:$0xff] }
 0x31a   : > { %2279 = vst.msk [vmem:[#allocation3 + $0x58] sm:$0xf] %vm2256_vm12, %v2205_v12 }
 0x31c   : > { %5166 = vmatmul.msk.bf16.gmra.mxu0 %vm2423_vm13, %v5274_v54 }
 0x31e   : > { %v2207_v25 = vpop.permute.xlu1 %2206 }
 0x31f   : > { %2280 = vst.msk [vmem:[#allocation3 + $0x5c] sm:$0xf] %vm2256_vm12, %v2207_v25 }
 0x320   : > { %v2209_v55 = vpop.permute.xlu2 %2208  ;;  %v5281_v40 = vld [vmem:[#allocation3 + $0x50] sm:$0xff] }
 0x321   : > { %v2211_v22 = vpop.permute.xlu0 %2210  ;;  %2281 = vst.msk [vmem:[#allocation3 + $0x60] sm:$0xf] %vm2256_vm12, %v2209_v55 }
 0x322   : > { %2282 = vst.msk [vmem:[#allocation3 + $0x64] sm:$0xf] %vm2256_vm12, %v2211_v22 }
 0x326   : > { %v2213_v62 = vpop.permute.xlu1 %2212  ;;  %v5282_v61 = vld [vmem:[#allocation3 + $0x58] sm:$0xff] }
 0x327   : > { %5172 = vmatmul.msk.bf16.gmra.mxu2 %vm2423_vm13, %v5280_v60  ;;  %2283 = vst.msk [vmem:[#allocation3 + $0x68] sm:$0xf] %vm2256_vm12, %v2213_v62 }
 0x328   : > { %v2215_v21 = vpop.permute.xlu2 %2214 }
 0x329   : > { %2284 = vst.msk [vmem:[#allocation3 + $0x6c] sm:$0xf] %vm2256_vm12, %v2215_v21  ;;  %v2217_v27 = vpop.permute.xlu0 %2216  ;;  %v5283_v52 = vld [vmem:[#allocation3 + $0x60] sm:$0xff] }
 0x32a   : > { %2285 = vst.msk [vmem:[#allocation3 + $0x70] sm:$0xf] %vm2256_vm12, %v2217_v27 }
 0x32c   : > { %5167 = vmatmul.msk.bf16.gmra.mxu0 %vm2423_vm13, %v5275_v9 }
 0x32e   : > { %v2219_v8 = vpop.permute.xlu1 %2218 }
 0x32f   : > { %2286 = vst.msk [vmem:[#allocation3 + $0x74] sm:$0xf] %vm2256_vm12, %v2219_v8 }
 0x330   : > { %v5284_v16 = vld [vmem:[#allocation3 + $0x68] sm:$0xff] }
 0x336   : > { %v5285_v6 = vld [vmem:[#allocation3 + $0x70] sm:$0xff] }
 0x337   : > { %5173 = vmatmul.msk.bf16.gmra.mxu2 %vm2423_vm13, %v5281_v40 }
 0x33c   : > { %5168 = vmatmul.msk.bf16.gmra.mxu0 %vm2423_vm13, %v5276_v0 }
 0x347   : > { %5174 = vmatmul.msk.bf16.gmra.mxu2 %vm2423_vm13, %v5282_v61 }
 0x34c   : > { %5169 = vmatmul.msk.bf16.gmra.mxu0 %vm2423_vm13, %v5277_v34 }
 0x357   : > { %5175 = vmatmul.msk.bf16.gmra.mxu2 %vm2423_vm13, %v5283_v52 }
 0x35c   : > { %5170 = vmatmul.msk.bf16.gmra.mxu0 %vm2423_vm13, %v5278_v32 }
 0x367   : > { %5176 = vmatmul.msk.bf16.gmra.mxu2 %vm2423_vm13, %v5284_v16 }
 0x369   : > { %v2485_v59 = vpop.f32.mrf.mxu0 }
 0x36a   : > { %v2568_v48 = vmul.f32 %v6502_v11, %v2485_v59 }
 0x36c   : > { %v2603_v23 = vadd.f32 %v6507_v37, %v2568_v48 }
 0x36e   : > { %v2635_v18 = vmax.f32 %v2603_v23, 0.0 }
 0x370   : > { %2667 = vst.msk [vmem:[#allocation2 + $0x19] sm:$0xff] %vm280_vm0, %v2635_v18 }
 0x371   : > { %v2487_v46 = vpop.f32.mrf.mxu0 }
 0x372   : > { %v2569_v51 = vmul.f32 %v6502_v11, %v2487_v46 }
 0x374   : > { %v2604_v31 = vadd.f32 %v6507_v37, %v2569_v51 }
 0x376   : > { %v2636_v17 = vmax.f32 %v2604_v31, 0.0 }
 0x377   : > { %5177 = vmatmul.msk.bf16.gmra.mxu2 %vm2423_vm13, %v5285_v6  ;;  %v2797_v49 = vld [vmem:[#allocation2 + $0x19] sm:$0xff] }
 0x378   : > { %v2701_v56 = vld [vmem:[#allocation2 + $0x18] sm:$0xff]  ;;  %2668 = vst.msk [vmem:[#allocation2 + $0x21] sm:$0xff] %vm280_vm0, %v2636_v17  ;;  %v2829_v50 = vpack.c.bf16 %v2797_v49, %v2797_v49 }
 0x379   : > { %v6516_v41 = vpack.c.bf16 %v2701_v56, %v2701_v56  ;;  %v2490_v24 = vpop.f32.mrf.mxu0 }
 0x37a   : > { %v2570_v54 = vmul.f32 %v6502_v11, %v2490_v24  ;;  %2895 = vrot.lane.b32.xlu0 %v2829_v50, %s5345_s30 }
 0x37b   : > { %2765 = vst.msk [vmem:[#allocation3 + $0x8] sm:$0xf] %vm455_vm3, %v6516_v41 }
 0x37c   : > { %v2605_v12 = vadd.f32 %v6507_v37, %v2570_v54 }
 0x37e   : > { %v2637_v25 = vmax.f32 %v2605_v12, 0.0 }
 0x37f   : > { %v2798_v60 = vld [vmem:[#allocation2 + $0x21] sm:$0xff] }
 0x380   : > { %v2702_v9 = vld [vmem:[#allocation2 + $0x20] sm:$0xff]  ;;  %2669 = vst.msk [vmem:[#allocation2 + $0x31] sm:$0xff] %vm280_vm0, %v2637_v25  ;;  %v2830_v22 = vpack.c.bf16 %v2798_v60, %v2798_v60 }
 0x381   : > { %v6524_v55 = vpack.c.bf16 %v2702_v9, %v2702_v9  ;;  %v2492_v40 = vpop.f32.mrf.mxu0  ;;  %v3022_v7 = vld [vmem:[#allocation2 + $0x22] sm:$0xff] }
 0x382   : > { %v2571_v0 = vmul.f32 %v6502_v11, %v2492_v40  ;;  %2897 = vrot.lane.b32.xlu1 %v2830_v22, %s5345_s30 }
 0x383   : > { %2766 = vst.msk [vmem:[#allocation3 + $0xc] sm:$0xf] %vm455_vm3, %v6524_v55 }
 0x384   : > { %v2606_v21 = vadd.f32 %v6507_v37, %v2571_v0 }
 0x386   : > { %v2638_v62 = vmax.f32 %v2606_v21, 0.0 }
 0x387   : > { %v2799_v61 = vld [vmem:[#allocation2 + $0x31] sm:$0xff] }
 0x388   : > { %v2703_v34 = vld [vmem:[#allocation2 + $0x30] sm:$0xff]  ;;  %2670 = vst.msk [vmem:[#allocation2 + $0x39] sm:$0xff] %vm280_vm0, %v2638_v62  ;;  %v2831_v27 = vpack.c.bf16 %v2799_v61, %v2799_v61 }
 0x389   : > { %v6532_v8 = vpack.c.bf16 %v2703_v34, %v2703_v34  ;;  %v2495_v33 = vpop.f32.mrf.mxu0 }
 0x38a   : > { %v2572_v52 = vmul.f32 %v6502_v11, %v2495_v33  ;;  %2899 = vrot.lane.b32.xlu2 %v2831_v27, %s5345_s30 }
 0x38b   : > { %2767 = vst.msk [vmem:[#allocation3 + $0x10] sm:$0xf] %vm455_vm3, %v6532_v8 }
 0x38c   : > { %v2607_v13 = vadd.f32 %v6507_v37, %v2572_v52 }
 0x38e   : > { %v2639_v45 = vmax.f32 %v2607_v13, 0.0 }
 0x38f   : > { %v2800_v28 = vld [vmem:[#allocation2 + $0x39] sm:$0xff] }
 0x390   : > { %v2704_v36 = vld [vmem:[#allocation2 + $0x38] sm:$0xff]  ;;  %2671 = vst.msk [vmem:[#allocation2 + $0x49] sm:$0xff] %vm280_vm0, %v2639_v45  ;;  %v2832_v53 = vpack.c.bf16 %v2800_v28, %v2800_v28 }
 0x391   : > { %v6540_v32 = vpack.c.bf16 %v2704_v36, %v2704_v36  ;;  %v2497_v58 = vpop.f32.mrf.mxu0  ;;  %v3024_v30 = vld [vmem:[#allocation2 + $0x3a] sm:$0xff] }
 0x392   : > { %v2573_v16 = vmul.f32 %v6502_v11, %v2497_v58  ;;  %2901 = vrot.lane.b32.xlu0 %v2832_v53, %s5345_s30  ;;  %v3056_v43 = vpack.c.bf16 %v3024_v30, %v3024_v30 }
 0x393   : > { %2768 = vst.msk [vmem:[#allocation3 + $0x14] sm:$0xf] %vm455_vm3, %v6540_v32 }
 0x394   : > { %v2608_v63 = vadd.f32 %v6507_v37, %v2573_v16 }
 0x396   : > { %v2640_v59 = vmax.f32 %v2608_v63, 0.0 }
 0x397   : > { %v2801_v48 = vld [vmem:[#allocation2 + $0x49] sm:$0xff] }
 0x398   : > { %v2705_v18 = vld [vmem:[#allocation2 + $0x48] sm:$0xff]  ;;  %2672 = vst.msk [vmem:[#allocation2 + $0x51] sm:$0xff] %vm280_vm0, %v2640_v59  ;;  %v2833_v6 = vpack.c.bf16 %v2801_v48, %v2801_v48 }
 0x399   : > { %v6549_v51 = vpack.c.bf16 %v2705_v18, %v2705_v18  ;;  %v2500_v31 = vpop.f32.mrf.mxu0 }
 0x39a   : > { %v2525_v23 = vpop.f32.mrf.mxu2  ;;  %v2574_v17 = vmul.f32 %v6502_v11, %v2500_v31  ;;  %2903 = vrot.lane.b32.xlu1 %v2833_v6, %s5345_s30 }
 0x39b   : > { %v2584_v46 = vmul.f32 %v6502_v11, %v2525_v23  ;;  %2769 = vst.msk [vmem:[#allocation3 + $0x18] sm:$0xf] %vm455_vm3, %v6549_v51 }
 0x39c   : > { %v2609_v56 = vadd.f32 %v6507_v37, %v2574_v17 }
 0x39d   : > { %v2619_v49 = vadd.f32 %v6507_v37, %v2584_v46 }
 0x39e   : > { %v2641_v24 = vmax.f32 %v2609_v56, 0.0 }
 0x39f   : > { %v2651_v50 = vmax.f32 %v2619_v49, 0.0  ;;  %v2802_v54 = vld [vmem:[#allocation2 + $0x51] sm:$0xff] }
 0x3a0   : > { %v2706_v25 = vld [vmem:[#allocation2 + $0x50] sm:$0xff]  ;;  %2673 = vst.msk [vmem:[#allocation2 + $0x61] sm:$0xff] %vm280_vm0, %v2641_v24  ;;  %v2834_v60 = vpack.c.bf16 %v2802_v54, %v2802_v54 }
 0x3a1   : > { %2683 = vst.msk [vmem:[#allocation2 + $0xd9] sm:$0xff] %vm280_vm0, %v2651_v50  ;;  %v6560_v22 = vpack.c.bf16 %v2706_v25, %v2706_v25  ;;  %v2502_v40 = vpop.f32.mrf.mxu0 }
 0x3a2   : > { %v2527_v12 = vpop.f32.mrf.mxu2  ;;  %v2575_v0 = vmul.f32 %v6502_v11, %v2502_v40  ;;  %2905 = vrot.lane.b32.xlu2 %v2834_v60, %s5345_s30 }
 0x3a3   : > { %v2585_v9 = vmul.f32 %v6502_v11, %v2527_v12  ;;  %2770 = vst.msk [vmem:[#allocation3 + $0x1c] sm:$0xf] %vm455_vm3, %v6560_v22 }
 0x3a4   : > { %v2610_v62 = vadd.f32 %v6507_v37, %v2575_v0 }
 0x3a5   : > { %v2620_v21 = vadd.f32 %v6507_v37, %v2585_v9  ;;  %v2221_v9 = vpop.permute.xlu2 %2220 }
 0x3a6   : > { %v2642_v27 = vmax.f32 %v2610_v62, 0.0  ;;  %2287 = vst.msk [vmem:[#allocation3 + $0x78] sm:$0xf] %vm2256_vm12, %v2221_v9  ;;  %v2223_v9 = vpop.permute.xlu0 %2222 }
 0x3a7   : > { %v2652_v61 = vmax.f32 %v2620_v21, 0.0  ;;  %v2803_v52 = vld [vmem:[#allocation2 + $0x61] sm:$0xff]  ;;  %2288 = vst.msk [vmem:[#allocation3 + $0x7c] sm:$0xf] %vm2256_vm12, %v2223_v9 }
 0x3a8   : > { %v2717_v34 = vld [vmem:[#allocation2 + $0xd8] sm:$0xff]  ;;  %v2707_v45 = vld [vmem:[#allocation2 + $0x60] sm:$0xff]  ;;  %2674 = vst.msk [vmem:[#allocation2 + $0x69] sm:$0xff] %vm280_vm0, %v2642_v27  ;;  %v2835_v28 = vpack.c.bf16 %v2803_v52, %v2803_v52 }
 0x3a9   : > { %2684 = vst.msk [vmem:[#allocation2 + $0xe1] sm:$0xff] %vm280_vm0, %v2652_v61  ;;  %v6569_v33 = vpack.c.bf16 %v2717_v34, %v2717_v34  ;;  %v6573_v53 = vpack.c.bf16 %v2707_v45, %v2707_v45  ;;  %v2505_v58 = vpop.f32.mrf.mxu0 }
 0x3aa   : > { %v2530_v13 = vpop.f32.mrf.mxu2  ;;  %v2576_v16 = vmul.f32 %v6502_v11, %v2505_v58  ;;  %2907 = vrot.lane.b32.xlu0 %v2835_v28, %s5345_s30 }
 0x3ab   : > { %v2586_v36 = vmul.f32 %v6502_v11, %v2530_v13  ;;  %2781 = vst.msk [vmem:[#allocation3 + $0x48] sm:$0xf] %vm455_vm3, %v6569_v33 }
 0x3ac   : > { %2771 = vst.msk [vmem:[#allocation3 + $0x20] sm:$0xf] %vm455_vm3, %v6573_v53  ;;  %v2611_v59 = vadd.f32 %v6507_v37, %v2576_v16 }
 0x3ad   : > { %v2621_v63 = vadd.f32 %v6507_v37, %v2586_v36 }
 0x3ae   : > { %v2643_v23 = vmax.f32 %v2611_v59, 0.0 }
 0x3af   : > { %v2653_v48 = vmax.f32 %v2621_v63, 0.0  ;;  %v2804_v6 = vld [vmem:[#allocation2 + $0x69] sm:$0xff]  ;;  %v2894_v63 = vpop.permute.xlu2 %2893 }
 0x3b0   : > { %v2718_v18 = vld [vmem:[#allocation2 + $0xe0] sm:$0xff]  ;;  %v2708_v31 = vld [vmem:[#allocation2 + $0x68] sm:$0xff]  ;;  %2675 = vst.msk [vmem:[#allocation2 + $0x79] sm:$0xff] %vm280_vm0, %v2643_v23  ;;  %v2836_v49 = vpack.c.bf16 %v2804_v6, %v2804_v6 }
 0x3b1   : > { %2685 = vst.msk [vmem:[#allocation2 + $0xf1] sm:$0xff] %vm280_vm0, %v2653_v48  ;;  %v6584_v17 = vpack.c.bf16 %v2718_v18, %v2718_v18  ;;  %v6588_v50 = vpack.c.bf16 %v2708_v31, %v2708_v31  ;;  %v2507_v24 = vpop.f32.mrf.mxu0 }
 0x3b2   : > { %v2532_v46 = vpop.f32.mrf.mxu2  ;;  %v2577_v54 = vmul.f32 %v6502_v11, %v2507_v24  ;;  %2909 = vrot.lane.b32.xlu1 %v2836_v49, %s5345_s30  ;;  %2988 = vst.msk [vmem:[#allocation3 + $0x4] sm:$0xf] %vm680_vm4, %v2894_v63 }
 0x3b3   : > { %v2587_v56 = vmul.f32 %v6502_v11, %v2532_v46  ;;  %2782 = vst.msk [vmem:[#allocation3 + $0x4c] sm:$0xf] %vm455_vm3, %v6584_v17 }
 0x3b4   : > { %2772 = vst.msk [vmem:[#allocation3 + $0x24] sm:$0xf] %vm455_vm3, %v6588_v50  ;;  %v2612_v25 = vadd.f32 %v6507_v37, %v2577_v54 }
 0x3b5   : > { %v2622_v12 = vadd.f32 %v6507_v37, %v2587_v56 }
 0x3b6   : > { %v2644_v0 = vmax.f32 %v2612_v25, 0.0 }
 0x3b7   : > { %v2654_v60 = vmax.f32 %v2622_v12, 0.0  ;;  %v2805_v62 = vld [vmem:[#allocation2 + $0x79] sm:$0xff] }
 0x3b8   : > { %v2719_v40 = vld [vmem:[#allocation2 + $0xf0] sm:$0xff]  ;;  %v2709_v34 = vld [vmem:[#allocation2 + $0x78] sm:$0xff]  ;;  %2676 = vst.msk [vmem:[#allocation2 + $0x81] sm:$0xff] %vm280_vm0, %v2644_v0  ;;  %v2837_v27 = vpack.c.bf16 %v2805_v62, %v2805_v62 }
 0x3b9   : > { %2686 = vst.msk [vmem:[#allocation2 + $0xf9] sm:$0xff] %vm280_vm0, %v2654_v60  ;;  %v6600_v21 = vpack.c.bf16 %v2719_v40, %v2719_v40  ;;  %v6604_v13 = vpack.c.bf16 %v2709_v34, %v2709_v34  ;;  %v2510_v45 = vpop.f32.mrf.mxu0 }
 0x3ba   : > { %v2535_v61 = vpop.f32.mrf.mxu2  ;;  %v2578_v28 = vmul.f32 %v6502_v11, %v2510_v45  ;;  %2911 = vrot.lane.b32.xlu2 %v2837_v27, %s5345_s30 }
 0x3bb   : > { %v2588_v52 = vmul.f32 %v6502_v11, %v2535_v61  ;;  %2783 = vst.msk [vmem:[#allocation3 + $0x50] sm:$0xf] %vm455_vm3, %v6600_v21 }
 0x3bc   : > { %2773 = vst.msk [vmem:[#allocation3 + $0x28] sm:$0xf] %vm455_vm3, %v6604_v13  ;;  %v2613_v58 = vadd.f32 %v6507_v37, %v2578_v28 }
 0x3bd   : > { %v2623_v36 = vadd.f32 %v6507_v37, %v2588_v52 }
 0x3be   : > { %v2645_v59 = vmax.f32 %v2613_v58, 0.0 }
 0x3bf   : > { %v2655_v16 = vmax.f32 %v2623_v36, 0.0  ;;  %v2806_v23 = vld [vmem:[#allocation2 + $0x81] sm:$0xff] }
 0x3c0   : > { %v2720_v48 = vld [vmem:[#allocation2 + $0xf8] sm:$0xff]  ;;  %v2710_v6 = vld [vmem:[#allocation2 + $0x80] sm:$0xff]  ;;  %2677 = vst.msk [vmem:[#allocation2 + $0x91] sm:$0xff] %vm280_vm0, %v2645_v59  ;;  %v2838_v31 = vpack.c.bf16 %v2806_v23, %v2806_v23 }
 0x3c1   : > { %2687 = vst.msk [vmem:[#allocation2 + $0x109] sm:$0xff] %vm280_vm0, %v2655_v16  ;;  %v6616_v46 = vpack.c.bf16 %v2720_v48, %v2720_v48  ;;  %v6620_v56 = vpack.c.bf16 %v2710_v6, %v2710_v6  ;;  %v2512_v24 = vpop.f32.mrf.mxu0  ;;  %v2892_v48 = vpop.permute.xlu1 %2891 }
 0x3c2   : > { %v2537_v18 = vpop.f32.mrf.mxu2  ;;  %v2579_v54 = vmul.f32 %v6502_v11, %v2512_v24  ;;  %2913 = vrot.lane.b32.xlu0 %v2838_v31, %s5345_s30  ;;  %2987 = vst.msk [vmem:[#allocation3] sm:$0xf] %vm680_vm4, %v2892_v48 }
 0x3c3   : > { %v2589_v49 = vmul.f32 %v6502_v11, %v2537_v18  ;;  %2784 = vst.msk [vmem:[#allocation3 + $0x54] sm:$0xf] %vm455_vm3, %v6616_v46 }
 0x3c4   : > { %2774 = vst.msk [vmem:[#allocation3 + $0x2c] sm:$0xf] %vm455_vm3, %v6620_v56  ;;  %v2614_v25 = vadd.f32 %v6507_v37, %v2579_v54 }
 0x3c5   : > { %v2624_v12 = vadd.f32 %v6507_v37, %v2589_v49 }
 0x3c6   : > { %v2646_v0 = vmax.f32 %v2614_v25, 0.0 }
 0x3c7   : > { %v2656_v60 = vmax.f32 %v2624_v12, 0.0  ;;  %v2807_v61 = vld [vmem:[#allocation2 + $0x91] sm:$0xff] }
 0x3c8   : > { %v2721_v40 = vld [vmem:[#allocation2 + $0x108] sm:$0xff]  ;;  %v2711_v27 = vld [vmem:[#allocation2 + $0x90] sm:$0xff]  ;;  %2678 = vst.msk [vmem:[#allocation2 + $0x99] sm:$0xff] %vm280_vm0, %v2646_v0  ;;  %v2839_v52 = vpack.c.bf16 %v2807_v61, %v2807_v61 }
 0x3c9   : > { %2688 = vst.msk [vmem:[#allocation2 + $0x111] sm:$0xff] %vm280_vm0, %v2656_v60  ;;  %v6632_v62 = vpack.c.bf16 %v2721_v40, %v2721_v40  ;;  %v6636_v28 = vpack.c.bf16 %v2711_v27, %v2711_v27  ;;  %v2515_v36 = vpop.f32.mrf.mxu0 }
 0x3ca   : > { %v2540_v34 = vpop.f32.mrf.mxu2  ;;  %v2580_v58 = vmul.f32 %v6502_v11, %v2515_v36  ;;  %2915 = vrot.lane.b32.xlu1 %v2839_v52, %s5345_s30 }
 0x3cb   : > { %v2590_v45 = vmul.f32 %v6502_v11, %v2540_v34  ;;  %2785 = vst.msk [vmem:[#allocation3 + $0x58] sm:$0xf] %vm455_vm3, %v6632_v62 }
 0x3cc   : > { %2775 = vst.msk [vmem:[#allocation3 + $0x30] sm:$0xf] %vm455_vm3, %v6636_v28  ;;  %v2615_v63 = vadd.f32 %v6507_v37, %v2580_v58 }
 0x3cd   : > { %v2625_v16 = vadd.f32 %v6507_v37, %v2590_v45 }
 0x3ce   : > { %v2647_v23 = vmax.f32 %v2615_v63, 0.0 }
 0x3cf   : > { %v2657_v59 = vmax.f32 %v2625_v16, 0.0  ;;  %v2808_v6 = vld [vmem:[#allocation2 + $0x99] sm:$0xff] }
 0x3d0   : > { %v2722_v18 = vld [vmem:[#allocation2 + $0x110] sm:$0xff]  ;;  %v2712_v49 = vld [vmem:[#allocation2 + $0x98] sm:$0xff]  ;;  %2679 = vst.msk [vmem:[#allocation2 + $0xa9] sm:$0xff] %vm280_vm0, %v2647_v23  ;;  %v2840_v54 = vpack.c.bf16 %v2808_v6, %v2808_v6 }
 0x3d1   : > { %2689 = vst.msk [vmem:[#allocation2 + $0x121] sm:$0xff] %vm280_vm0, %v2657_v59  ;;  %v6648_v24 = vpack.c.bf16 %v2722_v18, %v2722_v18  ;;  %v6652_v25 = vpack.c.bf16 %v2712_v49, %v2712_v49  ;;  %v2517_v60 = vpop.f32.mrf.mxu0  ;;  %v3032_v30 = vld [vmem:[#allocation2 + $0x9a] sm:$0xff] }
 0x3d2   : > { %v2542_v31 = vpop.f32.mrf.mxu2  ;;  %v2581_v9 = vmul.f32 %v6502_v11, %v2517_v60  ;;  %2917 = vrot.lane.b32.xlu2 %v2840_v54, %s5345_s30 }
 0x3d3   : > { %v2591_v12 = vmul.f32 %v6502_v11, %v2542_v31  ;;  %2786 = vst.msk [vmem:[#allocation3 + $0x5c] sm:$0xf] %vm455_vm3, %v6648_v24 }
 0x3d4   : > { %2776 = vst.msk [vmem:[#allocation3 + $0x34] sm:$0xf] %vm455_vm3, %v6652_v25  ;;  %v2616_v0 = vadd.f32 %v6507_v37, %v2581_v9 }
 0x3d5   : > { %v2626_v40 = vadd.f32 %v6507_v37, %v2591_v12 }
 0x3d6   : > { %v2648_v27 = vmax.f32 %v2616_v0, 0.0 }
 0x3d7   : > { %v2658_v61 = vmax.f32 %v2626_v40, 0.0  ;;  %v2809_v45 = vld [vmem:[#allocation2 + $0xa9] sm:$0xff] }
 0x3d8   : > { %v2723_v34 = vld [vmem:[#allocation2 + $0x120] sm:$0xff]  ;;  %v2713_v58 = vld [vmem:[#allocation2 + $0xa8] sm:$0xff]  ;;  %2680 = vst.msk [vmem:[#allocation2 + $0xb1] sm:$0xff] %vm280_vm0, %v2648_v27  ;;  %v2841_v16 = vpack.c.bf16 %v2809_v45, %v2809_v45 }
 0x3d9   : > { %2690 = vst.msk [vmem:[#allocation2 + $0x129] sm:$0xff] %vm280_vm0, %v2658_v61  ;;  %v6663_v52 = vpack.c.bf16 %v2723_v34, %v2723_v34  ;;  %v6667_v59 = vpack.c.bf16 %v2713_v58, %v2713_v58  ;;  %v2520_v48 = vpop.f32.mrf.mxu0 }
 0x3da   : > { %v2545_v36 = vpop.f32.mrf.mxu2  ;;  %v2582_v23 = vmul.f32 %v6502_v11, %v2520_v48  ;;  %2919 = vrot.lane.b32.xlu0 %v2841_v16, %s5345_s30  ;;  %v2813_v48 = vld [vmem:[#allocation2 + $0xd9] sm:$0xff] }
 0x3db   : > { %v2592_v63 = vmul.f32 %v6502_v11, %v2545_v36  ;;  %2787 = vst.msk [vmem:[#allocation3 + $0x60] sm:$0xf] %vm455_vm3, %v6663_v52 }
 0x3dc   : > { %2777 = vst.msk [vmem:[#allocation3 + $0x38] sm:$0xf] %vm455_vm3, %v6667_v59  ;;  %v2617_v6 = vadd.f32 %v6507_v37, %v2582_v23 }
 0x3dd   : > { %v2627_v18 = vadd.f32 %v6507_v37, %v2592_v63 }
 0x3de   : > { %v2649_v49 = vmax.f32 %v2617_v6, 0.0 }
 0x3df   : > { %v2659_v31 = vmax.f32 %v2627_v18, 0.0  ;;  %v2810_v12 = vld [vmem:[#allocation2 + $0xb1] sm:$0xff] }
 0x3e0   : > { %v2724_v54 = vld [vmem:[#allocation2 + $0x128] sm:$0xff]  ;;  %2681 = vst.msk [vmem:[#allocation2 + $0xc1] sm:$0xff] %vm280_vm0, %v2649_v49  ;;  %v2842_v40 = vpack.c.bf16 %v2810_v12, %v2810_v12  ;;  %v2714_v61 = vld [vmem:[#allocation2 + $0xb0] sm:$0xff]  ;;  %v2845_v12 = vpack.c.bf16 %v2813_v48, %v2813_v48 }
 0x3e1   : > { %2691 = vst.msk [vmem:[#allocation2 + $0x139] sm:$0xff] %vm280_vm0, %v2659_v31  ;;  %v6678_v9 = vpack.c.bf16 %v2724_v54, %v2724_v54  ;;  %v2522_v34 = vpop.f32.mrf.mxu0  ;;  %v6682_v27 = vpack.c.bf16 %v2714_v61, %v2714_v61 }
 0x3e2   : > { %v2547_v60 = vpop.f32.mrf.mxu2  ;;  %v2583_v45 = vmul.f32 %v6502_v11, %v2522_v34  ;;  %2921 = vrot.lane.b32.xlu1 %v2842_v40, %s5345_s30 }
 0x3e3   : > { %v2593_v0 = vmul.f32 %v6502_v11, %v2547_v60  ;;  %2788 = vst.msk [vmem:[#allocation3 + $0x64] sm:$0xf] %vm455_vm3, %v6678_v9 }
 0x3e4   : > { %2778 = vst.msk [vmem:[#allocation3 + $0x3c] sm:$0xf] %vm455_vm3, %v6682_v27  ;;  %v2618_v58 = vadd.f32 %v6507_v37, %v2583_v45  ;;  %v2900_v16 = vpop.permute.xlu2 %2899 }
 0x3e5   : > { %v2628_v36 = vadd.f32 %v6507_v37, %v2593_v0  ;;  %2991 = vst.msk [vmem:[#allocation3 + $0x10] sm:$0xf] %vm680_vm4, %v2900_v16 }
 0x3e6   : > { %v2650_v18 = vmax.f32 %v2618_v58, 0.0  ;;  %v2814_v58 = vld [vmem:[#allocation2 + $0xe1] sm:$0xff] }
 0x3e7   : > { %v2660_v63 = vmax.f32 %v2628_v36, 0.0  ;;  %v2811_v31 = vld [vmem:[#allocation2 + $0xc1] sm:$0xff]  ;;  %v2816_v36 = vld [vmem:[#allocation2 + $0xf9] sm:$0xff] }
 0x3e8   : > { %v2725_v23 = vld [vmem:[#allocation2 + $0x138] sm:$0xff]  ;;  %v2715_v54 = vld [vmem:[#allocation2 + $0xc0] sm:$0xff]  ;;  %2682 = vst.msk [vmem:[#allocation2 + $0xc9] sm:$0xff] %vm280_vm0, %v2650_v18  ;;  %v2843_v60 = vpack.c.bf16 %v2811_v31, %v2811_v31  ;;  %v2848_v18 = vpack.c.bf16 %v2816_v36, %v2816_v36  ;;  %v2846_v31 = vpack.c.bf16 %v2814_v58, %v2814_v58  ;;  %v2817_v36 = vld [vmem:[#allocation2 + $0x109] sm:$0xff] }
 0x3e9   : > { %2692 = vst.msk [vmem:[#allocation2 + $0x141] sm:$0xff] %vm280_vm0, %v2660_v63  ;;  %v6694_v6 = vpack.c.bf16 %v2725_v23, %v2725_v23  ;;  %v6698_v0 = vpack.c.bf16 %v2715_v54, %v2715_v54  ;;  %v5286_v58 = vld [vmem:[#allocation3 + $0x78] sm:$0xff] }
 0x3ea   : > { %v2550_v49 = vpop.f32.mrf.mxu2  ;;  %2927 = vrot.lane.b32.xlu1 %v2845_v12, %s5345_s30  ;;  %2923 = vrot.lane.b32.xlu2 %v2843_v60, %s5345_s30 }
 0x3eb   : > { %v2594_v40 = vmul.f32 %v6502_v11, %v2550_v49  ;;  %2789 = vst.msk [vmem:[#allocation3 + $0x68] sm:$0xf] %vm455_vm3, %v6694_v6  ;;  %5178 = vmatmul.msk.bf16.gmra.mxu2 %vm2423_vm13, %v5286_v58  ;;  %v2818_v58 = vld [vmem:[#allocation2 + $0x111] sm:$0xff] }
 0x3ec   : > { %2779 = vst.msk [vmem:[#allocation3 + $0x40] sm:$0xf] %vm455_vm3, %v6698_v0  ;;  %v2896_v34 = vpop.permute.xlu0 %2895  ;;  %v6742_v39 = vpack.c.bf16 %v2818_v58, %v2818_v58 }
 0x3ed   : > { %v2629_v61 = vadd.f32 %v6507_v37, %v2594_v40  ;;  %2989 = vst.msk [vmem:[#allocation3 + $0x8] sm:$0xf] %vm680_vm4, %v2896_v34 }
 0x3ef   : > { %v2661_v45 = vmax.f32 %v2629_v61, 0.0  ;;  %v2812_v63 = vld [vmem:[#allocation2 + $0xc9] sm:$0xff] }
 0x3f0   : > { %v2726_v16 = vld [vmem:[#allocation2 + $0x140] sm:$0xff]  ;;  %v2844_v49 = vpack.c.bf16 %v2812_v63, %v2812_v63  ;;  %v2716_v12 = vld [vmem:[#allocation2 + $0xc8] sm:$0xff] }
 0x3f1   : > { %2693 = vst.msk [vmem:[#allocation2 + $0x151] sm:$0xff] %vm280_vm0, %v2661_v45  ;;  %v6709_v23 = vpack.c.bf16 %v2726_v16, %v2726_v16  ;;  %v6712_v60 = vpack.c.bf16 %v2716_v12, %v2716_v12  ;;  %v2819_v45 = vld [vmem:[#allocation2 + $0x121] sm:$0xff]  ;;  %v2815_v16 = vld [vmem:[#allocation2 + $0xf1] sm:$0xff] }
 0x3f2   : > { %v2552_v48 = vpop.f32.mrf.mxu2  ;;  %2933 = vrot.lane.b32.xlu1 %v2848_v18, %s5345_s30  ;;  %2929 = vrot.lane.b32.xlu2 %v2846_v31, %s5345_s30  ;;  %v2851_v31 = vpack.c.bf16 %v2819_v45, %v2819_v45  ;;  %v6728_v12 = vpack.c.bf16 %v2815_v16, %v2815_v16  ;;  %v2822_v45 = vld [vmem:[#allocation2 + $0x141] sm:$0xff] }
 0x3f3   : > { %v2595_v54 = vmul.f32 %v6502_v11, %v2552_v48  ;;  %2790 = vst.msk [vmem:[#allocation3 + $0x6c] sm:$0xf] %vm455_vm3, %v6709_v23  ;;  %2925 = vrot.lane.b32.xlu0 %v2844_v49, %s5345_s30  ;;  %v2849_v49 = vpack.c.bf16 %v2817_v36, %v2817_v36  ;;  %v2820_v36 = vld [vmem:[#allocation2 + $0x129] sm:$0xff] }
 0x3f4   : > { %2780 = vst.msk [vmem:[#allocation3 + $0x44] sm:$0xf] %vm455_vm3, %v6712_v60  ;;  %v2898_v61 = vpop.permute.xlu1 %2897 }
 0x3f5   : > { %v2630_v40 = vadd.f32 %v6507_v37, %v2595_v54  ;;  %2990 = vst.msk [vmem:[#allocation3 + $0xc] sm:$0xf] %vm680_vm4, %v2898_v61 }
 0x3f7   : > { %v2662_v34 = vmax.f32 %v2630_v40, 0.0 }
 0x3f8   : > { %v2727_v63 = vld [vmem:[#allocation2 + $0x150] sm:$0xff] }
 0x3f9   : > { %2694 = vst.msk [vmem:[#allocation2 + $0x159] sm:$0xff] %vm280_vm0, %v2662_v34  ;;  %v6725_v18 = vpack.c.bf16 %v2727_v63, %v2727_v63 }
 0x3fa   : > { %v2555_v48 = vpop.f32.mrf.mxu2  ;;  %2939 = vrot.lane.b32.xlu1 %v2851_v31, %s5345_s30  ;;  %2935 = vrot.lane.b32.xlu2 %v2849_v49, %s5345_s30  ;;  %v2854_v31 = vpack.c.bf16 %v2822_v45, %v2822_v45  ;;  %v2852_v49 = vpack.c.bf16 %v2820_v36, %v2820_v36  ;;  %v2823_v45 = vld [vmem:[#allocation2 + $0x151] sm:$0xff] }
 0x3fb   : > { %v2596_v54 = vmul.f32 %v6502_v11, %v2555_v48  ;;  %2791 = vst.msk [vmem:[#allocation3 + $0x70] sm:$0xf] %vm455_vm3, %v6725_v18  ;;  %2931 = vrot.lane.b32.xlu0 %v6728_v12, %s5345_s30 }
 0x3fc   : > { %v2906_v61 = vpop.permute.xlu2 %2905 }
 0x3fd   : > { %v2631_v40 = vadd.f32 %v6507_v37, %v2596_v54  ;;  %2994 = vst.msk [vmem:[#allocation3 + $0x1c] sm:$0xf] %vm680_vm4, %v2906_v61 }
 0x3ff   : > { %v2663_v34 = vmax.f32 %v2631_v40, 0.0 }
 0x400   : > { %v2728_v16 = vld [vmem:[#allocation2 + $0x158] sm:$0xff] }
 0x401   : > { %2695 = vst.msk [vmem:[#allocation2 + $0x169] sm:$0xff] %vm280_vm0, %v2663_v34  ;;  %v6739_v48 = vpack.c.bf16 %v2728_v16, %v2728_v16  ;;  %v2821_v16 = vld [vmem:[#allocation2 + $0x139] sm:$0xff] }
 0x402   : > { %v2557_v63 = vpop.f32.mrf.mxu2  ;;  %2945 = vrot.lane.b32.xlu1 %v2854_v31, %s5345_s30  ;;  %2941 = vrot.lane.b32.xlu2 %v2852_v49, %s5345_s30  ;;  %v2855_v31 = vpack.c.bf16 %v2823_v45, %v2823_v45  ;;  %v3020_v49 = vld [vmem:[#allocation2 + $0xa] sm:$0xff] }
 0x403   : > { %v2597_v54 = vmul.f32 %v6502_v11, %v2557_v63  ;;  %2792 = vst.msk [vmem:[#allocation3 + $0x74] sm:$0xf] %vm455_vm3, %v6739_v48  ;;  %2937 = vrot.lane.b32.xlu0 %v6742_v39, %s5345_s30 }
 0x404   : > { %v2902_v61 = vpop.permute.xlu0 %2901 }
 0x405   : > { %v2632_v40 = vadd.f32 %v6507_v37, %v2597_v54  ;;  %2992 = vst.msk [vmem:[#allocation3 + $0x14] sm:$0xf] %vm680_vm4, %v2902_v61  ;;  %v6757_v37 = vpack.c.bf16 %v2821_v16, %v2821_v16  ;;  %v2824_v61 = vld [vmem:[#allocation2 + $0x159] sm:$0xff] }
 0x406   : > { %v6766_v16 = vpack.c.bf16 %v2824_v61, %v2824_v61 }
 0x407   : > { %v2664_v34 = vmax.f32 %v2632_v40, 0.0 }
 0x408   : > { %v2825_v36 = vld [vmem:[#allocation2 + $0x169] sm:$0xff] }
 0x409   : > { %v2729_v58 = vld [vmem:[#allocation2 + $0x168] sm:$0xff]  ;;  %2696 = vst.msk [vmem:[#allocation2 + $0x171] sm:$0xff] %vm280_vm0, %v2664_v34  ;;  %v2857_v63 = vpack.c.bf16 %v2825_v36, %v2825_v36  ;;  %v3052_v34 = vpack.c.bf16 %v3020_v49, %v3020_v49  ;;  %v3023_v49 = vld [vmem:[#allocation2 + $0x32] sm:$0xff] }
 0x40a   : > { %v6753_v14 = vpack.c.bf16 %v2729_v58, %v2729_v58  ;;  %2947 = vrot.lane.b32.xlu2 %v2855_v31, %s5345_s30  ;;  %v3019_v31 = vld [vmem:[#allocation2 + $0x2] sm:$0xff] }
 0x40b   : > { %2951 = vrot.lane.b32.xlu1 %v2857_v63, %s5345_s30  ;;  %2943 = vrot.lane.b32.xlu0 %v6757_v37, %s5345_s30 }
 0x40c   : > { %2793 = vst.msk [vmem:[#allocation3 + $0x78] sm:$0xf] %vm455_vm3, %v6753_v14  ;;  %v2904_v54 = vpop.permute.xlu1 %2903 }
 0x40d   : > { %2993 = vst.msk [vmem:[#allocation3 + $0x18] sm:$0xf] %vm680_vm4, %v2904_v54  ;;  %v3021_v54 = vld [vmem:[#allocation2 + $0x1a] sm:$0xff] }
 0x40e   : > { %v3053_v61 = vpack.c.bf16 %v3021_v54, %v3021_v54  ;;  %v3027_v54 = vld [vmem:[#allocation2 + $0x62] sm:$0xff] }
 0x410   : > { %v2826_v40 = vld [vmem:[#allocation2 + $0x171] sm:$0xff] }
 0x411   : > { %v2858_v45 = vpack.c.bf16 %v2826_v40, %v2826_v40  ;;  %v2730_v36 = vld [vmem:[#allocation2 + $0x170] sm:$0xff]  ;;  %v3051_v40 = vpack.c.bf16 %v3019_v31, %v3019_v31 }
 0x412   : > { %v6764_v58 = vpack.c.bf16 %v2730_v36, %v2730_v36  ;;  %v3055_v36 = vpack.c.bf16 %v3023_v49, %v3023_v49  ;;  %v3029_v49 = vld [vmem:[#allocation2 + $0x7a] sm:$0xff] }
 0x413   : > { %3117 = vrot.lane.b32.xlu1 %v3052_v34, %s5346_s8  ;;  %2953 = vrot.lane.b32.xlu2 %v2858_v45, %s5345_s30  ;;  %v3026_v45 = vld [vmem:[#allocation2 + $0x52] sm:$0xff] }
 0x414   : > { %2794 = vst.msk [vmem:[#allocation3 + $0x7c] sm:$0xf] %vm455_vm3, %v6764_v58  ;;  %2949 = vrot.lane.b32.xlu0 %v6766_v16, %s5345_s30  ;;  %v2912_v63 = vpop.permute.xlu2 %2911  ;;  %v3058_v47 = vpack.c.bf16 %v3026_v45, %v3026_v45  ;;  %v3064_v45 = vpack.c.bf16 %v3032_v30, %v3032_v30 }
 0x415   : > { %2997 = vst.msk [vmem:[#allocation3 + $0x28] sm:$0xf] %vm680_vm4, %v2912_v63  ;;  %v6779_v63 = vpack.c.bf16 %v3022_v7, %v3022_v7 }
 0x41b   : > { %3123 = vrot.lane.b32.xlu1 %v3055_v36, %s5346_s8  ;;  %3119 = vrot.lane.b32.xlu2 %v3053_v61, %s5346_s8  ;;  %v3061_v36 = vpack.c.bf16 %v3029_v49, %v3029_v49  ;;  %v3059_v61 = vpack.c.bf16 %v3027_v54, %v3027_v54  ;;  %v3033_v54 = vld [vmem:[#allocation2 + $0xaa] sm:$0xff] }
 0x41c   : > { %3115 = vrot.lane.b32.xlu0 %v3051_v40, %s5346_s8  ;;  %v2908_v34 = vpop.permute.xlu0 %2907  ;;  %v3025_v40 = vld [vmem:[#allocation2 + $0x4a] sm:$0xff] }
 0x41d   : > { %2995 = vst.msk [vmem:[#allocation3 + $0x20] sm:$0xf] %vm680_vm4, %v2908_v34  ;;  %v6786_v34 = vpack.c.bf16 %v3025_v40, %v3025_v40  ;;  %v3035_v40 = vld [vmem:[#allocation2 + $0xc2] sm:$0xff] }
 0x423   : > { %3129 = vrot.lane.b32.xlu1 %v3058_v47, %s5346_s8  ;;  %3125 = vrot.lane.b32.xlu2 %v3056_v43, %s5346_s8  ;;  %v3030_v47 = vld [vmem:[#allocation2 + $0x82] sm:$0xff]  ;;  %v3028_v43 = vld [vmem:[#allocation2 + $0x6a] sm:$0xff] }
 0x424   : > { %3121 = vrot.lane.b32.xlu0 %v6779_v63, %s5346_s8  ;;  %v2910_v31 = vpop.permute.xlu1 %2909  ;;  %v6793_v5 = vpack.c.bf16 %v3028_v43, %v3028_v43  ;;  %v3038_v43 = vld [vmem:[#allocation2 + $0xe2] sm:$0xff] }
 0x425   : > { %2996 = vst.msk [vmem:[#allocation3 + $0x24] sm:$0xf] %vm680_vm4, %v2910_v31  ;;  %v3062_v31 = vpack.c.bf16 %v3030_v47, %v3030_v47  ;;  %v3036_v47 = vld [vmem:[#allocation2 + $0xca] sm:$0xff] }
 0x42b   : > { %3135 = vrot.lane.b32.xlu1 %v3061_v36, %s5346_s8  ;;  %3131 = vrot.lane.b32.xlu2 %v3059_v61, %s5346_s8  ;;  %v3031_v36 = vld [vmem:[#allocation2 + $0x92] sm:$0xff]  ;;  %v3065_v61 = vpack.c.bf16 %v3033_v54, %v3033_v54 }
 0x42c   : > { %3127 = vrot.lane.b32.xlu0 %v6786_v34, %s5346_s8  ;;  %v2918_v7 = vpop.permute.xlu2 %2917  ;;  %v6800_v20 = vpack.c.bf16 %v3031_v36, %v3031_v36  ;;  %v3041_v36 = vld [vmem:[#allocation2 + $0x10a] sm:$0xff] }
 0x42d   : > { %3000 = vst.msk [vmem:[#allocation3 + $0x34] sm:$0xf] %vm680_vm4, %v2918_v7  ;;  %v3067_v7 = vpack.c.bf16 %v3035_v40, %v3035_v40  ;;  %v3039_v40 = vld [vmem:[#allocation2 + $0xf2] sm:$0xff] }
 0x433   : > { %3141 = vrot.lane.b32.xlu1 %v3064_v45, %s5346_s8  ;;  %3137 = vrot.lane.b32.xlu2 %v3062_v31, %s5346_s8  ;;  %v3034_v45 = vld [vmem:[#allocation2 + $0xb2] sm:$0xff]  ;;  %v3068_v31 = vpack.c.bf16 %v3036_v47, %v3036_v47 }
 0x434   : > { %3133 = vrot.lane.b32.xlu0 %v6793_v5, %s5346_s8  ;;  %v2914_v49 = vpop.permute.xlu0 %2913  ;;  %v6807_v44 = vpack.c.bf16 %v3034_v45, %v3034_v45  ;;  %v3042_v45 = vld [vmem:[#allocation2 + $0x112] sm:$0xff] }
 0x435   : > { %2998 = vst.msk [vmem:[#allocation3 + $0x2c] sm:$0xf] %vm680_vm4, %v2914_v49  ;;  %v3070_v49 = vpack.c.bf16 %v3038_v43, %v3038_v43 }
 0x43b   : > { %3143 = vrot.lane.b32.xlu2 %v3065_v61, %s5346_s8  ;;  %3147 = vrot.lane.b32.xlu1 %v3067_v7, %s5346_s8  ;;  %v3037_v61 = vld [vmem:[#allocation2 + $0xda] sm:$0xff]  ;;  %v3071_v7 = vpack.c.bf16 %v3039_v40, %v3039_v40 }
 0x43c   : > { %3139 = vrot.lane.b32.xlu0 %v6800_v20, %s5346_s8  ;;  %v2916_v30 = vpop.permute.xlu1 %2915  ;;  %v3069_v38 = vpack.c.bf16 %v3037_v61, %v3037_v61  ;;  %v3045_v61 = vld [vmem:[#allocation2 + $0x13a] sm:$0xff] }
 0x43d   : > { %2999 = vst.msk [vmem:[#allocation3 + $0x30] sm:$0xf] %vm680_vm4, %v2916_v30  ;;  %v3073_v30 = vpack.c.bf16 %v3041_v36, %v3041_v36 }
 0x443   : > { %3149 = vrot.lane.b32.xlu2 %v3068_v31, %s5346_s8  ;;  %3153 = vrot.lane.b32.xlu1 %v3070_v49, %s5346_s8  ;;  %v3044_v31 = vld [vmem:[#allocation2 + $0x12a] sm:$0xff]  ;;  %v3040_v49 = vld [vmem:[#allocation2 + $0xfa] sm:$0xff] }
 0x444   : > { %3145 = vrot.lane.b32.xlu0 %v6807_v44, %s5346_s8  ;;  %v2924_v54 = vpop.permute.xlu2 %2923  ;;  %v3076_v4 = vpack.c.bf16 %v3044_v31, %v3044_v31  ;;  %v6819_v40 = vpack.c.bf16 %v3040_v49, %v3040_v49  ;;  %v3048_v49 = vld [vmem:[#allocation2 + $0x15a] sm:$0xff] }
 0x445   : > { %3003 = vst.msk [vmem:[#allocation3 + $0x40] sm:$0xf] %vm680_vm4, %v2924_v54  ;;  %v3074_v54 = vpack.c.bf16 %v3042_v45, %v3042_v45 }
 0x44b   : > { %3155 = vrot.lane.b32.xlu2 %v3071_v7, %s5346_s8  ;;  %3159 = vrot.lane.b32.xlu1 %v3073_v30, %s5346_s8  ;;  %v3047_v7 = vld [vmem:[#allocation2 + $0x152] sm:$0xff]  ;;  %v3043_v30 = vld [vmem:[#allocation2 + $0x122] sm:$0xff] }
 0x44c   : > { %3151 = vrot.lane.b32.xlu0 %v3069_v38, %s5346_s8  ;;  %v2920_v47 = vpop.permute.xlu0 %2919  ;;  %v2930_v43 = vpop.permute.xlu2 %2929  ;;  %v6827_v45 = vpack.c.bf16 %v3043_v30, %v3043_v30 }
 0x44d   : > { %3001 = vst.msk [vmem:[#allocation3 + $0x38] sm:$0xf] %vm680_vm4, %v2920_v47  ;;  %v3077_v47 = vpack.c.bf16 %v3045_v61, %v3045_v61 }
 0x44e   : > { %3006 = vst.msk [vmem:[#allocation3 + $0x4c] sm:$0xf] %vm680_vm4, %v2930_v43  ;;  %v3079_v43 = vpack.c.bf16 %v3047_v7, %v3047_v7 }
 0x453   : > { %3161 = vrot.lane.b32.xlu2 %v3074_v54, %s5346_s8  ;;  %3165 = vrot.lane.b32.xlu1 %v3076_v4, %s5346_s8  ;;  %v3050_v54 = vld [vmem:[#allocation2 + $0x172] sm:$0xff] }
 0x454   : > { %3157 = vrot.lane.b32.xlu0 %v6819_v40, %s5346_s8  ;;  %v2922_v38 = vpop.permute.xlu1 %2921  ;;  %v2936_v36 = vpop.permute.xlu2 %2935  ;;  %v3082_v61 = vpack.c.bf16 %v3050_v54, %v3050_v54 }
 0x455   : > { %3002 = vst.msk [vmem:[#allocation3 + $0x3c] sm:$0xf] %vm680_vm4, %v2922_v38  ;;  %v3046_v38 = vld [vmem:[#allocation2 + $0x142] sm:$0xff] }
 0x456   : > { %3009 = vst.msk [vmem:[#allocation3 + $0x58] sm:$0xf] %vm680_vm4, %v2936_v36  ;;  %v3080_v36 = vpack.c.bf16 %v3048_v49, %v3048_v49  ;;  %v3078_v7 = vpack.c.bf16 %v3046_v38, %v3046_v38 }
 0x45b   : > { %3167 = vrot.lane.b32.xlu2 %v3077_v47, %s5346_s8  ;;  %3171 = vrot.lane.b32.xlu1 %v3079_v43, %s5346_s8 }
 0x45c   : > { %3163 = vrot.lane.b32.xlu0 %v6827_v45, %s5346_s8  ;;  %v2928_v4 = vpop.permute.xlu1 %2927  ;;  %v2942_v31 = vpop.permute.xlu2 %2941 }
 0x45d   : > { %3005 = vst.msk [vmem:[#allocation3 + $0x48] sm:$0xf] %vm680_vm4, %v2928_v4  ;;  %v3049_v4 = vld [vmem:[#allocation2 + $0x16a] sm:$0xff] }
 0x45e   : > { %3012 = vst.msk [vmem:[#allocation3 + $0x64] sm:$0xf] %vm680_vm4, %v2942_v31  ;;  %v3081_v31 = vpack.c.bf16 %v3049_v4, %v3049_v4 }
 0x463   : > { %3173 = vrot.lane.b32.xlu2 %v3080_v36, %s5346_s8  ;;  %3177 = vrot.lane.b32.xlu1 %v3082_v61, %s5346_s8 }
 0x464   : > { %3169 = vrot.lane.b32.xlu0 %v3078_v7, %s5346_s8  ;;  %v2934_v30 = vpop.permute.xlu1 %2933  ;;  %v2948_v47 = vpop.permute.xlu2 %2947 }
 0x465   : > { %3008 = vst.msk [vmem:[#allocation3 + $0x54] sm:$0xf] %vm680_vm4, %v2934_v30  ;;  %v2926_v43 = vpop.permute.xlu0 %2925 }
 0x466   : > { %3015 = vst.msk [vmem:[#allocation3 + $0x70] sm:$0xf] %vm680_vm4, %v2948_v47 }
 0x467   : > { %3004 = vst.msk [vmem:[#allocation3 + $0x44] sm:$0xf] %vm680_vm4, %v2926_v43 }
 0x46b   : > { %3339 = vrot.lane.b32.xlu2 %v6516_v41, %s5347_s9  ;;  %3343 = vrot.lane.b32.xlu1 %v6532_v8, %s5347_s9 }
 0x46c   : > { %3175 = vrot.lane.b32.xlu0 %v3081_v31, %s5346_s8  ;;  %v2940_v49 = vpop.permute.xlu1 %2939 }
 0x46d   : > { %v2954_v54 = vpop.permute.xlu2 %2953  ;;  %3011 = vst.msk [vmem:[#allocation3 + $0x60] sm:$0xf] %vm680_vm4, %v2940_v49  ;;  %v2932_v38 = vpop.permute.xlu0 %2931 }
 0x46e   : > { %3007 = vst.msk [vmem:[#allocation3 + $0x50] sm:$0xf] %vm680_vm4, %v2932_v38  ;;  %v2560_v61 = vpop.f32.mrf.mxu2 }
 0x46f   : > { %3018 = vst.msk [vmem:[#allocation3 + $0x7c] sm:$0xf] %vm680_vm4, %v2954_v54  ;;  %v2598_v7 = vmul.f32 %v6502_v11, %v2560_v61  ;;  %v3470_v61 = vld [vmem:[#allocation2 + $0x39] sm:$0xff] }
 0x473   : > { %3345 = vrot.lane.b32.xlu2 %v6540_v32, %s5347_s9  ;;  %3349 = vrot.lane.b32.xlu1 %v6560_v22, %s5347_s9 }
 0x474   : > { %3341 = vrot.lane.b32.xlu0 %v6524_v55, %s5347_s9  ;;  %v2946_v41 = vpop.permute.xlu1 %2945 }
 0x475   : > { %v3120_v8 = vpop.permute.xlu2 %3119  ;;  %3014 = vst.msk [vmem:[#allocation3 + $0x6c] sm:$0xf] %vm680_vm4, %v2946_v41  ;;  %v2938_v36 = vpop.permute.xlu0 %2937 }
 0x476   : > { %3010 = vst.msk [vmem:[#allocation3 + $0x5c] sm:$0xf] %vm680_vm4, %v2938_v36  ;;  %v2562_v11 = vpop.f32.mrf.mxu2  ;;  %v3467_v36 = vld [vmem:[#allocation2 + $0x19] sm:$0xff] }
 0x477   : > { %3213 = vst.msk [vmem:[#allocation3 + $0x8] sm:$0xf] %vm905_vm5, %v3120_v8 }
 0x47b   : > { %3351 = vrot.lane.b32.xlu2 %v6573_v53, %s5347_s9  ;;  %3355 = vrot.lane.b32.xlu1 %v6604_v13, %s5347_s9 }
 0x47c   : > { %3347 = vrot.lane.b32.xlu0 %v6549_v51, %s5347_s9  ;;  %v5334_v51 = vld [vmem:[%s7643_s3] ss:$0 sm:$0xff] }
 0x47d   : > { %v2952_v32 = vpop.permute.xlu1 %2951  ;;  %v3126_v55 = vpop.permute.xlu2 %3125  ;;  %v2633_v53 = vadd.f32 %v5334_v51, %v2598_v7 }
 0x47e   : > { %v2944_v22 = vpop.permute.xlu0 %2943  ;;  %3017 = vst.msk [vmem:[#allocation3 + $0x78] sm:$0xf] %vm680_vm4, %v2952_v32 }
 0x47f   : > { %3013 = vst.msk [vmem:[#allocation3 + $0x68] sm:$0xf] %vm680_vm4, %v2944_v22  ;;  %v2665_v47 = vmax.f32 %v2633_v53, 0.0  ;;  %v3468_v22 = vld [vmem:[#allocation2 + $0x21] sm:$0xff]  ;;  %v6946_v53 = vpack.c.bf16 %v3470_v61, %v3470_v61 }
 0x480   : > { %3216 = vst.msk [vmem:[#allocation3 + $0x14] sm:$0xf] %vm905_vm5, %v3126_v55  ;;  %v3499_v55 = vpack.c.bf16 %v3467_v36, %v3467_v36 }
 0x481   : > { %2697 = vst.msk [vmem:[#allocation2 + $0x181] sm:$0xff] %vm280_vm0, %v2665_v47 }
 0x483   : > { %3357 = vrot.lane.b32.xlu2 %v6620_v56, %s5347_s9  ;;  %3361 = vrot.lane.b32.xlu1 %v6652_v25, %s5347_s9  ;;  %v5335_v56 = vld [vmem:[%s7642_s2] ss:$0 sm:$0xff] }
 0x484   : > { %3353 = vrot.lane.b32.xlu0 %v6588_v50, %s5347_s9  ;;  %v2599_v25 = vmul.f32 %v5335_v56, %v2562_v11  ;;  %v3473_v11 = vld [vmem:[#allocation2 + $0x61] sm:$0xff]  ;;  %v3469_v56 = vld [vmem:[#allocation2 + $0x31] sm:$0xff] }
 0x485   : > { %v3118_v13 = vpop.permute.xlu1 %3117  ;;  %v3132_v30 = vpop.permute.xlu2 %3131 }
 0x486   : > { %v2950_v43 = vpop.permute.xlu0 %2949  ;;  %3212 = vst.msk [vmem:[#allocation3 + $0x4] sm:$0xf] %vm905_vm5, %v3118_v13  ;;  %v2634_v50 = vadd.f32 %v5334_v51, %v2599_v25  ;;  %v3500_v51 = vpack.c.bf16 %v3468_v22, %v3468_v22 }
 0x487   : > { %3016 = vst.msk [vmem:[#allocation3 + $0x74] sm:$0xf] %vm680_vm4, %v2950_v43  ;;  %v3471_v43 = vld [vmem:[#allocation2 + $0x49] sm:$0xff] }
 0x488   : > { %3219 = vst.msk [vmem:[#allocation3 + $0x20] sm:$0xf] %vm905_vm5, %v3132_v30  ;;  %v2666_v49 = vmax.f32 %v2634_v50, 0.0  ;;  %v3273_v8 = vld [vmem:[#allocation2 + $0x180] sm:$0xff]  ;;  %v6955_v25 = vpack.c.bf16 %v3471_v43, %v3471_v43  ;;  %v6957_v50 = vpack.c.bf16 %v3473_v11, %v3473_v11 }
 0x489   : > { %v3305_v32 = vpack.c.bf16 %v3273_v8, %v3273_v8 }
 0x48a   : > { %2698 = vst.msk [vmem:[#allocation2 + $0x189] sm:$0xff] %vm280_vm0, %v2666_v49 }
 0x48b   : > { %3363 = vrot.lane.b32.xlu2 %v6667_v59, %s5347_s9  ;;  %3367 = vrot.lane.b32.xlu1 %v6698_v0, %s5347_s9 }
 0x48c   : > { %3359 = vrot.lane.b32.xlu0 %v6636_v28, %s5347_s9 }
 0x48d   : > { %v3124_v4 = vpop.permute.xlu1 %3123  ;;  %v3138_v31 = vpop.permute.xlu2 %3137 }
 0x48e   : > { %v3116_v54 = vpop.permute.xlu0 %3115  ;;  %3215 = vst.msk [vmem:[#allocation3 + $0x10] sm:$0xf] %vm905_vm5, %v3124_v4  ;;  %v6959_v4 = vpack.c.bf16 %v3469_v56, %v3469_v56 }
 0x48f   : > { %3211 = vst.msk [vmem:[#allocation3] sm:$0xf] %vm905_vm5, %v3116_v54 }
 0x490   : > { %3222 = vst.msk [vmem:[#allocation3 + $0x2c] sm:$0xf] %vm905_vm5, %v3138_v31 }
 0x491   : > { %v3274_v7 = vld [vmem:[#allocation2 + $0x188] sm:$0xff] }
 0x492   : > { %v3306_v13 = vpack.c.bf16 %v3274_v7, %v3274_v7 }
 0x493   : > { %3369 = vrot.lane.b32.xlu2 %v6712_v60, %s5347_s9  ;;  %3373 = vrot.lane.b32.xlu1 %v6584_v17, %s5347_s9 }
 0x494   : > { %3365 = vrot.lane.b32.xlu0 %v6682_v27, %s5347_s9 }
 0x495   : > { %v3130_v28 = vpop.permute.xlu1 %3129  ;;  %v3144_v59 = vpop.permute.xlu2 %3143 }
 0x496   : > { %v3122_v0 = vpop.permute.xlu0 %3121  ;;  %3218 = vst.msk [vmem:[#allocation3 + $0x1c] sm:$0xf] %vm905_vm5, %v3130_v28  ;;  %v3474_v28 = vld [vmem:[#allocation2 + $0x69] sm:$0xff] }
 0x497   : > { %3214 = vst.msk [vmem:[#allocation3 + $0xc] sm:$0xf] %vm905_vm5, %v3122_v0  ;;  %v3472_v0 = vld [vmem:[#allocation2 + $0x51] sm:$0xff] }
 0x498   : > { %3225 = vst.msk [vmem:[#allocation3 + $0x38] sm:$0xf] %vm905_vm5, %v3144_v59  ;;  %v3476_v59 = vld [vmem:[#allocation2 + $0x81] sm:$0xff] }
 0x49b   : > { %3375 = vrot.lane.b32.xlu2 %v6600_v21, %s5347_s9  ;;  %3379 = vrot.lane.b32.xlu1 %v6632_v62, %s5347_s9 }
 0x49c   : > { %3371 = vrot.lane.b32.xlu0 %v6569_v33, %s5347_s9 }
 0x49d   : > { %v3136_v17 = vpop.permute.xlu1 %3135  ;;  %v3150_v27 = vpop.permute.xlu2 %3149 }
 0x49e   : > { %v3128_v60 = vpop.permute.xlu0 %3127  ;;  %3221 = vst.msk [vmem:[#allocation3 + $0x28] sm:$0xf] %vm905_vm5, %v3136_v17  ;;  %v6970_v17 = vpack.c.bf16 %v3474_v28, %v3474_v28 }
 0x49f   : > { %3217 = vst.msk [vmem:[#allocation3 + $0x18] sm:$0xf] %vm905_vm5, %v3128_v60  ;;  %v6974_v60 = vpack.c.bf16 %v3472_v0, %v3472_v0 }
 0x4a0   : > { %3228 = vst.msk [vmem:[#allocation3 + $0x44] sm:$0xf] %vm905_vm5, %v3150_v27  ;;  %v6972_v27 = vpack.c.bf16 %v3476_v59, %v3476_v59 }
 0x4a3   : > { %3381 = vrot.lane.b32.xlu2 %v6648_v24, %s5347_s9  ;;  %3385 = vrot.lane.b32.xlu1 %v6678_v9, %s5347_s9 }
 0x4a4   : > { %3377 = vrot.lane.b32.xlu0 %v6616_v46, %s5347_s9 }
 0x4a5   : > { %v3142_v62 = vpop.permute.xlu1 %3141  ;;  %v3156_v33 = vpop.permute.xlu2 %3155 }
 0x4a6   : > { %v3134_v38 = vpop.permute.xlu0 %3133  ;;  %3224 = vst.msk [vmem:[#allocation3 + $0x34] sm:$0xf] %vm905_vm5, %v3142_v62 }
 0x4a7   : > { %3220 = vst.msk [vmem:[#allocation3 + $0x24] sm:$0xf] %vm905_vm5, %v3134_v38 }
 0x4a8   : > { %3231 = vst.msk [vmem:[#allocation3 + $0x50] sm:$0xf] %vm905_vm5, %v3156_v33 }
 0x4ab   : > { %3387 = vrot.lane.b32.xlu2 %v6694_v6, %s5347_s9  ;;  %3391 = vrot.lane.b32.xlu1 %v6725_v18, %s5347_s9 }
 0x4ac   : > { %3383 = vrot.lane.b32.xlu0 %v6663_v52, %s5347_s9 }
 0x4ad   : > { %v3162_v24 = vpop.permute.xlu2 %3161  ;;  %v3148_v9 = vpop.permute.xlu1 %3147 }
 0x4ae   : > { %v3140_v41 = vpop.permute.xlu0 %3139  ;;  %3234 = vst.msk [vmem:[#allocation3 + $0x5c] sm:$0xf] %vm905_vm5, %v3162_v24  ;;  %v3477_v24 = vld [vmem:[#allocation2 + $0x91] sm:$0xff] }
 0x4af   : > { %3223 = vst.msk [vmem:[#allocation3 + $0x30] sm:$0xf] %vm905_vm5, %v3140_v41  ;;  %v3475_v41 = vld [vmem:[#allocation2 + $0x79] sm:$0xff] }
 0x4b0   : > { %3227 = vst.msk [vmem:[#allocation3 + $0x40] sm:$0xf] %vm905_vm5, %v3148_v9  ;;  %v3479_v9 = vld [vmem:[#allocation2 + $0xa9] sm:$0xff] }
 0x4b3   : > { %3393 = vrot.lane.b32.xlu2 %v6739_v48, %s5347_s9  ;;  %3397 = vrot.lane.b32.xlu1 %v6764_v58, %s5347_s9 }
 0x4b4   : > { %3389 = vrot.lane.b32.xlu0 %v6709_v23, %s5347_s9 }
 0x4b5   : > { %v3168_v6 = vpop.permute.xlu2 %3167  ;;  %v3154_v52 = vpop.permute.xlu1 %3153 }
 0x4b6   : > { %v3146_v18 = vpop.permute.xlu0 %3145  ;;  %3237 = vst.msk [vmem:[#allocation3 + $0x68] sm:$0xf] %vm905_vm5, %v3168_v6  ;;  %v3509_v6 = vpack.c.bf16 %v3477_v24, %v3477_v24 }
 0x4b7   : > { %3226 = vst.msk [vmem:[#allocation3 + $0x3c] sm:$0xf] %vm905_vm5, %v3146_v18  ;;  %v6985_v18 = vpack.c.bf16 %v3475_v41, %v3475_v41 }
 0x4b8   : > { %3230 = vst.msk [vmem:[#allocation3 + $0x4c] sm:$0xf] %vm905_vm5, %v3154_v52  ;;  %v3511_v52 = vpack.c.bf16 %v3479_v9, %v3479_v9 }
 0x4bb   : > { %3399 = vrot.lane.b32.xlu2 %v3305_v32, %s5347_s9  ;;  %3563 = vrot.lane.b32.xlu1 %v3499_v55, %s5348_s10  ;;  %v3480_v55 = vld [vmem:[#allocation2 + $0xb1] sm:$0xff] }
 0x4bc   : > { %3395 = vrot.lane.b32.xlu0 %v6753_v14, %s5347_s9 }
 0x4bd   : > { %v3174_v23 = vpop.permute.xlu2 %3173  ;;  %v3160_v48 = vpop.permute.xlu1 %3159 }
 0x4be   : > { %v3152_v58 = vpop.permute.xlu0 %3151  ;;  %3240 = vst.msk [vmem:[#allocation3 + $0x74] sm:$0xf] %vm905_vm5, %v3174_v23  ;;  %v3482_v23 = vld [vmem:[#allocation2 + $0xc9] sm:$0xff] }
 0x4bf   : > { %3229 = vst.msk [vmem:[#allocation3 + $0x48] sm:$0xf] %vm905_vm5, %v3152_v58  ;;  %v3512_v58 = vpack.c.bf16 %v3480_v55, %v3480_v55  ;;  %v3514_v22 = vpack.c.bf16 %v3482_v23, %v3482_v23 }
 0x4c0   : > { %3233 = vst.msk [vmem:[#allocation3 + $0x58] sm:$0xf] %vm905_vm5, %v3160_v48  ;;  %v3478_v48 = vld [vmem:[#allocation2 + $0x99] sm:$0xff] }
 0x4c1   : > { %v3510_v61 = vpack.c.bf16 %v3478_v48, %v3478_v48  ;;  %v3495_v48 = vld [vmem:[#allocation2 + $0x169] sm:$0xff] }
 0x4c3   : > { %3565 = vrot.lane.b32.xlu2 %v3500_v51, %s5348_s10  ;;  %3569 = vrot.lane.b32.xlu1 %v6946_v53, %s5348_s10 }
 0x4c4   : > { %3401 = vrot.lane.b32.xlu0 %v3306_v13, %s5347_s9 }
 0x4c5   : > { %v3340_v14 = vpop.permute.xlu2 %3339  ;;  %v3166_v30 = vpop.permute.xlu1 %3165 }
 0x4c6   : > { %v3158_v47 = vpop.permute.xlu0 %3157  ;;  %3435 = vst.msk [vmem:[#allocation3] sm:$0xf] %vm1130_vm6, %v3340_v14  ;;  %v3483_v14 = vld [vmem:[#allocation2 + $0xd9] sm:$0xff] }
 0x4c7   : > { %3232 = vst.msk [vmem:[#allocation3 + $0x54] sm:$0xf] %vm905_vm5, %v3158_v47  ;;  %v3515_v47 = vpack.c.bf16 %v3483_v14, %v3483_v14 }
 0x4c8   : > { %3236 = vst.msk [vmem:[#allocation3 + $0x64] sm:$0xf] %vm905_vm5, %v3166_v30  ;;  %v3481_v30 = vld [vmem:[#allocation2 + $0xc1] sm:$0xff] }
 0x4c9   : > { %v3513_v43 = vpack.c.bf16 %v3481_v30, %v3481_v30  ;;  %v3498_v30 = vld [vmem:[#allocation2 + $0x189] sm:$0xff] }
 0x4cb   : > { %3571 = vrot.lane.b32.xlu2 %v6955_v25, %s5348_s10  ;;  %3575 = vrot.lane.b32.xlu1 %v6957_v50, %s5348_s10 }
 0x4cc   : > { %3567 = vrot.lane.b32.xlu0 %v6959_v4, %s5348_s10 }
 0x4cd   : > { %v3346_v31 = vpop.permute.xlu2 %3345  ;;  %v3172_v49 = vpop.permute.xlu1 %3171 }
 0x4ce   : > { %v3164_v54 = vpop.permute.xlu0 %3163  ;;  %3438 = vst.msk [vmem:[#allocation3 + $0xc] sm:$0xf] %vm1130_vm6, %v3346_v31 }
 0x4cf   : > { %3235 = vst.msk [vmem:[#allocation3 + $0x60] sm:$0xf] %vm905_vm5, %v3164_v54  ;;  %v3484_v54 = vld [vmem:[#allocation2 + $0xe1] sm:$0xff] }
 0x4d0   : > { %3239 = vst.msk [vmem:[#allocation3 + $0x70] sm:$0xf] %vm905_vm5, %v3172_v49  ;;  %v3486_v49 = vld [vmem:[#allocation2 + $0xf9] sm:$0xff]  ;;  %v3516_v59 = vpack.c.bf16 %v3484_v54, %v3484_v54 }
 0x4d1   : > { %v7007_v28 = vpack.c.bf16 %v3486_v49, %v3486_v49  ;;  %v3693_v54 = vld [vmem:[#allocation2 + $0x32] sm:$0xff] }
 0x4d3   : > { %3577 = vrot.lane.b32.xlu2 %v6970_v17, %s5348_s10  ;;  %3581 = vrot.lane.b32.xlu1 %v6972_v27, %s5348_s10 }
 0x4d4   : > { %3573 = vrot.lane.b32.xlu0 %v6974_v60, %s5348_s10 }
 0x4d5   : > { %v3352_v62 = vpop.permute.xlu2 %3351  ;;  %v3178_v33 = vpop.permute.xlu1 %3177 }
 0x4d6   : > { %v3170_v38 = vpop.permute.xlu0 %3169  ;;  %3441 = vst.msk [vmem:[#allocation3 + $0x18] sm:$0xf] %vm1130_vm6, %v3352_v62 }
 0x4d7   : > { %3238 = vst.msk [vmem:[#allocation3 + $0x6c] sm:$0xf] %vm905_vm5, %v3170_v38  ;;  %v3487_v38 = vld [vmem:[#allocation2 + $0x109] sm:$0xff] }
 0x4d8   : > { %3242 = vst.msk [vmem:[#allocation3 + $0x7c] sm:$0xf] %vm905_vm5, %v3178_v33  ;;  %v3489_v33 = vld [vmem:[#allocation2 + $0x121] sm:$0xff]  ;;  %v7019_v9 = vpack.c.bf16 %v3487_v38, %v3487_v38  ;;  %v3696_v38 = vld [vmem:[#allocation2 + $0x52] sm:$0xff] }
 0x4d9   : > { %v7017_v24 = vpack.c.bf16 %v3489_v33, %v3489_v33 }
 0x4db   : > { %3583 = vrot.lane.b32.xlu2 %v3509_v6, %s5348_s10  ;;  %3587 = vrot.lane.b32.xlu1 %v3511_v52, %s5348_s10  ;;  %v3492_v52 = vld [vmem:[#allocation2 + $0x141] sm:$0xff] }
 0x4dc   : > { %3579 = vrot.lane.b32.xlu0 %v6985_v18, %s5348_s10 }
 0x4dd   : > { %v3358_v8 = vpop.permute.xlu2 %3357  ;;  %v3344_v36 = vpop.permute.xlu1 %3343 }
 0x4de   : > { %v3176_v32 = vpop.permute.xlu0 %3175  ;;  %3444 = vst.msk [vmem:[#allocation3 + $0x24] sm:$0xf] %vm1130_vm6, %v3358_v8  ;;  %v3490_v8 = vld [vmem:[#allocation2 + $0x129] sm:$0xff] }
 0x4df   : > { %3241 = vst.msk [vmem:[#allocation3 + $0x78] sm:$0xf] %vm905_vm5, %v3176_v32  ;;  %v7032_v32 = vpack.c.bf16 %v3490_v8, %v3490_v8 }
 0x4e0   : > { %3437 = vst.msk [vmem:[#allocation3 + $0x8] sm:$0xf] %vm1130_vm6, %v3344_v36  ;;  %v7030_v36 = vpack.c.bf16 %v3492_v52, %v3492_v52 }
 0x4e3   : > { %3589 = vrot.lane.b32.xlu2 %v3512_v58, %s5348_s10  ;;  %3593 = vrot.lane.b32.xlu1 %v3514_v22, %s5348_s10  ;;  %v3497_v58 = vld [vmem:[#allocation2 + $0x181] sm:$0xff]  ;;  %v3493_v22 = vld [vmem:[#allocation2 + $0x151] sm:$0xff] }
 0x4e4   : > { %3585 = vrot.lane.b32.xlu0 %v3510_v61, %s5348_s10  ;;  %v7043_v61 = vpack.c.bf16 %v3495_v48, %v3495_v48 }
 0x4e5   : > { %v3364_v7 = vpop.permute.xlu2 %3363  ;;  %v3350_v51 = vpop.permute.xlu1 %3349 }
 0x4e6   : > { %v3342_v13 = vpop.permute.xlu0 %3341  ;;  %3447 = vst.msk [vmem:[#allocation3 + $0x30] sm:$0xf] %vm1130_vm6, %v3364_v7  ;;  %v3529_v7 = vpack.c.bf16 %v3497_v58, %v3497_v58 }
 0x4e7   : > { %3436 = vst.msk [vmem:[#allocation3 + $0x4] sm:$0xf] %vm1130_vm6, %v3342_v13 }
 0x4e8   : > { %3440 = vst.msk [vmem:[#allocation3 + $0x14] sm:$0xf] %vm1130_vm6, %v3350_v51  ;;  %v7045_v51 = vpack.c.bf16 %v3493_v22, %v3493_v22 }
 0x4eb   : > { %3595 = vrot.lane.b32.xlu2 %v3515_v47, %s5348_s10  ;;  %3599 = vrot.lane.b32.xlu1 %v6728_v12, %s5348_s10  ;;  %v3496_v47 = vld [vmem:[#allocation2 + $0x171] sm:$0xff] }
 0x4ec   : > { %3591 = vrot.lane.b32.xlu0 %v3513_v43, %s5348_s10  ;;  %v3530_v43 = vpack.c.bf16 %v3498_v30, %v3498_v30 }
 0x4ed   : > { %v3370_v11 = vpop.permute.xlu2 %3369  ;;  %v3356_v56 = vpop.permute.xlu1 %3355 }
 0x4ee   : > { %v3348_v31 = vpop.permute.xlu0 %3347  ;;  %3450 = vst.msk [vmem:[#allocation3 + $0x3c] sm:$0xf] %vm1130_vm6, %v3370_v11  ;;  %v7055_v11 = vpack.c.bf16 %v3496_v47, %v3496_v47 }
 0x4ef   : > { %3439 = vst.msk [vmem:[#allocation3 + $0x10] sm:$0xf] %vm1130_vm6, %v3348_v31 }
 0x4f0   : > { %3443 = vst.msk [vmem:[#allocation3 + $0x20] sm:$0xf] %vm1130_vm6, %v3356_v56 }
 0x4f3   : > { %3601 = vrot.lane.b32.xlu2 %v7007_v28, %s5348_s10  ;;  %3605 = vrot.lane.b32.xlu1 %v6742_v39, %s5348_s10 }
 0x4f4   : > { %3597 = vrot.lane.b32.xlu0 %v3516_v59, %s5348_s10  ;;  %v3691_v59 = vld [vmem:[#allocation2 + $0x1a] sm:$0xff] }
 0x4f5   : > { %v3376_v12 = vpop.permute.xlu2 %3375  ;;  %v3362_v0 = vpop.permute.xlu1 %3361 }
 0x4f6   : > { %v3354_v62 = vpop.permute.xlu0 %3353  ;;  %3453 = vst.msk [vmem:[#allocation3 + $0x48] sm:$0xf] %vm1130_vm6, %v3376_v12  ;;  %v7065_v12 = vpack.c.bf16 %v3693_v54, %v3693_v54 }
 0x4f7   : > { %3442 = vst.msk [vmem:[#allocation3 + $0x1c] sm:$0xf] %vm1130_vm6, %v3354_v62 }
 0x4f8   : > { %3446 = vst.msk [vmem:[#allocation3 + $0x2c] sm:$0xf] %vm1130_vm6, %v3362_v0  ;;  %v3723_v0 = vpack.c.bf16 %v3691_v59, %v3691_v59 }
 0x4fb   : > { %3607 = vrot.lane.b32.xlu2 %v7017_v24, %s5348_s10  ;;  %3611 = vrot.lane.b32.xlu1 %v6757_v37, %s5348_s10 }
 0x4fc   : > { %3603 = vrot.lane.b32.xlu0 %v7019_v9, %s5348_s10 }
 0x4fd   : > { %v3382_v39 = vpop.permute.xlu2 %3381  ;;  %v3368_v41 = vpop.permute.xlu1 %3367 }
 0x4fe   : > { %v3360_v6 = vpop.permute.xlu0 %3359  ;;  %3456 = vst.msk [vmem:[#allocation3 + $0x54] sm:$0xf] %vm1130_vm6, %v3382_v39  ;;  %v3694_v39 = vld [vmem:[#allocation2 + $0x3a] sm:$0xff] }
 0x4ff   : > { %3445 = vst.msk [vmem:[#allocation3 + $0x28] sm:$0xf] %vm1130_vm6, %v3360_v6  ;;  %v7077_v6 = vpack.c.bf16 %v3694_v39, %v3694_v39 }
 0x500   : > { %3449 = vst.msk [vmem:[#allocation3 + $0x38] sm:$0xf] %vm1130_vm6, %v3368_v41  ;;  %v7075_v41 = vpack.c.bf16 %v3696_v38, %v3696_v38 }
 0x503   : > { %3613 = vrot.lane.b32.xlu2 %v7030_v36, %s5348_s10  ;;  %3617 = vrot.lane.b32.xlu1 %v6766_v16, %s5348_s10 }
 0x504   : > { %3609 = vrot.lane.b32.xlu0 %v7032_v32, %s5348_s10 }
 0x505   : > { %v3388_v37 = vpop.permute.xlu2 %3387  ;;  %v3374_v55 = vpop.permute.xlu1 %3373 }
 0x506   : > { %v3366_v23 = vpop.permute.xlu0 %3365  ;;  %3459 = vst.msk [vmem:[#allocation3 + $0x60] sm:$0xf] %vm1130_vm6, %v3388_v37  ;;  %v3699_v37 = vld [vmem:[#allocation2 + $0x7a] sm:$0xff] }
 0x507   : > { %3448 = vst.msk [vmem:[#allocation3 + $0x34] sm:$0xf] %vm1130_vm6, %v3366_v23  ;;  %v7088_v23 = vpack.c.bf16 %v3699_v37, %v3699_v37  ;;  %v3711_v37 = vld [vmem:[#allocation2 + $0x10a] sm:$0xff] }
 0x508   : > { %3452 = vst.msk [vmem:[#allocation3 + $0x44] sm:$0xf] %vm1130_vm6, %v3374_v55  ;;  %v3697_v55 = vld [vmem:[#allocation2 + $0x62] sm:$0xff] }
 0x509   : > { %v7090_v48 = vpack.c.bf16 %v3697_v55, %v3697_v55  ;;  %v3709_v55 = vld [vmem:[#allocation2 + $0xf2] sm:$0xff] }
 0x50b   : > { %3619 = vrot.lane.b32.xlu2 %v7043_v61, %s5348_s10  ;;  %3623 = vrot.lane.b32.xlu1 %v3529_v7, %s5348_s10  ;;  %v3702_v7 = vld [vmem:[#allocation2 + $0x9a] sm:$0xff] }
 0x50c   : > { %3615 = vrot.lane.b32.xlu0 %v7045_v51, %s5348_s10 }
 0x50d   : > { %v3394_v16 = vpop.permute.xlu2 %3393  ;;  %v3380_v13 = vpop.permute.xlu1 %3379 }
 0x50e   : > { %v3372_v14 = vpop.permute.xlu0 %3371  ;;  %3462 = vst.msk [vmem:[#allocation3 + $0x6c] sm:$0xf] %vm1130_vm6, %v3394_v16  ;;  %v3700_v16 = vld [vmem:[#allocation2 + $0x82] sm:$0xff] }
 0x50f   : > { %3451 = vst.msk [vmem:[#allocation3 + $0x40] sm:$0xf] %vm1130_vm6, %v3372_v14  ;;  %v7103_v14 = vpack.c.bf16 %v3700_v16, %v3700_v16  ;;  %v3714_v16 = vld [vmem:[#allocation2 + $0x12a] sm:$0xff] }
 0x510   : > { %3455 = vst.msk [vmem:[#allocation3 + $0x50] sm:$0xf] %vm1130_vm6, %v3380_v13  ;;  %v7101_v13 = vpack.c.bf16 %v3702_v7, %v3702_v7 }
 0x513   : > { %3625 = vrot.lane.b32.xlu2 %v3530_v43, %s5348_s10  ;;  %3789 = vrot.lane.b32.xlu1 %v6779_v63, %s5349_s11  ;;  %v3705_v43 = vld [vmem:[#allocation2 + $0xc2] sm:$0xff] }
 0x514   : > { %3621 = vrot.lane.b32.xlu0 %v7055_v11, %s5348_s10 }
 0x515   : > { %v3400_v56 = vpop.permute.xlu2 %3399  ;;  %v3386_v31 = vpop.permute.xlu1 %3385 }
 0x516   : > { %v3378_v49 = vpop.permute.xlu0 %3377  ;;  %3465 = vst.msk [vmem:[#allocation3 + $0x78] sm:$0xf] %vm1130_vm6, %v3400_v56  ;;  %v3707_v56 = vld [vmem:[#allocation2 + $0xda] sm:$0xff] }
 0x517   : > { %3454 = vst.msk [vmem:[#allocation3 + $0x4c] sm:$0xf] %vm1130_vm6, %v3378_v49  ;;  %v3737_v49 = vpack.c.bf16 %v3705_v43, %v3705_v43  ;;  %v3739_v54 = vpack.c.bf16 %v3707_v56, %v3707_v56 }
 0x518   : > { %3458 = vst.msk [vmem:[#allocation3 + $0x5c] sm:$0xf] %vm1130_vm6, %v3386_v31  ;;  %v3703_v31 = vld [vmem:[#allocation2 + $0xaa] sm:$0xff] }
 0x519   : > { %v7114_v59 = vpack.c.bf16 %v3703_v31, %v3703_v31  ;;  %v3715_v31 = vld [vmem:[#allocation2 + $0x13a] sm:$0xff] }
 0x51b   : > { %3791 = vrot.lane.b32.xlu2 %v7065_v12, %s5349_s11  ;;  %3795 = vrot.lane.b32.xlu1 %v6786_v34, %s5349_s11 }
 0x51c   : > { %3787 = vrot.lane.b32.xlu0 %v3723_v0, %s5349_s11 }
 0x51d   : > { %v3566_v63 = vpop.permute.xlu2 %3565  ;;  %v3392_v62 = vpop.permute.xlu1 %3391 }
 0x51e   : > { %v3384_v33 = vpop.permute.xlu0 %3383  ;;  %3660 = vst.msk [vmem:[#allocation3 + $0x4] sm:$0xf] %vm1355_vm7, %v3566_v63 }
 0x51f   : > { %3457 = vst.msk [vmem:[#allocation3 + $0x58] sm:$0xf] %vm1130_vm6, %v3384_v33  ;;  %v3706_v33 = vld [vmem:[#allocation2 + $0xca] sm:$0xff] }
 0x520   : > { %3461 = vst.msk [vmem:[#allocation3 + $0x68] sm:$0xf] %vm1130_vm6, %v3392_v62  ;;  %v3708_v62 = vld [vmem:[#allocation2 + $0xe2] sm:$0xff]  ;;  %v3738_v39 = vpack.c.bf16 %v3706_v33, %v3706_v33 }
 0x521   : > { %v3740_v38 = vpack.c.bf16 %v3708_v62, %v3708_v62 }
 0x523   : > { %3797 = vrot.lane.b32.xlu2 %v7075_v41, %s5349_s11  ;;  %3801 = vrot.lane.b32.xlu1 %v6793_v5, %s5349_s11 }
 0x524   : > { %3793 = vrot.lane.b32.xlu0 %v7077_v6, %s5349_s11 }
 0x525   : > { %v3572_v34 = vpop.permute.xlu2 %3571  ;;  %v3398_v52 = vpop.permute.xlu1 %3397 }
 0x526   : > { %v3390_v8 = vpop.permute.xlu0 %3389  ;;  %3663 = vst.msk [vmem:[#allocation3 + $0x10] sm:$0xf] %vm1355_vm7, %v3572_v34 }
 0x527   : > { %3460 = vst.msk [vmem:[#allocation3 + $0x64] sm:$0xf] %vm1130_vm6, %v3390_v8 }
 0x528   : > { %3464 = vst.msk [vmem:[#allocation3 + $0x74] sm:$0xf] %vm1130_vm6, %v3398_v52 }
 0x52b   : > { %3803 = vrot.lane.b32.xlu2 %v7088_v23, %s5349_s11  ;;  %3807 = vrot.lane.b32.xlu1 %v6800_v20, %s5349_s11 }
 0x52c   : > { %3799 = vrot.lane.b32.xlu0 %v7090_v48, %s5349_s11 }
 0x52d   : > { %v3578_v5 = vpop.permute.xlu2 %3577  ;;  %v3564_v58 = vpop.permute.xlu1 %3563 }
 0x52e   : > { %v3396_v22 = vpop.permute.xlu0 %3395  ;;  %3666 = vst.msk [vmem:[#allocation3 + $0x1c] sm:$0xf] %vm1355_vm7, %v3578_v5  ;;  %v7130_v5 = vpack.c.bf16 %v3711_v37, %v3711_v37 }
 0x52f   : > { %3463 = vst.msk [vmem:[#allocation3 + $0x70] sm:$0xf] %vm1130_vm6, %v3396_v22 }
 0x530   : > { %3659 = vst.msk [vmem:[#allocation3] sm:$0xf] %vm1355_vm7, %v3564_v58  ;;  %v3741_v58 = vpack.c.bf16 %v3709_v55, %v3709_v55 }
 0x533   : > { %3809 = vrot.lane.b32.xlu2 %v7101_v13, %s5349_s11  ;;  %3813 = vrot.lane.b32.xlu1 %v6807_v44, %s5349_s11 }
 0x534   : > { %3805 = vrot.lane.b32.xlu0 %v7103_v14, %s5349_s11 }
 0x535   : > { %v3584_v20 = vpop.permute.xlu2 %3583  ;;  %v3570_v30 = vpop.permute.xlu1 %3569 }
 0x536   : > { %v3402_v47 = vpop.permute.xlu0 %3401  ;;  %3669 = vst.msk [vmem:[#allocation3 + $0x28] sm:$0xf] %vm1355_vm7, %v3584_v20  ;;  %v3712_v20 = vld [vmem:[#allocation2 + $0x112] sm:$0xff] }
 0x537   : > { %3466 = vst.msk [vmem:[#allocation3 + $0x7c] sm:$0xf] %vm1130_vm6, %v3402_v47  ;;  %v7142_v47 = vpack.c.bf16 %v3712_v20, %v3712_v20  ;;  %v3934_v20 = vld [vmem:[#allocation2 + $0x110] sm:$0xff] }
 0x538   : > { %3662 = vst.msk [vmem:[#allocation3 + $0xc] sm:$0xf] %vm1355_vm7, %v3570_v30  ;;  %v7140_v30 = vpack.c.bf16 %v3714_v16, %v3714_v16 }
 0x53b   : > { %3815 = vrot.lane.b32.xlu2 %v3737_v49, %s5349_s11  ;;  %3819 = vrot.lane.b32.xlu1 %v3739_v54, %s5349_s11  ;;  %v7153_v49 = vpack.c.bf16 %v3715_v31, %v3715_v31 }
 0x53c   : > { %3811 = vrot.lane.b32.xlu0 %v7114_v59, %s5349_s11 }
 0x53d   : > { %v3590_v44 = vpop.permute.xlu2 %3589  ;;  %v3576_v0 = vpop.permute.xlu1 %3575 }
 0x53e   : > { %v3568_v63 = vpop.permute.xlu0 %3567  ;;  %3672 = vst.msk [vmem:[#allocation3 + $0x34] sm:$0xf] %vm1355_vm7, %v3590_v44 }
 0x53f   : > { %3661 = vst.msk [vmem:[#allocation3 + $0x8] sm:$0xf] %vm1355_vm7, %v3568_v63  ;;  %v4155_v63 = vld [vmem:[#allocation2 + $0xf1] sm:$0xff] }
 0x540   : > { %3665 = vst.msk [vmem:[#allocation3 + $0x18] sm:$0xf] %vm1355_vm7, %v3576_v0  ;;  %v3915_v0 = vld [vmem:[#allocation2 + $0x30] sm:$0xff]  ;;  %v4187_v33 = vpack.c.bf16 %v4155_v63, %v4155_v63 }
 0x541   : > { %v3947_v62 = vpack.c.bf16 %v3915_v0, %v3915_v0  ;;  %v3918_v63 = vld [vmem:[#allocation2 + $0x50] sm:$0xff] }
 0x543   : > { %3821 = vrot.lane.b32.xlu2 %v3740_v38, %s5349_s11  ;;  %3825 = vrot.lane.b32.xlu1 %v6819_v40, %s5349_s11 }
 0x544   : > { %3817 = vrot.lane.b32.xlu0 %v3738_v39, %s5349_s11  ;;  %v3916_v39 = vld [vmem:[#allocation2 + $0x38] sm:$0xff] }
 0x545   : > { %v3596_v34 = vpop.permute.xlu2 %3595  ;;  %v3582_v52 = vpop.permute.xlu1 %3581 }
 0x546   : > { %v3574_v8 = vpop.permute.xlu0 %3573  ;;  %3675 = vst.msk [vmem:[#allocation3 + $0x40] sm:$0xf] %vm1355_vm7, %v3596_v34  ;;  %v4380_v34 = vld [vmem:[#allocation2 + $0xfa] sm:$0xff] }
 0x547   : > { %3664 = vst.msk [vmem:[#allocation3 + $0x14] sm:$0xf] %vm1355_vm7, %v3574_v8  ;;  %v4412_v8 = vpack.c.bf16 %v4380_v34, %v4380_v34 }
 0x548   : > { %3668 = vst.msk [vmem:[#allocation3 + $0x24] sm:$0xf] %vm1355_vm7, %v3582_v52  ;;  %v3948_v52 = vpack.c.bf16 %v3916_v39, %v3916_v39 }
 0x54b   : > { %3827 = vrot.lane.b32.xlu2 %v7130_v5, %s5349_s11  ;;  %3831 = vrot.lane.b32.xlu1 %v6827_v45, %s5349_s11 }
 0x54c   : > { %3823 = vrot.lane.b32.xlu0 %v3741_v58, %s5349_s11 }
 0x54d   : > { %v3602_v40 = vpop.permute.xlu2 %3601  ;;  %v3588_v22 = vpop.permute.xlu1 %3587 }
 0x54e   : > { %v3580_v7 = vpop.permute.xlu0 %3579  ;;  %3678 = vst.msk [vmem:[#allocation3 + $0x4c] sm:$0xf] %vm1355_vm7, %v3602_v40  ;;  %v3933_v40 = vld [vmem:[#allocation2 + $0x108] sm:$0xff] }
 0x54f   : > { %3667 = vst.msk [vmem:[#allocation3 + $0x20] sm:$0xf] %vm1355_vm7, %v3580_v7 }
 0x550   : > { %3671 = vst.msk [vmem:[#allocation3 + $0x30] sm:$0xf] %vm1355_vm7, %v3588_v22  ;;  %v3965_v22 = vpack.c.bf16 %v3933_v40, %v3933_v40  ;;  %v3919_v40 = vld [vmem:[#allocation2 + $0x60] sm:$0xff] }
 0x553   : > { %3833 = vrot.lane.b32.xlu2 %v7140_v30, %s5349_s11  ;;  %4043 = vrot.lane.b32.xlu1 %v6600_v21, %s5350_s12 }
 0x554   : > { %3829 = vrot.lane.b32.xlu0 %v7142_v47, %s5349_s11 }
 0x555   : > { %v3608_v45 = vpop.permute.xlu2 %3607  ;;  %v3594_v43 = vpop.permute.xlu1 %3593 }
 0x556   : > { %v3586_v56 = vpop.permute.xlu0 %3585  ;;  %3681 = vst.msk [vmem:[#allocation3 + $0x58] sm:$0xf] %vm1355_vm7, %v3608_v45  ;;  %v4158_v45 = vld [vmem:[#allocation2 + $0x111] sm:$0xff] }
 0x557   : > { %3670 = vst.msk [vmem:[#allocation3 + $0x2c] sm:$0xf] %vm1355_vm7, %v3586_v56  ;;  %v4190_v56 = vpack.c.bf16 %v4158_v45, %v4158_v45 }
 0x558   : > { %3674 = vst.msk [vmem:[#allocation3 + $0x3c] sm:$0xf] %vm1355_vm7, %v3594_v43  ;;  %v3966_v43 = vpack.c.bf16 %v3934_v20, %v3934_v20 }
 0x55b   : > { %4045 = vrot.lane.b32.xlu2 %v6616_v46, %s5350_s12  ;;  %4269 = vrot.lane.b32.xlu1 %v7007_v28, %s5351_s13 }
 0x55c   : > { %3835 = vrot.lane.b32.xlu0 %v7153_v49, %s5349_s11 }
 0x55d   : > { %v3614_v21 = vpop.permute.xlu2 %3613  ;;  %v3600_v54 = vpop.permute.xlu1 %3599 }
 0x55e   : > { %v3592_v44 = vpop.permute.xlu0 %3591  ;;  %3684 = vst.msk [vmem:[#allocation3 + $0x64] sm:$0xf] %vm1355_vm7, %v3614_v21  ;;  %v3917_v21 = vld [vmem:[#allocation2 + $0x48] sm:$0xff] }
 0x55f   : > { %3673 = vst.msk [vmem:[#allocation3 + $0x38] sm:$0xf] %vm1355_vm7, %v3592_v44 }
 0x560   : > { %3677 = vst.msk [vmem:[#allocation3 + $0x48] sm:$0xf] %vm1355_vm7, %v3600_v54  ;;  %v3949_v54 = vpack.c.bf16 %v3917_v21, %v3917_v21  ;;  %v4368_v21 = vld [vmem:[#allocation2 + $0x6a] sm:$0xff] }
 0x563   : > { %4491 = vrot.lane.b32.xlu2 %v3741_v58, %s5352_s14  ;;  %4011 = vrot.lane.b32.xlu1 %v3947_v62, %s5350_s12  ;;  %v3950_v62 = vpack.c.bf16 %v3918_v63, %v3918_v63 }
 0x564   : > { %4267 = vrot.lane.b32.xlu0 %v4187_v33, %s5351_s13 }
 0x565   : > { %v3620_v46 = vpop.permute.xlu2 %3619  ;;  %v3606_v28 = vpop.permute.xlu1 %3605 }
 0x566   : > { %v3598_v38 = vpop.permute.xlu0 %3597  ;;  %3687 = vst.msk [vmem:[#allocation3 + $0x70] sm:$0xf] %vm1355_vm7, %v3620_v46  ;;  %v4365_v46 = vld [vmem:[#allocation2 + $0x4a] sm:$0xff] }
 0x567   : > { %3676 = vst.msk [vmem:[#allocation3 + $0x44] sm:$0xf] %vm1355_vm7, %v3598_v38  ;;  %v4397_v38 = vpack.c.bf16 %v4365_v46, %v4365_v46 }
 0x568   : > { %3680 = vst.msk [vmem:[#allocation3 + $0x54] sm:$0xf] %vm1355_vm7, %v3606_v28  ;;  %v3935_v28 = vld [vmem:[#allocation2 + $0x120] sm:$0xff] }
 0x569   : > { %v3967_v39 = vpack.c.bf16 %v3935_v28, %v3935_v28 }
 0x56b   : > { %4013 = vrot.lane.b32.xlu2 %v3948_v52, %s5350_s12  ;;  %4237 = vrot.lane.b32.xlu1 %v6946_v53, %s5351_s13  ;;  %v3936_v52 = vld [vmem:[#allocation2 + $0x128] sm:$0xff] }
 0x56c   : > { %4493 = vrot.lane.b32.xlu0 %v4412_v8, %s5352_s14  ;;  %v3968_v8 = vpack.c.bf16 %v3936_v52, %v3936_v52  ;;  %v4386_v52 = vld [vmem:[#allocation2 + $0x142] sm:$0xff] }
 0x56d   : > { %v3626_v37 = vpop.permute.xlu2 %3625  ;;  %v3612_v55 = vpop.permute.xlu1 %3611 }
 0x56e   : > { %v3604_v58 = vpop.permute.xlu0 %3603  ;;  %3690 = vst.msk [vmem:[#allocation3 + $0x7c] sm:$0xf] %vm1355_vm7, %v3626_v37 }
 0x56f   : > { %3679 = vst.msk [vmem:[#allocation3 + $0x50] sm:$0xf] %vm1355_vm7, %v3604_v58  ;;  %v4383_v58 = vld [vmem:[#allocation2 + $0x122] sm:$0xff] }
 0x570   : > { %3683 = vst.msk [vmem:[#allocation3 + $0x60] sm:$0xf] %vm1355_vm7, %v3612_v55 }
 0x573   : > { %4459 = vrot.lane.b32.xlu2 %v7065_v12, %s5352_s14  ;;  %4047 = vrot.lane.b32.xlu1 %v3965_v22, %s5350_s12  ;;  %v4415_v22 = vpack.c.bf16 %v4383_v58, %v4383_v58 }
 0x574   : > { %4235 = vrot.lane.b32.xlu0 %v6959_v4, %s5351_s13 }
 0x575   : > { %v3792_v53 = vpop.permute.xlu2 %3791  ;;  %v3618_v7 = vpop.permute.xlu1 %3617 }
 0x576   : > { %v3610_v16 = vpop.permute.xlu0 %3609  ;;  %3885 = vst.msk [vmem:[#allocation3 + $0x8] sm:$0xf] %vm1580_vm8, %v3792_v53  ;;  %v3951_v53 = vpack.c.bf16 %v3919_v40, %v3919_v40 }
 0x577   : > { %3682 = vst.msk [vmem:[#allocation3 + $0x5c] sm:$0xf] %vm1355_vm7, %v3610_v16  ;;  %v3920_v16 = vld [vmem:[#allocation2 + $0x68] sm:$0xff] }
 0x578   : > { %3686 = vst.msk [vmem:[#allocation3 + $0x6c] sm:$0xf] %vm1355_vm7, %v3618_v7  ;;  %v3952_v20 = vpack.c.bf16 %v3920_v16, %v3920_v16  ;;  %v3940_v16 = vld [vmem:[#allocation2 + $0x158] sm:$0xff] }
 0x57b   : > { %4049 = vrot.lane.b32.xlu2 %v3966_v43, %s5350_s12  ;;  %4273 = vrot.lane.b32.xlu1 %v4190_v56, %s5351_s13  ;;  %v3937_v56 = vld [vmem:[#allocation2 + $0x138] sm:$0xff] }
 0x57c   : > { %4461 = vrot.lane.b32.xlu0 %v7077_v6, %s5352_s14 }
 0x57d   : > { %v3798_v4 = vpop.permute.xlu2 %3797  ;;  %v3624_v12 = vpop.permute.xlu1 %3623 }
 0x57e   : > { %v3616_v31 = vpop.permute.xlu0 %3615  ;;  %3888 = vst.msk [vmem:[#allocation3 + $0x14] sm:$0xf] %vm1580_vm8, %v3798_v4  ;;  %v3969_v4 = vpack.c.bf16 %v3937_v56, %v3937_v56 }
 0x57f   : > { %3685 = vst.msk [vmem:[#allocation3 + $0x68] sm:$0xf] %vm1355_vm7, %v3616_v31  ;;  %v3938_v31 = vld [vmem:[#allocation2 + $0x140] sm:$0xff] }
 0x580   : > { %3689 = vst.msk [vmem:[#allocation3 + $0x78] sm:$0xf] %vm1355_vm7, %v3624_v12 }
 0x583   : > { %4495 = vrot.lane.b32.xlu2 %v7130_v5, %s5352_s14  ;;  %4015 = vrot.lane.b32.xlu1 %v3949_v54, %s5350_s12  ;;  %v3970_v54 = vpack.c.bf16 %v3938_v31, %v3938_v31 }
 0x584   : > { %4271 = vrot.lane.b32.xlu0 %v7019_v9, %s5351_s13 }
 0x585   : > { %v3804_v6 = vpop.permute.xlu2 %3803  ;;  %v3790_v44 = vpop.permute.xlu1 %3789 }
 0x586   : > { %v3622_v0 = vpop.permute.xlu0 %3621  ;;  %3891 = vst.msk [vmem:[#allocation3 + $0x20] sm:$0xf] %vm1580_vm8, %v3804_v6  ;;  %v4400_v6 = vpack.c.bf16 %v4368_v21, %v4368_v21 }
 0x587   : > { %3688 = vst.msk [vmem:[#allocation3 + $0x74] sm:$0xf] %vm1355_vm7, %v3622_v0 }
 0x588   : > { %3884 = vst.msk [vmem:[#allocation3 + $0x4] sm:$0xf] %vm1580_vm8, %v3790_v44 }
 0x58b   : > { %4017 = vrot.lane.b32.xlu2 %v3950_v62, %s5350_s12  ;;  %4241 = vrot.lane.b32.xlu1 %v6974_v60, %s5351_s13 }
 0x58c   : > { %4497 = vrot.lane.b32.xlu0 %v7142_v47, %s5352_s14 }
 0x58d   : > { %v3810_v9 = vpop.permute.xlu2 %3809  ;;  %v3796_v5 = vpop.permute.xlu1 %3795 }
 0x58e   : > { %v3788_v33 = vpop.permute.xlu0 %3787  ;;  %3894 = vst.msk [vmem:[#allocation3 + $0x2c] sm:$0xf] %vm1580_vm8, %v3810_v9  ;;  %v3921_v9 = vld [vmem:[#allocation2 + $0x78] sm:$0xff] }
 0x58f   : > { %3883 = vst.msk [vmem:[#allocation3] sm:$0xf] %vm1580_vm8, %v3788_v33  ;;  %v4161_v33 = vld [vmem:[#allocation2 + $0x139] sm:$0xff]  ;;  %v3953_v46 = vpack.c.bf16 %v3921_v9, %v3921_v9 }
 0x590   : > { %3887 = vst.msk [vmem:[#allocation3 + $0x10] sm:$0xf] %vm1580_vm8, %v3796_v5  ;;  %v4193_v28 = vpack.c.bf16 %v4161_v33, %v4161_v33 }
 0x593   : > { %4463 = vrot.lane.b32.xlu2 %v4397_v38, %s5352_s14  ;;  %4051 = vrot.lane.b32.xlu1 %v3967_v39, %s5350_s12  ;;  %v5305_v38 = vld [vmem:[%s7644_s4] sm:$0xff] }
 0x594   : > { %4239 = vrot.lane.b32.xlu0 %v6955_v25, %s5351_s13 }
 0x595   : > { %v3816_v60 = vpop.permute.xlu2 %3815  ;;  %v3802_v47 = vpop.permute.xlu1 %3801 }
 0x596   : > { %v3794_v34 = vpop.permute.xlu0 %3793  ;;  %3897 = vst.msk [vmem:[#allocation3 + $0x38] sm:$0xf] %vm1580_vm8, %v3816_v60 }
 0x597   : > { %3886 = vst.msk [vmem:[#allocation3 + $0xc] sm:$0xf] %vm1580_vm8, %v3794_v34  ;;  %v3922_v34 = vld [vmem:[#allocation2 + $0x80] sm:$0xff] }
 0x598   : > { %3890 = vst.msk [vmem:[#allocation3 + $0x1c] sm:$0xf] %vm1580_vm8, %v3802_v47 }
 0x59b   : > { %4053 = vrot.lane.b32.xlu2 %v3968_v8, %s5350_s12  ;;  %4277 = vrot.lane.b32.xlu1 %v7032_v32, %s5351_s13  ;;  %v4418_v8 = vpack.c.bf16 %v4386_v52, %v4386_v52 }
 0x59c   : > { %4465 = vrot.lane.b32.xlu0 %v7075_v41, %s5352_s14 }
 0x59d   : > { %v3822_v25 = vpop.permute.xlu2 %3821  ;;  %v3808_v37 = vpop.permute.xlu1 %3807 }
 0x59e   : > { %v3800_v55 = vpop.permute.xlu0 %3799  ;;  %3900 = vst.msk [vmem:[#allocation3 + $0x44] sm:$0xf] %vm1580_vm8, %v3822_v25 }
 0x59f   : > { %3889 = vst.msk [vmem:[#allocation3 + $0x18] sm:$0xf] %vm1580_vm8, %v3800_v55 }
 0x5a0   : > { %3893 = vst.msk [vmem:[#allocation3 + $0x28] sm:$0xf] %vm1580_vm8, %v3808_v37 }
 0x5a3   : > { %4499 = vrot.lane.b32.xlu2 %v4415_v22, %s5352_s14  ;;  %4019 = vrot.lane.b32.xlu1 %v3951_v53, %s5350_s12  ;;  %v3939_v22 = vld [vmem:[#allocation2 + $0x150] sm:$0xff] }
 0x5a4   : > { %4275 = vrot.lane.b32.xlu0 %v7017_v24, %s5351_s13  ;;  %v3971_v53 = vpack.c.bf16 %v3939_v22, %v3939_v22 }
 0x5a5   : > { %v3828_v32 = vpop.permute.xlu2 %3827  ;;  %v3814_v41 = vpop.permute.xlu1 %3813 }
 0x5a6   : > { %v3806_v7 = vpop.permute.xlu0 %3805  ;;  %3903 = vst.msk [vmem:[#allocation3 + $0x50] sm:$0xf] %vm1580_vm8, %v3828_v32 }
 0x5a7   : > { %3892 = vst.msk [vmem:[#allocation3 + $0x24] sm:$0xf] %vm1580_vm8, %v3806_v7  ;;  %v4388_v7 = vld [vmem:[#allocation2 + $0x15a] sm:$0xff] }
 0x5a8   : > { %3896 = vst.msk [vmem:[#allocation3 + $0x34] sm:$0xf] %vm1580_vm8, %v3814_v41  ;;  %v4164_v41 = vld [vmem:[#allocation2 + $0x159] sm:$0xff] }
 0x5ab   : > { %4021 = vrot.lane.b32.xlu2 %v3952_v20, %s5350_s12  ;;  %4245 = vrot.lane.b32.xlu1 %v6970_v17, %s5351_s13  ;;  %v4196_v20 = vpack.c.bf16 %v4164_v41, %v4164_v41 }
 0x5ac   : > { %4501 = vrot.lane.b32.xlu0 %v7140_v30, %s5352_s14 }
 0x5ad   : > { %v3834_v24 = vpop.permute.xlu2 %3833  ;;  %v3820_v45 = vpop.permute.xlu1 %3819 }
 0x5ae   : > { %v3812_v43 = vpop.permute.xlu0 %3811  ;;  %3906 = vst.msk [vmem:[#allocation3 + $0x5c] sm:$0xf] %vm1580_vm8, %v3834_v24  ;;  %v4420_v24 = vpack.c.bf16 %v4388_v7, %v4388_v7 }
 0x5af   : > { %3895 = vst.msk [vmem:[#allocation3 + $0x30] sm:$0xf] %vm1580_vm8, %v3812_v43 }
 0x5b0   : > { %3899 = vst.msk [vmem:[#allocation3 + $0x40] sm:$0xf] %vm1580_vm8, %v3820_v45  ;;  %v3972_v45 = vpack.c.bf16 %v3940_v16, %v3940_v16 }
 0x5b3   : > { %4467 = vrot.lane.b32.xlu2 %v7090_v48, %s5352_s14  ;;  %4055 = vrot.lane.b32.xlu1 %v3969_v4, %s5350_s12  ;;  %v4625_v48 = vld [vmem:[%s7644_s4 + $0x10] sm:$0x3] }
 0x5b4   : > { %4243 = vrot.lane.b32.xlu0 %v6957_v50, %s5351_s13  ;;  %v4715_v44 = vunpack.c.l.b16 %v4625_v48  ;;  %v3923_v4 = vld [vmem:[#allocation2 + $0x90] sm:$0xff] }
 0x5b5   : > { %v4046_v17 = vpop.permute.xlu2 %4045  ;;  %v3826_v30 = vpop.permute.xlu1 %3825 }
 0x5b6   : > { %v3818_v12 = vpop.permute.xlu0 %3817  ;;  %4124 = vst.msk [vmem:[#allocation3 + $0x44] sm:$0xf] %vm1806_vm9, %v4046_v17  ;;  %v4718_v50 = vpack.c.b16 %v4715_v44, %v4715_v44  ;;  %v4147_v17 = vld [vmem:[#allocation2 + $0x91] sm:$0xff]  ;;  %v4148_v44 = vld [vmem:[#allocation2 + $0x99] sm:$0xff] }
 0x5b7   : > { %3898 = vst.msk [vmem:[#allocation3 + $0x3c] sm:$0xf] %vm1580_vm8, %v3818_v12  ;;  %v3955_v12 = vpack.c.bf16 %v3923_v4, %v3923_v4  ;;  %v4179_v31 = vpack.c.bf16 %v4147_v17, %v4147_v17  ;;  %v3944_v4 = vld [vmem:[#allocation2 + $0x188] sm:$0xff]  ;;  %v4374_v17 = vld [vmem:[#allocation2 + $0xb2] sm:$0xff] }
 0x5b8   : > { %3902 = vst.msk [vmem:[#allocation3 + $0x4c] sm:$0xf] %vm1580_vm8, %v3826_v30  ;;  %v4770_v5 = vsel %vm2472_vm11, %v4718_v50, 0  ;;  %v4387_v30 = vld [vmem:[#allocation2 + $0x152] sm:$0xff] }
 0x5b9   : > { %5310 = vmatpush.bf16.msra.mxu3 %v4770_v5  ;;  %4777 = vmatpush.bf16.msra.mxu1 %v4770_v5  ;;  %v4419_v21 = vpack.c.bf16 %v4387_v30, %v4387_v30  ;;  %v3924_v50 = vld [vmem:[#allocation2 + $0x98] sm:$0xff]  ;;  %v3976_v30 = vpack.c.bf16 %v3944_v4, %v3944_v4 }
 0x5bb   : > { %4057 = vrot.lane.b32.xlu2 %v3970_v54, %s5350_s12  ;;  %4281 = vrot.lane.b32.xlu1 %v7030_v36, %s5351_s13  ;;  %v5306_v36 = vld [vmem:[%s7644_s4 + $0x8] sm:$0xff] }
 0x5bc   : > { %4469 = vrot.lane.b32.xlu0 %v4400_v6, %s5352_s14 }
 0x5bd   : > { %v4492_v0 = vpop.permute.xlu2 %4491  ;;  %v3832_v63 = vpop.permute.xlu1 %3831  ;;  %5311 = vmatpush.bf16.msra.mxu3 %v5306_v36  ;;  %4778 = vmatpush.bf16.msra.mxu1 %v5306_v36  ;;  %v3941_v36 = vld [vmem:[#allocation2 + $0x168] sm:$0xff] }
 0x5be   : > { %v3824_v62 = vpop.permute.xlu0 %3823  ;;  %3905 = vst.msk [vmem:[#allocation3 + $0x58] sm:$0xf] %vm1580_vm8, %v3832_v63  ;;  %v3956_v63 = vpack.c.bf16 %v3924_v50, %v3924_v50 }
 0x5bf   : > { %3901 = vst.msk [vmem:[#allocation3 + $0x48] sm:$0xf] %vm1580_vm8, %v3824_v62 }
 0x5c1   : > { %5312 = vmatpush.bf16.msra.mxu3 %v5305_v38  ;;  %4779 = vmatpush.bf16.msra.mxu1 %v5305_v38 }
 0x5c3   : > { %4503 = vrot.lane.b32.xlu2 %v7153_v49, %s5352_s14  ;;  %4023 = vrot.lane.b32.xlu1 %v3953_v46, %s5350_s12  ;;  %v3954_v49 = vpack.c.bf16 %v3922_v34, %v3922_v34  ;;  %v4371_v46 = vld [vmem:[#allocation2 + $0x92] sm:$0xff] }
 0x5c4   : > { %4279 = vrot.lane.b32.xlu0 %v4193_v28, %s5351_s13  ;;  %v3973_v28 = vpack.c.bf16 %v3941_v36, %v3941_v36  ;;  %v3928_v36 = vld [vmem:[#allocation2 + $0xc8] sm:$0xff] }
 0x5c5   : > { %v4014_v39 = vpop.permute.xlu2 %4013  ;;  %v4044_v60 = vpop.permute.xlu1 %4043 }
 0x5c6   : > { %v3830_v47 = vpop.permute.xlu0 %3829  ;;  %4108 = vst.msk [vmem:[#allocation3 + $0x4] sm:$0xf] %vm1806_vm9, %v4014_v39 }
 0x5c7   : > { %3904 = vst.msk [vmem:[#allocation3 + $0x54] sm:$0xf] %vm1580_vm8, %v3830_v47  ;;  %v3942_v47 = vld [vmem:[#allocation2 + $0x170] sm:$0xff] }
 0x5c8   : > { %4123 = vst.msk [vmem:[#allocation3 + $0x40] sm:$0xf] %vm1806_vm9, %v4044_v60  ;;  %v3974_v34 = vpack.c.bf16 %v3942_v47, %v3942_v47 }
 0x5cb   : > { %4025 = vrot.lane.b32.xlu2 %v3954_v49, %s5350_s12  ;;  %4249 = vrot.lane.b32.xlu1 %v6972_v27, %s5351_s13 }
 0x5cc   : > { %4505 = vrot.lane.b32.xlu0 %v4418_v8, %s5352_s14 }
 0x5cd   : > { %v4460_v25 = vpop.permute.xlu2 %4459  ;;  %v4270_v37 = vpop.permute.xlu1 %4269 }
 0x5ce   : > { %v3836_v55 = vpop.permute.xlu0 %3835  ;;  %4348 = vst.msk [vmem:[#allocation3 + $0x44] sm:$0xf] %vm2031_vm10, %v4270_v37  ;;  %v4389_v37 = vld [vmem:[#allocation2 + $0x16a] sm:$0xff] }
 0x5cf   : > { %3907 = vst.msk [vmem:[#allocation3 + $0x60] sm:$0xf] %vm1580_vm8, %v3836_v55  ;;  %v3925_v55 = vld [vmem:[#allocation2 + $0xa8] sm:$0xff] }
 0x5d3   : > { %4471 = vrot.lane.b32.xlu2 %v7088_v23, %s5352_s14  ;;  %3837 = vrot.lane.b32.xlu1 %v4418_v8, %s5349_s11 }
 0x5d4   : > { %4247 = vrot.lane.b32.xlu0 %v6985_v18, %s5351_s13 }
 0x5d5   : > { %v4050_v58 = vpop.permute.xlu2 %4049  ;;  %v4012_v40 = vpop.permute.xlu1 %4011 }
 0x5d6   : > { %v4268_v27 = vpop.permute.xlu0 %4267  ;;  %4126 = vst.msk [vmem:[#allocation3 + $0x4c] sm:$0xf] %vm1806_vm9, %v4050_v58  ;;  %v4421_v58 = vpack.c.bf16 %v4389_v37, %v4389_v37 }
 0x5d7   : > { %4347 = vst.msk [vmem:[#allocation3 + $0x40] sm:$0xf] %vm2031_vm10, %v4268_v27 }
 0x5d8   : > { %4571 = vst.msk [vmem:[#allocation3 + $0x40] sm:$0xf] %vm2256_vm12, %v4492_v0  ;;  %v4180_v0 = vpack.c.bf16 %v4148_v44, %v4148_v44  ;;  %v3943_v44 = vld [vmem:[#allocation2 + $0x180] sm:$0xff] }
 0x5d9   : > { %4107 = vst.msk [vmem:[#allocation3] sm:$0xf] %vm1806_vm9, %v4012_v40 }
 0x5db   : > { %4059 = vrot.lane.b32.xlu2 %v3971_v53, %s5350_s12  ;;  %4283 = vrot.lane.b32.xlu1 %v7045_v51, %s5351_s13  ;;  %v3926_v53 = vld [vmem:[#allocation2 + $0xb0] sm:$0xff] }
 0x5dc   : > { %4473 = vrot.lane.b32.xlu0 %v7103_v14, %s5352_s14 }
 0x5dd   : > { %v4496_v18 = vpop.permute.xlu2 %4495  ;;  %v4238_v23 = vpop.permute.xlu1 %4237 }
 0x5de   : > { %v4494_v32 = vpop.permute.xlu0 %4493  ;;  %4332 = vst.msk [vmem:[#allocation3 + $0x4] sm:$0xf] %vm2031_vm10, %v4238_v23  ;;  %v4390_v23 = vld [vmem:[#allocation2 + $0x172] sm:$0xff] }
 0x5df   : > { %4572 = vst.msk [vmem:[#allocation3 + $0x44] sm:$0xf] %vm2256_vm12, %v4494_v32  ;;  %v3958_v32 = vpack.c.bf16 %v3926_v53, %v3926_v53  ;;  %v4422_v7 = vpack.c.bf16 %v4390_v23, %v4390_v23  ;;  %v3945_v23 = vld [vmem:[#allocation2 + $0x198] sm:$0xff] }
 0x5e3   : > { %4285 = vrot.lane.b32.xlu2 %v4196_v20, %s5351_s13  ;;  %4509 = vrot.lane.b32.xlu1 %v4420_v24, %s5352_s14 }
 0x5e4   : > { %4061 = vrot.lane.b32.xlu0 %v3972_v45, %s5350_s12  ;;  %v4149_v45 = vld [vmem:[#allocation2 + $0xa9] sm:$0xff] }
 0x5e5   : > { %v4018_v51 = vpop.permute.xlu2 %4017  ;;  %v4048_v14 = vpop.permute.xlu1 %4047 }
 0x5e6   : > { %v4236_v43 = vpop.permute.xlu0 %4235  ;;  %v5297_v56 = vld [vmem:[#allocation3 + $0x40] sm:$0xff]  ;;  %4110 = vst.msk [vmem:[#allocation3 + $0xc] sm:$0xf] %vm1806_vm9, %v4018_v51  ;;  %v4181_v51 = vpack.c.bf16 %v4149_v45, %v4149_v45  ;;  %v4170_v45 = vld [vmem:[#allocation2 + $0x1a1] sm:$0xff] }
 0x5e7   : > { %4331 = vst.msk [vmem:[#allocation3] sm:$0xf] %vm2031_vm10, %v4236_v43  ;;  %5259 = vmatmul.msk.bf16.vlgmr.msra.gmra.mxu3 %vm2423_vm13, %v5297_v56 }
 0x5e8   : > { %4555 = vst.msk [vmem:[#allocation3] sm:$0xf] %vm2256_vm12, %v4460_v25 }
 0x5e9   : > { %4125 = vst.msk [vmem:[#allocation3 + $0x48] sm:$0xf] %vm1806_vm9, %v4048_v14 }
 0x5eb   : > { %4027 = vrot.lane.b32.xlu2 %v3955_v12, %s5350_s12  ;;  %4251 = vrot.lane.b32.xlu1 %v4179_v31, %s5351_s13  ;;  %v4406_v12 = vpack.c.bf16 %v4374_v17, %v4374_v17  ;;  %v4202_v17 = vpack.c.bf16 %v4170_v45, %v4170_v45 }
 0x5ec   : > { %4507 = vrot.lane.b32.xlu0 %v4419_v21, %s5352_s14 }
 0x5ed   : > { %v4464_v54 = vpop.permute.xlu2 %4463  ;;  %v4274_v48 = vpop.permute.xlu1 %4273 }
 0x5ee   : > { %v4462_v6 = vpop.permute.xlu0 %4461  ;;  %4350 = vst.msk [vmem:[#allocation3 + $0x4c] sm:$0xf] %vm2031_vm10, %v4274_v48  ;;  %v4167_v48 = vld [vmem:[#allocation2 + $0x181] sm:$0xff] }
 0x5ef   : > { %4556 = vst.msk [vmem:[#allocation3 + $0x4] sm:$0xf] %vm2256_vm12, %v4462_v6  ;;  %v4391_v6 = vld [vmem:[#allocation2 + $0x182] sm:$0xff]  ;;  %v4199_v50 = vpack.c.bf16 %v4167_v48, %v4167_v48 }
 0x5f3   : > { %4253 = vrot.lane.b32.xlu2 %v4180_v0, %s5351_s13  ;;  %4477 = vrot.lane.b32.xlu1 %v7101_v13, %s5352_s14  ;;  %v4403_v13 = vpack.c.bf16 %v4371_v46, %v4371_v46  ;;  %v7355_v0 = vpack.c.bf16 %v4391_v6, %v4391_v6  ;;  %v4168_v46 = vld [vmem:[#allocation2 + $0x189] sm:$0xff]  ;;  %v3929_v6 = vld [vmem:[#allocation2 + $0xd8] sm:$0xff] }
 0x5f4   : > { %4029 = vrot.lane.b32.xlu0 %v3956_v63, %s5350_s12  ;;  %v3975_v63 = vpack.c.bf16 %v3943_v44, %v3943_v44  ;;  %v4153_v44 = vld [vmem:[#allocation2 + $0xd9] sm:$0xff] }
 0x5f5   : > { %v4054_v62 = vpop.permute.xlu2 %4053  ;;  %v4016_v9 = vpop.permute.xlu1 %4015 }
 0x5f6   : > { %v4272_v5 = vpop.permute.xlu0 %4271  ;;  %v5289_v33 = vld [vmem:[#allocation3] sm:$0xff]  ;;  %4128 = vst.msk [vmem:[#allocation3 + $0x54] sm:$0xf] %vm1806_vm9, %v4054_v62 }
 0x5f7   : > { %4349 = vst.msk [vmem:[#allocation3 + $0x48] sm:$0xf] %vm2031_vm10, %v4272_v5  ;;  %5251 = vmatmul.msk.bf16.vlgmr.msra.gmra.mxu1 %vm2423_vm13, %v5289_v33  ;;  %v4392_v33 = vld [vmem:[#allocation2 + $0x18a] sm:$0xff] }
 0x5f8   : > { %4573 = vst.msk [vmem:[#allocation3 + $0x48] sm:$0xf] %vm2256_vm12, %v4496_v18  ;;  %v4150_v18 = vld [vmem:[#allocation2 + $0xb1] sm:$0xff] }
 0x5f9   : > { %4109 = vst.msk [vmem:[#allocation3 + $0x8] sm:$0xf] %vm1806_vm9, %v4016_v9  ;;  %v4182_v41 = vpack.c.bf16 %v4150_v18, %v4150_v18 }
 0x5fb   : > { %3839 = vrot.lane.b32.xlu2 %v4419_v21, %s5349_s11  ;;  %4063 = vrot.lane.b32.xlu1 %v3973_v28, %s5350_s12  ;;  %v4424_v28 = vpack.c.bf16 %v4392_v33, %v4392_v33  ;;  %v4154_v33 = vld [vmem:[#allocation2 + $0xe1] sm:$0xff] }
 0x5fc   : > { %4475 = vrot.lane.b32.xlu0 %v4403_v13, %s5352_s14  ;;  %v3960_v13 = vpack.c.bf16 %v3928_v36, %v3928_v36  ;;  %v4378_v36 = vld [vmem:[#allocation2 + $0xe2] sm:$0xff] }
 0x5fd   : > { %v4500_v38 = vpop.permute.xlu2 %4499  ;;  %v4242_v39 = vpop.permute.xlu1 %4241 }
 0x5fe   : > { %v4498_v60 = vpop.permute.xlu0 %4497  ;;  %4334 = vst.msk [vmem:[#allocation3 + $0xc] sm:$0xf] %vm2031_vm10, %v4242_v39 }
 0x5ff   : > { %4574 = vst.msk [vmem:[#allocation3 + $0x4c] sm:$0xf] %vm2256_vm12, %v4498_v60 }
 0x603   : > { %4065 = vrot.lane.b32.xlu2 %v3974_v34, %s5350_s12  ;;  %4289 = vrot.lane.b32.xlu1 %v7055_v11, %s5351_s13  ;;  %v3957_v11 = vpack.c.bf16 %v3925_v55, %v3925_v55 }
 0x604   : > { %3841 = vrot.lane.b32.xlu0 %v4420_v24, %s5349_s11 }
 0x605   : > { %v4022_v52 = vpop.permute.xlu2 %4021  ;;  %v4052_v49 = vpop.permute.xlu1 %4051 }
 0x606   : > { %v4240_v8 = vpop.permute.xlu0 %4239  ;;  %v5298_v25 = vld [vmem:[#allocation3 + $0x48] sm:$0xff]  ;;  %4112 = vst.msk [vmem:[#allocation3 + $0x14] sm:$0xf] %vm1806_vm9, %v4022_v52  ;;  %v4151_v52 = vld [vmem:[#allocation2 + $0xc1] sm:$0xff] }
 0x607   : > { %4333 = vst.msk [vmem:[#allocation3 + $0x8] sm:$0xf] %vm2031_vm10, %v4240_v8  ;;  %5260 = vmatmul.msk.bf16.gmra.mxu3 %vm2423_vm13, %v5298_v25  ;;  %v3927_v8 = vld [vmem:[#allocation2 + $0xc0] sm:$0xff]  ;;  %v4183_v25 = vpack.c.bf16 %v4151_v52, %v4151_v52 }
 0x608   : > { %4557 = vst.msk [vmem:[#allocation3 + $0x8] sm:$0xf] %vm2256_vm12, %v4464_v54  ;;  %v3959_v55 = vpack.c.bf16 %v3927_v8, %v3927_v8  ;;  %v4377_v52 = vld [vmem:[#allocation2 + $0xda] sm:$0xff] }
 0x609   : > { %4127 = vst.msk [vmem:[#allocation3 + $0x50] sm:$0xf] %vm1806_vm9, %v4052_v49  ;;  %v4375_v49 = vld [vmem:[#allocation2 + $0xc2] sm:$0xff]  ;;  %v4409_v8 = vpack.c.bf16 %v4377_v52, %v4377_v52 }
 0x60a   : > { %v4407_v37 = vpack.c.bf16 %v4375_v49, %v4375_v49  ;;  %v7412_v49 = vld [vmem:[%s7645_s5] ss:$0 sm:$0xff] }
 0x60b   : > { %4511 = vrot.lane.b32.xlu2 %v4421_v58, %s5352_s14  ;;  %4031 = vrot.lane.b32.xlu1 %v3957_v11, %s5350_s12 }
 0x60c   : > { %4287 = vrot.lane.b32.xlu0 %v7043_v61, %s5351_s13 }
 0x60d   : > { %v4468_v40 = vpop.permute.xlu2 %4467  ;;  %v4278_v27 = vpop.permute.xlu1 %4277 }
 0x60e   : > { %v4466_v22 = vpop.permute.xlu0 %4465  ;;  %4352 = vst.msk [vmem:[#allocation3 + $0x54] sm:$0xf] %vm2031_vm10, %v4278_v27  ;;  %v4376_v27 = vld [vmem:[#allocation2 + $0xca] sm:$0xff] }
 0x60f   : > { %4558 = vst.msk [vmem:[#allocation3 + $0xc] sm:$0xf] %vm2256_vm12, %v4466_v22  ;;  %v4152_v22 = vld [vmem:[#allocation2 + $0xc9] sm:$0xff]  ;;  %v4408_v53 = vpack.c.bf16 %v4376_v27, %v4376_v27 }
 0x610   : > { %v4184_v18 = vpack.c.bf16 %v4152_v22, %v4152_v22 }
 0x613   : > { %4033 = vrot.lane.b32.xlu2 %v3958_v32, %s5350_s12  ;;  %4257 = vrot.lane.b32.xlu1 %v4182_v41, %s5351_s13  ;;  %v4169_v32 = vld [vmem:[#allocation2 + $0x199] sm:$0xff] }
 0x614   : > { %4513 = vrot.lane.b32.xlu0 %v4422_v7, %s5352_s14 }
 0x615   : > { %v4058_v61 = vpop.permute.xlu2 %4057  ;;  %v4020_v16 = vpop.permute.xlu1 %4019 }
 0x616   : > { %v4276_v20 = vpop.permute.xlu0 %4275  ;;  %v5290_v24 = vld [vmem:[#allocation3 + $0x8] sm:$0xff]  ;;  %4130 = vst.msk [vmem:[#allocation3 + $0x5c] sm:$0xf] %vm1806_vm9, %v4058_v61 }
 0x617   : > { %4351 = vst.msk [vmem:[#allocation3 + $0x50] sm:$0xf] %vm2031_vm10, %v4276_v20  ;;  %5252 = vmatmul.msk.bf16.gmra.mxu1 %vm2423_vm13, %v5290_v24  ;;  %v3977_v20 = vpack.c.bf16 %v3945_v23, %v3945_v23  ;;  %v4201_v24 = vpack.c.bf16 %v4169_v32, %v4169_v32 }
 0x618   : > { %4575 = vst.msk [vmem:[#allocation3 + $0x50] sm:$0xf] %vm2256_vm12, %v4500_v38  ;;  %v4200_v38 = vpack.c.bf16 %v4168_v46, %v4168_v46  ;;  %v3930_v46 = vld [vmem:[#allocation2 + $0xe0] sm:$0xff] }
 0x619   : > { %4111 = vst.msk [vmem:[#allocation3 + $0x10] sm:$0xf] %vm1806_vm9, %v4020_v16 }
 0x61b   : > { %4479 = vrot.lane.b32.xlu2 %v7114_v59, %s5352_s14  ;;  %3843 = vrot.lane.b32.xlu1 %v4421_v58, %s5349_s11 }
 0x61c   : > { %4255 = vrot.lane.b32.xlu0 %v4181_v51, %s5351_s13  ;;  %v4394_v51 = vld [vmem:[#allocation2 + $0x1a2] sm:$0xff] }
 0x61d   : > { %v4504_v14 = vpop.permute.xlu2 %4503  ;;  %v4246_v43 = vpop.permute.xlu1 %4245 }
 0x61e   : > { %v4502_v56 = vpop.permute.xlu0 %4501  ;;  %4336 = vst.msk [vmem:[#allocation3 + $0x14] sm:$0xf] %vm2031_vm10, %v4246_v43 }
 0x61f   : > { %4576 = vst.msk [vmem:[#allocation3 + $0x54] sm:$0xf] %vm2256_vm12, %v4502_v56  ;;  %v3946_v56 = vld [vmem:[#allocation2 + $0x1a0] sm:$0xff] }
 0x623   : > { %3845 = vrot.lane.b32.xlu2 %v4422_v7, %s5349_s11  ;;  %4069 = vrot.lane.b32.xlu1 %v3976_v30, %s5350_s12  ;;  %v4426_v30 = vpack.c.bf16 %v4394_v51, %v4394_v51 }
 0x624   : > { %4481 = vrot.lane.b32.xlu0 %v4406_v12, %s5352_s14  ;;  %v3978_v12 = vpack.c.bf16 %v3946_v56, %v3946_v56 }
 0x625   : > { %v4026_v59 = vpop.permute.xlu2 %4025  ;;  %v4056_v31 = vpop.permute.xlu1 %4055 }
 0x626   : > { %v4244_v21 = vpop.permute.xlu0 %4243  ;;  %v5299_v54 = vld [vmem:[#allocation3 + $0x50] sm:$0xff]  ;;  %4114 = vst.msk [vmem:[#allocation3 + $0x1c] sm:$0xf] %vm1806_vm9, %v4026_v59 }
 0x627   : > { %4335 = vst.msk [vmem:[#allocation3 + $0x10] sm:$0xf] %vm2031_vm10, %v4244_v21  ;;  %5261 = vmatmul.msk.bf16.gmra.mxu3 %vm2423_vm13, %v5299_v54  ;;  %v4393_v21 = vld [vmem:[#allocation2 + $0x19a] sm:$0xff] }
 0x628   : > { %4559 = vst.msk [vmem:[#allocation3 + $0x10] sm:$0xf] %vm2256_vm12, %v4468_v40 }
 0x629   : > { %4129 = vst.msk [vmem:[#allocation3 + $0x58] sm:$0xf] %vm1806_vm9, %v4056_v31 }
 0x62b   : > { %4291 = vrot.lane.b32.xlu2 %v4199_v50, %s5351_s13  ;;  %4515 = vrot.lane.b32.xlu1 %v7355_v0, %s5352_s14  ;;  %v4425_v50 = vpack.c.bf16 %v4393_v21, %v4393_v21 }
 0x62c   : > { %4067 = vrot.lane.b32.xlu0 %v3975_v63, %s5350_s12  ;;  %v4185_v63 = vpack.c.bf16 %v4153_v44, %v4153_v44 }
 0x62d   : > { %v4472_v62 = vpop.permute.xlu2 %4471  ;;  %v4282_v9 = vpop.permute.xlu1 %4281 }
 0x62e   : > { %v4470_v5 = vpop.permute.xlu0 %4469  ;;  %4354 = vst.msk [vmem:[#allocation3 + $0x5c] sm:$0xf] %vm2031_vm10, %v4282_v9 }
 0x62f   : > { %4560 = vst.msk [vmem:[#allocation3 + $0x14] sm:$0xf] %vm2256_vm12, %v4470_v5 }
 0x633   : > { %4517 = vrot.lane.b32.xlu2 %v4424_v28, %s5352_s14  ;;  %4037 = vrot.lane.b32.xlu1 %v3960_v13, %s5350_s12  ;;  %v4410_v13 = vpack.c.bf16 %v4378_v36, %v4378_v36 }
 0x634   : > { %4293 = vrot.lane.b32.xlu0 %v4200_v38, %s5351_s13  ;;  %v3962_v38 = vpack.c.bf16 %v3930_v46, %v3930_v46 }
 0x635   : > { %v4060_v39 = vpop.permute.xlu2 %4059  ;;  %v4024_v60 = vpop.permute.xlu1 %4023 }
 0x636   : > { %v4280_v47 = vpop.permute.xlu0 %4279  ;;  %v5291_v34 = vld [vmem:[#allocation3 + $0x10] sm:$0xff]  ;;  %4131 = vst.msk [vmem:[#allocation3 + $0x60] sm:$0xf] %vm1806_vm9, %v4060_v39 }
 0x637   : > { %4353 = vst.msk [vmem:[#allocation3 + $0x58] sm:$0xf] %vm2031_vm10, %v4280_v47  ;;  %5253 = vmatmul.msk.bf16.gmra.mxu1 %vm2423_vm13, %v5291_v34 }
 0x638   : > { %4577 = vst.msk [vmem:[#allocation3 + $0x58] sm:$0xf] %vm2256_vm12, %v4504_v14 }
 0x639   : > { %4113 = vst.msk [vmem:[#allocation3 + $0x18] sm:$0xf] %vm1806_vm9, %v4024_v60 }
 0x63b   : > { %4259 = vrot.lane.b32.xlu2 %v4183_v25, %s5351_s13  ;;  %4483 = vrot.lane.b32.xlu1 %v4407_v37, %s5352_s14  ;;  %v7418_v25 = vld [vmem:[%s7646_s6] ss:$0 sm:$0xff] }
 0x63c   : > { %4035 = vrot.lane.b32.xlu0 %v3959_v55, %s5350_s12 }
 0x63d   : > { %v4286_v58 = vpop.permute.xlu2 %4285  ;;  %v4250_v11 = vpop.permute.xlu1 %4249 }
 0x63e   : > { %v4506_v40 = vpop.permute.xlu0 %4505  ;;  %4338 = vst.msk [vmem:[#allocation3 + $0x1c] sm:$0xf] %vm2031_vm10, %v4250_v11 }
 0x63f   : > { %4578 = vst.msk [vmem:[#allocation3 + $0x5c] sm:$0xf] %vm2256_vm12, %v4506_v40 }
 0x643   : > { %4485 = vrot.lane.b32.xlu2 %v4408_v53, %s5352_s14  ;;  %3849 = vrot.lane.b32.xlu1 %v4424_v28, %s5349_s11  ;;  %v4186_v28 = vpack.c.bf16 %v4154_v33, %v4154_v33 }
 0x644   : > { %4261 = vrot.lane.b32.xlu0 %v4184_v18, %s5351_s13 }
 0x645   : > { %v4028_v41 = vpop.permute.xlu2 %4027  ;;  %v3838_v7 = vpop.permute.xlu1 %3837 }
 0x646   : > { %v4248_v61 = vpop.permute.xlu0 %4247  ;;  %v5300_v16 = vld [vmem:[#allocation3 + $0x58] sm:$0xff]  ;;  %4115 = vst.msk [vmem:[#allocation3 + $0x20] sm:$0xf] %vm1806_vm9, %v4028_v41 }
 0x647   : > { %4337 = vst.msk [vmem:[#allocation3 + $0x18] sm:$0xf] %vm2031_vm10, %v4248_v61  ;;  %5262 = vmatmul.msk.bf16.gmra.mxu3 %vm2423_vm13, %v5300_v16 }
 0x648   : > { %4561 = vst.msk [vmem:[#allocation3 + $0x18] sm:$0xf] %vm2256_vm12, %v4472_v62 }
 0x649   : > { %3908 = vst.msk [vmem:[#allocation3 + $0x64] sm:$0xf] %vm1580_vm8, %v3838_v7 }
 0x64b   : > { %4071 = vrot.lane.b32.xlu2 %v3977_v20, %s5350_s12  ;;  %4295 = vrot.lane.b32.xlu1 %v4201_v24, %s5351_s13 }
 0x64c   : > { %3847 = vrot.lane.b32.xlu0 %v7355_v0, %s5349_s11  ;;  %v3961_v0 = vpack.c.bf16 %v3929_v6, %v3929_v6 }
 0x64d   : > { %v4254_v14 = vpop.permute.xlu2 %4253  ;;  %v4284_v43 = vpop.permute.xlu1 %4283 }
 0x64e   : > { %v4474_v4 = vpop.permute.xlu0 %4473  ;;  %4355 = vst.msk [vmem:[#allocation3 + $0x60] sm:$0xf] %vm2031_vm10, %v4284_v43 }
 0x64f   : > { %4562 = vst.msk [vmem:[#allocation3 + $0x1c] sm:$0xf] %vm2256_vm12, %v4474_v4 }
 0x653   : > { %4297 = vrot.lane.b32.xlu2 %v4202_v17, %s5351_s13  ;;  %4521 = vrot.lane.b32.xlu1 %v4426_v30, %s5352_s14 }
 0x654   : > { %4073 = vrot.lane.b32.xlu0 %v3978_v12, %s5350_s12 }
 0x655   : > { %v3840_v59 = vpop.permute.xlu2 %3839  ;;  %v4510_v31 = vpop.permute.xlu1 %4509 }
 0x656   : > { %v4062_v54 = vpop.permute.xlu0 %4061  ;;  %v5292_v48 = vld [vmem:[#allocation3 + $0x18] sm:$0xff]  ;;  %3909 = vst.msk [vmem:[#allocation3 + $0x68] sm:$0xf] %vm1580_vm8, %v3840_v59 }
 0x657   : > { %4132 = vst.msk [vmem:[#allocation3 + $0x64] sm:$0xf] %vm1806_vm9, %v4062_v54  ;;  %5254 = vmatmul.msk.bf16.gmra.mxu1 %vm2423_vm13, %v5292_v48 }
 0x658   : > { %4356 = vst.msk [vmem:[#allocation3 + $0x64] sm:$0xf] %vm2031_vm10, %v4286_v58 }
 0x659   : > { %4580 = vst.msk [vmem:[#allocation3 + $0x64] sm:$0xf] %vm2256_vm12, %v4510_v31 }
 0x65b   : > { %4039 = vrot.lane.b32.xlu2 %v3961_v0, %s5350_s12  ;;  %4263 = vrot.lane.b32.xlu1 %v4185_v63, %s5351_s13 }
 0x65c   : > { %4519 = vrot.lane.b32.xlu0 %v4425_v50, %s5352_s14 }
 0x65d   : > { %v4066_v62 = vpop.permute.xlu2 %4065  ;;  %v4252_v9 = vpop.permute.xlu1 %4251 }
 0x65e   : > { %v4508_v5 = vpop.permute.xlu0 %4507  ;;  %4339 = vst.msk [vmem:[#allocation3 + $0x20] sm:$0xf] %vm2031_vm10, %v4252_v9 }
 0x65f   : > { %4579 = vst.msk [vmem:[#allocation3 + $0x60] sm:$0xf] %vm2256_vm12, %v4508_v5 }
 0x663   : > { %4265 = vrot.lane.b32.xlu2 %v4186_v28, %s5351_s13  ;;  %4489 = vrot.lane.b32.xlu1 %v4410_v13, %s5352_s14 }
 0x664   : > { %4041 = vrot.lane.b32.xlu0 %v3962_v38, %s5350_s12 }
 0x665   : > { %v4512_v39 = vpop.permute.xlu2 %4511  ;;  %v4478_v60 = vpop.permute.xlu1 %4477 }
 0x666   : > { %v4030_v47 = vpop.permute.xlu0 %4029  ;;  %v5301_v34 = vld [vmem:[#allocation3 + $0x60] sm:$0xff] }
 0x667   : > { %4116 = vst.msk [vmem:[#allocation3 + $0x24] sm:$0xf] %vm1806_vm9, %v4030_v47  ;;  %5263 = vmatmul.msk.bf16.gmra.mxu3 %vm2423_vm13, %v5301_v34 }
 0x668   : > { %4340 = vst.msk [vmem:[#allocation3 + $0x24] sm:$0xf] %vm2031_vm10, %v4254_v14 }
 0x669   : > { %4564 = vst.msk [vmem:[#allocation3 + $0x24] sm:$0xf] %vm2256_vm12, %v4478_v60 }
 0x66a   : > { %v4821_v37 = vpop.f32.mrf.mxu3 }
 0x66b   : > { %v4880_v55 = vmul.f32 %v7412_v49, %v4821_v37 }
 0x66c   : > { %4487 = vrot.lane.b32.xlu0 %v4409_v8, %s5352_s14  ;;  %s7432_s14 = scalar_lea.vmem %s7647_s7, %s5269_s26 }
 0x66d   : > { %v4034_v58 = vpop.permute.xlu2 %4033  ;;  %v4064_v11 = vpop.permute.xlu1 %4063  ;;  %v4915_v40 = vadd.f32 %v7418_v25, %v4880_v55 }
 0x66e   : > { %v4476_v27 = vpop.permute.xlu0 %4475  ;;  %4118 = vst.msk [vmem:[#allocation3 + $0x2c] sm:$0xf] %vm1806_vm9, %v4034_v58 }
 0x66f   : > { %4563 = vst.msk [vmem:[#allocation3 + $0x20] sm:$0xf] %vm2256_vm12, %v4476_v27  ;;  %v4947_v22 = vadd.f32 %v4915_v40, %v5482_v19 }
 0x670   : > { %4133 = vst.msk [vmem:[#allocation3 + $0x68] sm:$0xf] %vm1806_vm9, %v4064_v11 }
 0x671   : > { %v4979_v53 = vmax.f32 %v4947_v22, 0.0 }
 0x672   : > { %v4823_v18 = vpop.f32.mrf.mxu3 }
 0x673   : > { %5011 = vst.msk [vmem:[%s7432_s14 + $0x80] sm:$0xff] %vm280_vm0, %v4979_v53  ;;  %v4881_v23 = vmul.f32 %v7412_v49, %v4823_v18 }
 0x674   : > { %v4781_v32 = vpop.f32.mrf.mxu1 }
 0x675   : > { %v4480_v41 = vpop.permute.xlu2 %4479  ;;  %v4916_v19 = vadd.f32 %v7418_v25, %v4881_v23  ;;  %v4864_v7 = vmul.f32 %v7412_v49, %v4781_v32  ;;  %v4290_v20 = vpop.permute.xlu1 %4289 }
 0x676   : > { %v3842_v61 = vpop.permute.xlu0 %3841  ;;  %v5293_v16 = vld [vmem:[#allocation3 + $0x20] sm:$0xff] }
 0x677   : > { %3910 = vst.msk [vmem:[#allocation3 + $0x6c] sm:$0xf] %vm1580_vm8, %v3842_v61  ;;  %v4948_v24 = vadd.f32 %v4916_v19, %v5495_v26  ;;  %v4899_v45 = vadd.f32 %v7418_v25, %v4864_v7  ;;  %5255 = vmatmul.msk.bf16.gmra.mxu1 %vm2423_vm13, %v5293_v16 }
 0x678   : > { %4134 = vst.msk [vmem:[#allocation3 + $0x6c] sm:$0xf] %vm1806_vm9, %v4066_v62 }
 0x679   : > { %4358 = vst.msk [vmem:[#allocation3 + $0x6c] sm:$0xf] %vm2031_vm10, %v4290_v20  ;;  %v4980_v51 = vmax.f32 %v4948_v24, 0.0  ;;  %v4931_v14 = vadd.f32 %v4899_v45, %v5421_v1 }
 0x67b   : > { %5012 = vst.msk [vmem:[%s7432_s14 + $0x88] sm:$0xff] %vm280_vm0, %v4980_v51  ;;  %v4963_v43 = vmax.f32 %v4931_v14, 0.0 }
 0x67c   : > { %v4783_v56 = vpop.f32.mrf.mxu1 }
 0x67d   : > { %v3846_v4 = vpop.permute.xlu2 %3845  ;;  %4995 = vst.msk [vmem:[%s7432_s14] sm:$0xff] %vm280_vm0, %v4963_v43  ;;  %v4865_v26 = vmul.f32 %v7412_v49, %v4783_v56  ;;  %v4032_v30 = vpop.permute.xlu1 %4031 }
 0x67e   : > { %v4288_v17 = vpop.permute.xlu0 %4287  ;;  %3912 = vst.msk [vmem:[#allocation3 + $0x74] sm:$0xf] %vm1580_vm8, %v3846_v4 }
 0x67f   : > { %4357 = vst.msk [vmem:[#allocation3 + $0x68] sm:$0xf] %vm2031_vm10, %v4288_v17  ;;  %v4900_v12 = vadd.f32 %v7418_v25, %v4865_v26 }
 0x680   : > { %4581 = vst.msk [vmem:[#allocation3 + $0x68] sm:$0xf] %vm2256_vm12, %v4512_v39 }
 0x681   : > { %v4932_v1 = vadd.f32 %v4900_v12, %v5425_v2  ;;  %4117 = vst.msk [vmem:[#allocation3 + $0x28] sm:$0xf] %vm1806_vm9, %v4032_v30 }
 0x683   : > { %v4964_v59 = vmax.f32 %v4932_v1, 0.0 }
 0x685   : > { %v4292_v31 = vpop.permute.xlu2 %4291  ;;  %4996 = vst.msk [vmem:[%s7432_s14 + $0x8] sm:$0xff] %vm280_vm0, %v4964_v59  ;;  %v4258_v54 = vpop.permute.xlu1 %4257 }
 0x686   : > { %v4514_v21 = vpop.permute.xlu0 %4513  ;;  %4342 = vst.msk [vmem:[#allocation3 + $0x2c] sm:$0xf] %vm2031_vm10, %v4258_v54 }
 0x687   : > { %4582 = vst.msk [vmem:[#allocation3 + $0x6c] sm:$0xf] %vm2256_vm12, %v4514_v21 }
 0x68a   : > { %v4826_v48 = vpop.f32.mrf.mxu3 }
 0x68b   : > { %v4882_v6 = vmul.f32 %v7412_v49, %v4826_v48 }
 0x68d   : > { %v4518_v44 = vpop.permute.xlu2 %4517  ;;  %v4917_v50 = vadd.f32 %v7418_v25, %v4882_v6  ;;  %v3844_v63 = vpop.permute.xlu1 %3843 }
 0x68e   : > { %v4256_v2 = vpop.permute.xlu0 %4255  ;;  %v5302_v0 = vld [vmem:[#allocation3 + $0x68] sm:$0xff]  ;;  %3911 = vst.msk [vmem:[#allocation3 + $0x70] sm:$0xf] %vm1580_vm8, %v3844_v63 }
 0x68f   : > { %4341 = vst.msk [vmem:[#allocation3 + $0x28] sm:$0xf] %vm2031_vm10, %v4256_v2  ;;  %v4949_v62 = vadd.f32 %v4917_v50, %v5559_v57  ;;  %5264 = vmatmul.msk.bf16.gmra.mxu3 %vm2423_vm13, %v5302_v0 }
 0x690   : > { %4565 = vst.msk [vmem:[#allocation3 + $0x28] sm:$0xf] %vm2256_vm12, %v4480_v41 }
 0x691   : > { %v4981_v9 = vmax.f32 %v4949_v62, 0.0 }
 0x692   : > { %v4828_v5 = vpop.f32.mrf.mxu3 }
 0x693   : > { %5013 = vst.msk [vmem:[%s7432_s14 + $0x90] sm:$0xff] %vm280_vm0, %v4981_v9  ;;  %v4883_v33 = vmul.f32 %v7412_v49, %v4828_v5 }
 0x694   : > { %v4786_v36 = vpop.f32.mrf.mxu1 }
 0x695   : > { %v4260_v46 = vpop.permute.xlu2 %4259  ;;  %v4918_v28 = vadd.f32 %v7418_v25, %v4883_v33  ;;  %v4866_v57 = vmul.f32 %v7412_v49, %v4786_v36  ;;  %v4070_v38 = vpop.permute.xlu1 %4069  ;;  %v7691_v33 = vld [vmem:[#allocation13_spill] sm:$0xff] }
 0x696   : > { %v4482_v13 = vpop.permute.xlu0 %4481  ;;  %4136 = vst.msk [vmem:[#allocation3 + $0x74] sm:$0xf] %vm1806_vm9, %v4070_v38 }
 0x697   : > { %4566 = vst.msk [vmem:[#allocation3 + $0x2c] sm:$0xf] %vm2256_vm12, %v4482_v13  ;;  %v4950_v39 = vadd.f32 %v4918_v28, %v5502_v29  ;;  %v4901_v60 = vadd.f32 %v7418_v25, %v4866_v57 }
 0x699   : > { %v4982_v47 = vmax.f32 %v4950_v39, 0.0  ;;  %v4933_v34 = vadd.f32 %v4901_v60, %v5453_v10 }
 0x69b   : > { %5014 = vst.msk [vmem:[%s7432_s14 + $0x98] sm:$0xff] %vm280_vm0, %v4982_v47  ;;  %v4965_v52 = vmax.f32 %v4933_v34, 0.0 }
 0x69c   : > { %v4788_v8 = vpop.f32.mrf.mxu1 }
 0x69d   : > { %v4486_v37 = vpop.permute.xlu2 %4485  ;;  %4997 = vst.msk [vmem:[%s7432_s14 + $0x10] sm:$0xff] %vm280_vm0, %v4965_v52  ;;  %v4867_v55 = vmul.f32 %v7412_v49, %v4788_v8  ;;  %v4516_v29 = vpop.permute.xlu1 %4515  ;;  %v7692_v8 = vld [vmem:[#allocation15_spill] sm:$0xff] }
 0x69e   : > { %v4068_v58 = vpop.permute.xlu0 %4067  ;;  %v5294_v11 = vld [vmem:[#allocation3 + $0x28] sm:$0xff] }
 0x69f   : > { %4135 = vst.msk [vmem:[#allocation3 + $0x70] sm:$0xf] %vm1806_vm9, %v4068_v58  ;;  %v4902_v40 = vadd.f32 %v7418_v25, %v4867_v55  ;;  %5256 = vmatmul.msk.bf16.gmra.mxu1 %vm2423_vm13, %v5294_v11  ;;  %v7693_v11 = vld [vmem:[#allocation11_spill] sm:$0xff] }
 0x6a0   : > { %4359 = vst.msk [vmem:[#allocation3 + $0x70] sm:$0xf] %vm2031_vm10, %v4292_v31 }
 0x6a1   : > { %4583 = vst.msk [vmem:[#allocation3 + $0x70] sm:$0xf] %vm2256_vm12, %v4516_v29  ;;  %v4934_v10 = vadd.f32 %v4902_v40, %v5469_v15 }
 0x6a3   : > { %v4966_v27 = vmax.f32 %v4934_v10, 0.0 }
 0x6a5   : > { %v4072_v22 = vpop.permute.xlu2 %4071  ;;  %4998 = vst.msk [vmem:[%s7432_s14 + $0x18] sm:$0xff] %vm280_vm0, %v4966_v27  ;;  %v4038_v18 = vpop.permute.xlu1 %4037 }
 0x6a6   : > { %v4294_v53 = vpop.permute.xlu0 %4293  ;;  %4120 = vst.msk [vmem:[#allocation3 + $0x34] sm:$0xf] %vm1806_vm9, %v4038_v18  ;;  %v7694_v18 = vld [vmem:[#allocation5_spill] sm:$0xff] }
 0x6a7   : > { %4360 = vst.msk [vmem:[#allocation3 + $0x74] sm:$0xf] %vm2031_vm10, %v4294_v53 }
 0x6a8   : > { %4584 = vst.msk [vmem:[#allocation3 + $0x74] sm:$0xf] %vm2256_vm12, %v4518_v44 }
 0x6aa   : > { %v4831_v23 = vpop.f32.mrf.mxu3 }
 0x6ab   : > { %v4884_v32 = vmul.f32 %v7412_v49, %v4831_v23 }
 0x6ad   : > { %v4298_v41 = vpop.permute.xlu2 %4297  ;;  %v4919_v19 = vadd.f32 %v7418_v25, %v4884_v32  ;;  %v4484_v7 = vpop.permute.xlu1 %4483 }
 0x6ae   : > { %v4036_v15 = vpop.permute.xlu0 %4035 }
 0x6af   : > { %4119 = vst.msk [vmem:[#allocation3 + $0x30] sm:$0xf] %vm1806_vm9, %v4036_v15  ;;  %v5303_v61 = vld [vmem:[#allocation3 + $0x70] sm:$0xff]  ;;  %v4951_v16 = vadd.f32 %v4919_v19, %v5513_v35 }
 0x6b0   : > { %4343 = vst.msk [vmem:[#allocation3 + $0x30] sm:$0xf] %vm2031_vm10, %v4260_v46  ;;  %5265 = vmatmul.msk.bf16.gmra.mxu3 %vm2423_vm13, %v5303_v61  ;;  %v7695_v61 = vld [vmem:[#allocation21_spill] sm:$0xff] }
 0x6b1   : > { %4567 = vst.msk [vmem:[#allocation3 + $0x30] sm:$0xf] %vm2256_vm12, %v4484_v7  ;;  %v4983_v20 = vmax.f32 %v4951_v16, 0.0 }
 0x6b2   : > { %v4833_v24 = vpop.f32.mrf.mxu3 }
 0x6b3   : > { %5015 = vst.msk [vmem:[%s7432_s14 + $0xa0] sm:$0xff] %vm280_vm0, %v4983_v20  ;;  %v4885_v45 = vmul.f32 %v7412_v49, %v4833_v24 }
 0x6b4   : > { %v4791_v51 = vpop.f32.mrf.mxu1 }
 0x6b5   : > { %v4040_v14 = vpop.permute.xlu2 %4039  ;;  %v4920_v43 = vadd.f32 %v7418_v25, %v4885_v45  ;;  %v4868_v35 = vmul.f32 %v7412_v49, %v4791_v51  ;;  %v3850_v4 = vpop.permute.xlu1 %3849 }
 0x6b6   : > { %v4262_v56 = vpop.permute.xlu0 %4261  ;;  %4121 = vst.msk [vmem:[#allocation3 + $0x38] sm:$0xf] %vm1806_vm9, %v4040_v14 }
 0x6b7   : > { %4344 = vst.msk [vmem:[#allocation3 + $0x34] sm:$0xf] %vm2031_vm10, %v4262_v56  ;;  %v4952_v26 = vadd.f32 %v4920_v43, %v5652_v42  ;;  %v4903_v17 = vadd.f32 %v7418_v25, %v4868_v35  ;;  %v7696_v35 = vld [vmem:[#allocation16_spill] sm:$0xff] }
 0x6b8   : > { %4568 = vst.msk [vmem:[#allocation3 + $0x34] sm:$0xf] %vm2256_vm12, %v4486_v37 }
 0x6b9   : > { %3914 = vst.msk [vmem:[#allocation3 + $0x7c] sm:$0xf] %vm1580_vm8, %v3850_v4  ;;  %v4984_v30 = vmax.f32 %v4952_v26, 0.0  ;;  %v4935_v12 = vadd.f32 %v4903_v17, %v5428_v3  ;;  %v7690_v3 = vld [vmem:[#allocation4_spill] sm:$0xff]  ;;  %v7697_v17 = vld [vmem:[#allocation6_spill] sm:$0xff] }
 0x6bb   : > { %5016 = vst.msk [vmem:[%s7432_s14 + $0xa8] sm:$0xff] %vm280_vm0, %v4984_v30  ;;  %v4967_v1 = vmax.f32 %v4935_v12, 0.0 }
 0x6bc   : > { %v4793_v59 = vpop.f32.mrf.mxu1 }
 0x6bd   : > { %4999 = vst.msk [vmem:[%s7432_s14 + $0x20] sm:$0xff] %vm280_vm0, %v4967_v1  ;;  %v4869_v31 = vmul.f32 %v7412_v49, %v4793_v59  ;;  %v4296_v42 = vpop.permute.xlu1 %4295  ;;  %v4266_v52 = vpop.permute.xlu2 %4265 }
 0x6be   : > { %v3848_v21 = vpop.permute.xlu0 %3847 }
 0x6bf   : > { %3913 = vst.msk [vmem:[#allocation3 + $0x78] sm:$0xf] %vm1580_vm8, %v3848_v21  ;;  %v5295_v54 = vld [vmem:[#allocation3 + $0x30] sm:$0xff]  ;;  %v4904_v48 = vadd.f32 %v7418_v25, %v4869_v31  ;;  %v7698_v21 = vld [vmem:[#allocation12_spill] sm:$0xff] }
 0x6c0   : > { %4137 = vst.msk [vmem:[#allocation3 + $0x78] sm:$0xf] %vm1806_vm9, %v4072_v22  ;;  %5257 = vmatmul.msk.bf16.gmra.mxu1 %vm2423_vm13, %v5295_v54 }
 0x6c1   : > { %4361 = vst.msk [vmem:[#allocation3 + $0x78] sm:$0xf] %vm2031_vm10, %v4296_v42  ;;  %v4936_v6 = vadd.f32 %v4904_v48, %v7690_v3 }
 0x6c3   : > { %v4968_v44 = vmax.f32 %v4936_v6, 0.0 }
 0x6c5   : > { %5000 = vst.msk [vmem:[%s7432_s14 + $0x28] sm:$0xff] %vm280_vm0, %v4968_v44  ;;  %v4522_v2 = vpop.permute.xlu1 %4521  ;;  %v7699_v44 = vld [vmem:[#allocation18_spill] sm:$0xff] }
 0x6c6   : > { %v4074_v50 = vpop.permute.xlu0 %4073 }
 0x6c7   : > { %4138 = vst.msk [vmem:[#allocation3 + $0x7c] sm:$0xf] %vm1806_vm9, %v4074_v50 }
 0x6c8   : > { %4362 = vst.msk [vmem:[#allocation3 + $0x7c] sm:$0xf] %vm2031_vm10, %v4298_v41 }
 0x6c9   : > { %4586 = vst.msk [vmem:[#allocation3 + $0x7c] sm:$0xf] %vm2256_vm12, %v4522_v2 }
 0x6ca   : > { %v4836_v0 = vpop.f32.mrf.mxu3 }
 0x6cb   : > { %v4886_v63 = vmul.f32 %v7412_v49, %v4836_v0 }
 0x6cd   : > { %v4921_v62 = vadd.f32 %v7418_v25, %v4886_v63  ;;  %v4264_v5 = vpop.permute.xlu1 %4263 }
 0x6ce   : > { %v4520_v9 = vpop.permute.xlu0 %4519  ;;  %4345 = vst.msk [vmem:[#allocation3 + $0x38] sm:$0xf] %vm2031_vm10, %v4264_v5 }
 0x6cf   : > { %4585 = vst.msk [vmem:[#allocation3 + $0x78] sm:$0xf] %vm2256_vm12, %v4520_v9  ;;  %v4953_v36 = vadd.f32 %v4921_v62, %v7691_v33  ;;  %v7700_v33 = vld [vmem:[#allocation22_spill] sm:$0xff] }
 0x6d1   : > { %v4985_v46 = vmax.f32 %v4953_v36, 0.0 }
 0x6d2   : > { %v4838_v28 = vpop.f32.mrf.mxu3 }
 0x6d3   : > { %5017 = vst.msk [vmem:[%s7432_s14 + $0xb0] sm:$0xff] %vm280_vm0, %v4985_v46  ;;  %v4887_v57 = vmul.f32 %v7412_v49, %v4838_v28 }
 0x6d4   : > { %v4796_v13 = vpop.f32.mrf.mxu1 }
 0x6d5   : > { %v4922_v38 = vadd.f32 %v7418_v25, %v4887_v57  ;;  %v4870_v39 = vmul.f32 %v7412_v49, %v4796_v13  ;;  %v4490_v34 = vpop.permute.xlu1 %4489  ;;  %v7701_v57 = vld [vmem:[#allocation7_spill] sm:$0xff] }
 0x6d6   : > { %v4042_v60 = vpop.permute.xlu0 %4041  ;;  %v5304_v47 = vld [vmem:[#allocation3 + $0x78] sm:$0xff] }
 0x6d7   : > { %4122 = vst.msk [vmem:[#allocation3 + $0x3c] sm:$0xf] %vm1806_vm9, %v4042_v60  ;;  %v4954_v37 = vadd.f32 %v4922_v38, %v7692_v8  ;;  %v4905_v55 = vadd.f32 %v7418_v25, %v4870_v39  ;;  %5266 = vmatmul.msk.bf16.gmra.mxu3 %vm2423_vm13, %v5304_v47 }
 0x6d8   : > { %4346 = vst.msk [vmem:[#allocation3 + $0x3c] sm:$0xf] %vm2031_vm10, %v4266_v52 }
 0x6d9   : > { %4570 = vst.msk [vmem:[#allocation3 + $0x3c] sm:$0xf] %vm2256_vm12, %v4490_v34  ;;  %v4986_v58 = vmax.f32 %v4954_v37, 0.0  ;;  %v4937_v29 = vadd.f32 %v4905_v55, %v7693_v11  ;;  %v7702_v34 = vld [vmem:[#allocation8_spill] sm:$0xff]  ;;  %v7703_v11 = vld [vmem:[#allocation19_spill] sm:$0xff] }
 0x6db   : > { %5018 = vst.msk [vmem:[%s7432_s14 + $0xb8] sm:$0xff] %vm280_vm0, %v4986_v58  ;;  %v4969_v40 = vmax.f32 %v4937_v29, 0.0 }
 0x6dc   : > { %v4798_v10 = vpop.f32.mrf.mxu1 }
 0x6dd   : > { %5001 = vst.msk [vmem:[%s7432_s14 + $0x30] sm:$0xff] %vm280_vm0, %v4969_v40  ;;  %v4871_v27 = vmul.f32 %v7412_v49, %v4798_v10 }
 0x6de   : > { %v4488_v22 = vpop.permute.xlu0 %4487 }
 0x6df   : > { %4569 = vst.msk [vmem:[#allocation3 + $0x38] sm:$0xf] %vm2256_vm12, %v4488_v22  ;;  %v4906_v53 = vadd.f32 %v7418_v25, %v4871_v27 }
 0x6e1   : > { %v4938_v23 = vadd.f32 %v4906_v53, %v7694_v18 }
 0x6e3   : > { %v4970_v32 = vmax.f32 %v4938_v23, 0.0  ;;  %v7704_v23 = vld [vmem:[#allocation20_spill] sm:$0xff] }
 0x6e5   : > { %5002 = vst.msk [vmem:[%s7432_s14 + $0x38] sm:$0xff] %vm280_vm0, %v4970_v32 }
 0x6e6   : > { %v5296_v41 = vld [vmem:[#allocation3 + $0x38] sm:$0xff] }
 0x6e7   : > { %5258 = vmatmul.msk.bf16.gmra.mxu1 %vm2423_vm13, %v5296_v41 }
 0x6ea   : > { %v4841_v19 = vpop.f32.mrf.mxu3 }
 0x6eb   : > { %v4888_v15 = vmul.f32 %v7412_v49, %v4841_v19 }
 0x6ed   : > { %v4923_v7 = vadd.f32 %v7418_v25, %v4888_v15  ;;  %v7705_v15 = vld [vmem:[#allocation14_spill] sm:$0xff] }
 0x6ef   : > { %v4955_v16 = vadd.f32 %v4923_v7, %v7695_v61 }
 0x6f1   : > { %v4987_v20 = vmax.f32 %v4955_v16, 0.0 }
 0x6f2   : > { %v4843_v24 = vpop.f32.mrf.mxu3 }
 0x6f3   : > { %5019 = vst.msk [vmem:[%s7432_s14 + $0xc0] sm:$0xff] %vm280_vm0, %v4987_v20  ;;  %v4889_v45 = vmul.f32 %v7412_v49, %v4843_v24 }
 0x6f4   : > { %v4801_v51 = vpop.f32.mrf.mxu1 }
 0x6f5   : > { %v4924_v14 = vadd.f32 %v7418_v25, %v4889_v45  ;;  %v4872_v43 = vmul.f32 %v7412_v49, %v4801_v51  ;;  %v7706_v45 = vld [vmem:[#allocation9_spill] sm:$0xff] }
 0x6f7   : > { %v4956_v56 = vadd.f32 %v4924_v14, %v7696_v35  ;;  %v4907_v4 = vadd.f32 %v7418_v25, %v4872_v43 }
 0x6f9   : > { %v4988_v26 = vmax.f32 %v4956_v56, 0.0  ;;  %v4939_v30 = vadd.f32 %v4907_v4, %v7697_v17  ;;  %v7707_v4 = vld [vmem:[#allocation23_spill] sm:$0xff] }
 0x6fb   : > { %5020 = vst.msk [vmem:[%s7432_s14 + $0xc8] sm:$0xff] %vm280_vm0, %v4988_v26  ;;  %v4971_v12 = vmax.f32 %v4939_v30, 0.0 }
 0x6fc   : > { %v4803_v1 = vpop.f32.mrf.mxu1 }
 0x6fd   : > { %5003 = vst.msk [vmem:[%s7432_s14 + $0x40] sm:$0xff] %vm280_vm0, %v4971_v12  ;;  %v4873_v59 = vmul.f32 %v7412_v49, %v4803_v1 }
 0x6ff   : > { %v4908_v31 = vadd.f32 %v7418_v25, %v4873_v59 }
 0x701   : > { %v4940_v42 = vadd.f32 %v4908_v31, %v7698_v21  ;;  %v7708_v21 = vld [vmem:[#allocation24_spill] sm:$0xff] }
 0x703   : > { %v4972_v54 = vmax.f32 %v4940_v42, 0.0 }
 0x705   : > { %5004 = vst.msk [vmem:[%s7432_s14 + $0x48] sm:$0xff] %vm280_vm0, %v4972_v54 }
 0x712   : > { %v4846_v48 = vpop.f32.mrf.mxu3 }
 0x713   : > { %v4890_v3 = vmul.f32 %v7412_v49, %v4846_v48 }
 0x715   : > { %v4925_v6 = vadd.f32 %v7418_v25, %v4890_v3  ;;  %v7709_v3 = vld [vmem:[#allocation10_spill] sm:$0xff] }
 0x717   : > { %v4957_v50 = vadd.f32 %v4925_v6, %v7699_v44 }
 0x719   : > { %v4989_v2 = vmax.f32 %v4957_v50, 0.0 }
 0x71a   : > { %v4848_v0 = vpop.f32.mrf.mxu3 }
 0x71b   : > { %5021 = vst.msk [vmem:[%s7432_s14 + $0xd0] sm:$0xff] %vm280_vm0, %v4989_v2  ;;  %v4891_v63 = vmul.f32 %v7412_v49, %v4848_v0 }
 0x71c   : > { %v4806_v62 = vpop.f32.mrf.mxu1 }
 0x71d   : > { %v4926_v9 = vadd.f32 %v7418_v25, %v4891_v63  ;;  %v4874_v5 = vmul.f32 %v7412_v49, %v4806_v62  ;;  %v7710_v63 = vld [vmem:[#allocation17_spill] sm:$0xff] }
 0x71f   : > { %v4958_v36 = vadd.f32 %v4926_v9, %v7700_v33  ;;  %v4909_v46 = vadd.f32 %v7418_v25, %v4874_v5 }
 0x721   : > { %v4990_v28 = vmax.f32 %v4958_v36, 0.0  ;;  %v4941_v13 = vadd.f32 %v4909_v46, %v7701_v57 }
 0x723   : > { %5022 = vst.msk [vmem:[%s7432_s14 + $0xd8] sm:$0xff] %vm280_vm0, %v4990_v28  ;;  %v4973_v38 = vmax.f32 %v4941_v13, 0.0 }
 0x724   : > { %v4808_v39 = vpop.f32.mrf.mxu1 }
 0x725   : > { %5005 = vst.msk [vmem:[%s7432_s14 + $0x50] sm:$0xff] %vm280_vm0, %v4973_v38  ;;  %v4875_v60 = vmul.f32 %v7412_v49, %v4808_v39 }
 0x727   : > { %v4910_v47 = vadd.f32 %v7418_v25, %v4875_v60 }
 0x729   : > { %v4942_v52 = vadd.f32 %v4910_v47, %v7702_v34 }
 0x72b   : > { %v4974_v8 = vmax.f32 %v4942_v52, 0.0 }
 0x72d   : > { %5006 = vst.msk [vmem:[%s7432_s14 + $0x58] sm:$0xff] %vm280_vm0, %v4974_v8 }
 0x733   : > { %v4851_v37 = vpop.f32.mrf.mxu3 }
 0x734   : > { %v4892_v55 = vmul.f32 %v7412_v49, %v4851_v37 }
 0x736   : > { %v4927_v58 = vadd.f32 %v7418_v25, %v4892_v55 }
 0x738   : > { %v4959_v29 = vadd.f32 %v4927_v58, %v7703_v11 }
 0x73a   : > { %v4991_v40 = vmax.f32 %v4959_v29, 0.0 }
 0x73b   : > { %v4853_v10 = vpop.f32.mrf.mxu3 }
 0x73c   : > { %5023 = vst.msk [vmem:[%s7432_s14 + $0xe0] sm:$0xff] %vm280_vm0, %v4991_v40  ;;  %v4893_v27 = vmul.f32 %v7412_v49, %v4853_v10 }
 0x73d   : > { %v4811_v22 = vpop.f32.mrf.mxu1 }
 0x73e   : > { %v4928_v53 = vadd.f32 %v7418_v25, %v4893_v27  ;;  %v4876_v18 = vmul.f32 %v7412_v49, %v4811_v22 }
 0x740   : > { %v4960_v32 = vadd.f32 %v4928_v53, %v7704_v23  ;;  %v4911_v41 = vadd.f32 %v7418_v25, %v4876_v18 }
 0x742   : > { %v4992_v19 = vmax.f32 %v4960_v32, 0.0  ;;  %v4943_v7 = vadd.f32 %v4911_v41, %v7705_v15 }
 0x744   : > { %5024 = vst.msk [vmem:[%s7432_s14 + $0xe8] sm:$0xff] %vm280_vm0, %v4992_v19  ;;  %v4975_v61 = vmax.f32 %v4943_v7, 0.0 }
 0x745   : > { %v4813_v16 = vpop.f32.mrf.mxu1 }
 0x746   : > { %5007 = vst.msk [vmem:[%s7432_s14 + $0x60] sm:$0xff] %vm280_vm0, %v4975_v61  ;;  %v4877_v20 = vmul.f32 %v7412_v49, %v4813_v16 }
 0x748   : > { %v4912_v24 = vadd.f32 %v7418_v25, %v4877_v20 }
 0x74a   : > { %v4944_v51 = vadd.f32 %v4912_v24, %v7706_v45 }
 0x74c   : > { %v4976_v14 = vmax.f32 %v4944_v51, 0.0 }
 0x74e   : > { %5008 = vst.msk [vmem:[%s7432_s14 + $0x68] sm:$0xff] %vm280_vm0, %v4976_v14 }
 0x75a   : > { %v4856_v43 = vpop.f32.mrf.mxu3 }
 0x75b   : > { %v4894_v35 = vmul.f32 %v7412_v49, %v4856_v43 }
 0x75d   : > { %v4929_v56 = vadd.f32 %v7418_v25, %v4894_v35 }
 0x75f   : > { %v4961_v26 = vadd.f32 %v4929_v56, %v7707_v4 }
 0x761   : > { %v4993_v17 = vmax.f32 %v4961_v26, 0.0 }
 0x762   : > { %v4858_v30 = vpop.f32.mrf.mxu3 }
 0x763   : > { %5025 = vst.msk [vmem:[%s7432_s14 + $0xf0] sm:$0xff] %vm280_vm0, %v4993_v17  ;;  %v4895_v12 = vmul.f32 %v7412_v49, %v4858_v30 }
 0x764   : > { %v4816_v1 = vpop.f32.mrf.mxu1 }
 0x765   : > { %v4930_v59 = vadd.f32 %v7418_v25, %v4895_v12  ;;  %v4878_v31 = vmul.f32 %v7412_v49, %v4816_v1 }
 0x767   : > { %v4962_v42 = vadd.f32 %v4930_v59, %v7708_v21  ;;  %v4913_v54 = vadd.f32 %v7418_v25, %v4878_v31 }
 0x769   : > { %v4994_v48 = vmax.f32 %v4962_v42, 0.0  ;;  %v4945_v6 = vadd.f32 %v4913_v54, %v7709_v3 }
 0x76b   : > { %5026 = vst.msk [vmem:[%s7432_s14 + $0xf8] sm:$0xff] %vm280_vm0, %v4994_v48  ;;  %v4977_v44 = vmax.f32 %v4945_v6, 0.0 }
 0x76c   : > { %v4818_v50 = vpop.f32.mrf.mxu1 }
 0x76d   : > { %5009 = vst.msk [vmem:[%s7432_s14 + $0x70] sm:$0xff] %vm280_vm0, %v4977_v44  ;;  %v4879_v2 = vmul.f32 %v7412_v49, %v4818_v50 }
 0x76f   : > { %v4914_v0 = vadd.f32 %v7418_v25, %v4879_v2 }
 0x771   : > { %v4946_v62 = vadd.f32 %v4914_v0, %v7710_v63 }
 0x773   : > { %v4978_v9 = vmax.f32 %v4946_v62, 0.0 }
 0x775   : > { %5010 = vst.msk [vmem:[%s7432_s14 + $0x78] sm:$0xff] %vm280_vm0, %v4978_v9 }
 0x776 PF: > { %s17_s24 = sadd.s32 1, %s5342_s24  }
 0x777   : > { %p14_p4 = scmp.ge.s32.totalorder %s17_s24, 4  }
 0x779   :  { %16 = sbr.rel (!%p14_p4) target bundleno = 1 (0x1), region = 81 }

</bundles_post_ra>
